<compile_context>
chip_gen: v7x
topology: tpu7x:2x2x1
jax: 0.10.0
libtpu: 0.0.40
codegen_flags: <defaults>
</compile_context>

<pallas_src>
import jax
import jax.numpy as jnp
from jax import lax
from jax.experimental import pallas as pl
from jax.experimental.pallas import tpu as pltpu

BF16 = jnp.bfloat16
F32 = jnp.float32


# ----------------------------- Pallas kernels ------------------------------ #

def _conv_mm_kernel(pat_ref, w_ref, b_ref, o_ref):
    """Conv-as-matmul for one net / one batch tile: (M,K)@(K,C) + b, ReLU, bf16."""
    y = jnp.dot(pat_ref[...], w_ref[...], preferred_element_type=F32)
    o_ref[...] = jnp.maximum(y + b_ref[...], 0.0).astype(o_ref.dtype)


def _qnet_kernel(feat_ref, act_ref, wl_ref, bl_ref, w0s_ref, w0a_ref, b0_ref,
                 wf1_ref, bf1_ref, wf2_ref, bf2_ref, wq_ref, bq_ref, o_ref):
    """Linear(2592,200) + fc0/fc1/fc2 + quantile head for one net / batch tile.

    Every contraction is a single large matmul (K = 2592 / 200+A / 512 / 512),
    bf16 operands, f32 MXU accumulation.
    """
    obs = jnp.dot(feat_ref[...], wl_ref[...], preferred_element_type=F32)
    obs = jnp.maximum(obs + bl_ref[...], 0.0).astype(BF16)            # (Bt, 200)

    # cat([obs, action], 1) @ W_fc0  ==  obs @ W0[:200] + action @ W0[200:]
    h = (jnp.dot(obs, w0s_ref[...], preferred_element_type=F32)
         + jnp.dot(act_ref[...], w0a_ref[...], preferred_element_type=F32)
         + b0_ref[...])
    h = jnp.maximum(h, 0.0).astype(BF16)
    h = jnp.maximum(jnp.dot(h, wf1_ref[...], preferred_element_type=F32)
                    + bf1_ref[...], 0.0).astype(BF16)
    h = jnp.maximum(jnp.dot(h, wf2_ref[...], preferred_element_type=F32)
                    + bf2_ref[...], 0.0).astype(BF16)
    q = jnp.dot(h, wq_ref[...], preferred_element_type=F32) + bq_ref[...]
    o_ref[...] = q.astype(o_ref.dtype)


# ------------------------------- JAX glue ---------------------------------- #

def im2col(x, ksize, stride):
    """x: (N, H, W, C) NHWC -> (N, out_h*out_w, ksize*ksize*C). Layout only."""
    N, H, W, C = x.shape
    out_h = (H - ksize) // stride + 1
    out_w = (W - ksize) // stride + 1
    cols = []
    for kh in range(ksize):
        for kw in range(ksize):
            cols.append(x[:, kh:kh + (out_h - 1) * stride + 1:stride,
                          kw:kw + (out_w - 1) * stride + 1:stride, :])
    p = jnp.stack(cols, axis=3)                       # (N, oh, ow, k*k, C)
    return p.reshape(N, out_h * out_w, ksize * ksize * C), out_h, out_w


def _pick_tile(total, target, align=1):
    """Largest divisor of `total` that is <= target and align-divisible
    (or the full extent, which always satisfies the (8,128) block rule)."""
    for t in range(min(total, target), 0, -1):
        if total % t == 0 and (t % align == 0 or t == total):
            return t
    return total


def prepare_params(params):
    """One-time prep: stack nets, OIHW->matmul weights, fold the NCHW flatten
    permutation into w_lin, cast matmul weights to bf16 (biases stay f32)."""
    def stk(k):
        return jnp.stack([p[k] for p in params])

    c2 = params[0]["w_conv2"].shape[0]                # 32 conv2 out channels
    d_out = params[0]["w_lin"].shape[1]               # 200
    n_sp = params[0]["w_lin"].shape[0] // c2          # 81 spatial positions

    w1m = jnp.stack([jnp.transpose(p["w_conv1"], (2, 3, 1, 0))
                     .reshape(-1, p["w_conv1"].shape[0]) for p in params])
    w2m = jnp.stack([jnp.transpose(p["w_conv2"], (2, 3, 1, 0))
                     .reshape(-1, p["w_conv2"].shape[0]) for p in params])
    # PyTorch NCHW-flatten row index is c*81 + s; reorder rows to s*32 + c so
    # the kernel's (b, s, c)-ordered feature slab hits the right weights.
    wl2 = jnp.stack([p["w_lin"].reshape(c2, n_sp, d_out).transpose(1, 0, 2)
                     .reshape(n_sp * c2, d_out) for p in params])
    w0 = stk("w_fc0")
    return dict(
        w1=w1m.astype(BF16), b1=stk("b_conv1")[:, None, :],
        w2=w2m.astype(BF16), b2=stk("b_conv2")[:, None, :],
        wl=wl2.astype(BF16), bl=stk("b_lin")[:, None, :],
        w0s=w0[:, :d_out, :].astype(BF16), w0a=w0[:, d_out:, :].astype(BF16),
        b0=stk("b_fc0")[:, None, :],
        wf1=stk("w_fc1").astype(BF16), bf1=stk("b_fc1")[:, None, :],
        wf2=stk("w_fc2").astype(BF16), bf2=stk("b_fc2")[:, None, :],
        wq=stk("w_last").astype(BF16), bq=stk("b_last")[:, None, :],
    )


def critic_forward_pallas(state, action, prep):
    """state: (n_nets, B, 3, 84, 84) NCHW, action: (B, A) -> (B, n_nets, n_q)."""
    # TODO(synk): the 5-D "high dim" obs branch of Mlp.forward (obs.view(-1,C,H,W)
    # + re-view) is not exercised here; only the standard 4-D obs path is.
    n_nets, B = state.shape[0], state.shape[1]
    x = jnp.transpose(state, (0, 1, 3, 4, 2)).astype(BF16)   # NCHW -> NHWC, bf16
    x = x.reshape(n_nets * B, *x.shape[2:])

    # ---- stage 1: conv1 as matmul over im2col patches, coarsened grid -------
    # TODO(synk): conv1 patches are still materialized by XLA im2col (a ~3.6x
    # HBM expansion); in-VMEM strided patch extraction is not implemented.
    pat1, oh1, ow1 = im2col(x, 8, 4)                          # (n*B, 400, 192)
    m1, k1 = oh1 * ow1, pat1.shape[-1]
    c1 = prep["w1"].shape[-1]
    pat1 = pat1.reshape(n_nets, B * m1, k1)
    bt1 = _pick_tile(B, 4)                                    # ~1600 rows / step
    y1 = pl.pallas_call(
        _conv_mm_kernel,
        out_shape=jax.ShapeDtypeStruct((n_nets, B * m1, c1), BF16),
        grid=(n_nets, B // bt1),
        in_specs=[
            pl.BlockSpec((None, bt1 * m1, k1), lambda n, b: (n, b, 0)),
            pl.BlockSpec((None, k1, c1), lambda n, b: (n, 0, 0)),
            pl.BlockSpec((None, 1, c1), lambda n, b: (n, 0, 0)),
        ],
        out_specs=pl.BlockSpec((None, bt1 * m1, c1), lambda n, b: (n, b, 0)),
        compiler_params=pltpu.CompilerParams(
            dimension_semantics=("parallel", "parallel")),
        cost_estimate=pl.CostEstimate(
            flops=2 * n_nets * B * m1 * k1 * c1, transcendentals=0,
            bytes_accessed=2 * (n_nets * B * m1 * (k1 + c1) + n_nets * k1 * c1)),
    )(pat1, prep["w1"], prep["b1"])

    # ---- stage 2: conv2 as ONE (B*81, 256) @ (256, 32) matmul per net -------
    y1 = y1.reshape(n_nets * B, oh1, ow1, c1)
    pat2, oh2, ow2 = im2col(y1, 4, 2)                         # (n*B, 81, 256)
    m2, k2 = oh2 * ow2, pat2.shape[-1]
    c2 = prep["w2"].shape[-1]
    pat2 = pat2.reshape(n_nets, B * m2, k2)                   # (b, s) rows; no transpose
    bt2 = _pick_tile(B, 16, align=8)                          # 81*bt2 rows / step
    y2 = pl.pallas_call(
        _conv_mm_kernel,
        out_shape=jax.ShapeDtypeStruct((n_nets, B * m2, c2), BF16),
        grid=(n_nets, B // bt2),
        in_specs=[
            pl.BlockSpec((None, bt2 * m2, k2), lambda n, b: (n, b, 0)),
            pl.BlockSpec((None, k2, c2), lambda n, b: (n, 0, 0)),
            pl.BlockSpec((None, 1, c2), lambda n, b: (n, 0, 0)),
        ],
        out_specs=pl.BlockSpec((None, bt2 * m2, c2), lambda n, b: (n, b, 0)),
        compiler_params=pltpu.CompilerParams(
            dimension_semantics=("parallel", "parallel")),
        cost_estimate=pl.CostEstimate(
            flops=2 * n_nets * B * m2 * k2 * c2, transcendentals=0,
            bytes_accessed=2 * (n_nets * B * m2 * (k2 + c2) + n_nets * k2 * c2)),
    )(pat2, prep["w2"], prep["b2"])

    # Row-major reshape (b*81+s, c) -> (b, s*32+c): exactly the [s, c] feature
    # order the pre-folded w_lin expects.  Pure metadata for XLA, no relayout.
    feat = y2.reshape(n_nets, B, m2 * c2)                     # (n, B, 2592)

    # ---- stage 3: Linear + MLP head, gridded over (net, batch tile) ---------
    A = action.shape[1]
    d_feat = feat.shape[-1]
    d_out = prep["wl"].shape[-1]
    H = prep["wf1"].shape[-1]
    Q = prep["wq"].shape[-1]
    act_bf = action.astype(BF16)
    bt3 = _pick_tile(B, 128, align=8)

    mlp_flops = 2 * n_nets * B * (d_feat * d_out + d_out * H + A * H
                                  + 2 * H * H + H * Q)
    mlp_bytes = (2 * (n_nets * B * d_feat + B * A
                      + n_nets * (d_feat * d_out + (d_out + A) * H
                                  + 2 * H * H + H * Q))
                 + 4 * n_nets * B * Q)

    out = pl.pallas_call(
        _qnet_kernel,
        out_shape=jax.ShapeDtypeStruct((n_nets, B, Q), F32),
        grid=(n_nets, B // bt3),     # batch innermost: per-net weights keep the
        in_specs=[                   # same block index -> not re-DMA'd across b
            pl.BlockSpec((None, bt3, d_feat), lambda n, b: (n, b, 0)),    # feat
            pl.BlockSpec((bt3, A), lambda n, b: (b, 0)),                  # action
            pl.BlockSpec((None, d_feat, d_out), lambda n, b: (n, 0, 0)),  # wl
            pl.BlockSpec((None, 1, d_out), lambda n, b: (n, 0, 0)),       # bl
            pl.BlockSpec((None, d_out, H), lambda n, b: (n, 0, 0)),       # w0s
            pl.BlockSpec((None, A, H), lambda n, b: (n, 0, 0)),           # w0a
            pl.BlockSpec((None, 1, H), lambda n, b: (n, 0, 0)),           # b0
            pl.BlockSpec((None, H, H), lambda n, b: (n, 0, 0)),           # wf1
            pl.BlockSpec((None, 1, H), lambda n, b: (n, 0, 0)),           # bf1
            pl.BlockSpec((None, H, H), lambda n, b: (n, 0, 0)),           # wf2
            pl.BlockSpec((None, 1, H), lambda n, b: (n, 0, 0)),           # bf2
            pl.BlockSpec((None, H, Q), lambda n, b: (n, 0, 0)),           # wq
            pl.BlockSpec((None, 1, Q), lambda n, b: (n, 0, 0)),           # bq
        ],
        out_specs=pl.BlockSpec((None, bt3, Q), lambda n, b: (n, b, 0)),
        compiler_params=pltpu.CompilerParams(
            dimension_semantics=("parallel", "parallel"),
            vmem_limit_bytes=32 * 1024 * 1024),
        cost_estimate=pl.CostEstimate(flops=mlp_flops, transcendentals=0,
                                      bytes_accessed=mlp_bytes),
    )(feat, act_bf, prep["wl"], prep["bl"], prep["w0s"], prep["w0a"], prep["b0"],
      prep["wf1"], prep["bf1"], prep["wf2"], prep["bf2"], prep["wq"], prep["bq"])

    return jnp.transpose(out, (1, 0, 2))                      # (B, n_nets, n_q)


def critic_forward_ref(state, action, params):
    """Pure-JAX reference with the same bf16-operand / f32-accumulate policy."""
    outs = []
    act_bf = action.astype(BF16)
    for i, p in enumerate(params):
        x = state[i].astype(BF16)
        x = lax.conv_general_dilated(x, p["w_conv1"].astype(BF16), (4, 4), "VALID",
                                     dimension_numbers=("NCHW", "OIHW", "NCHW"),
                                     preferred_element_type=F32)
        x = jnp.maximum(x + p["b_conv1"][None, :, None, None], 0.0).astype(BF16)
        x = lax.conv_general_dilated(x, p["w_conv2"].astype(BF16), (2, 2), "VALID",
                                     dimension_numbers=("NCHW", "OIHW", "NCHW"),
                                     preferred_element_type=F32)
        x = jnp.maximum(x + p["b_conv2"][None, :, None, None], 0.0)
        x = x.reshape(x.shape[0], -1).astype(BF16)            # PyTorch NCHW flatten
        h = jnp.maximum(jnp.dot(x, p["w_lin"].astype(BF16),
                                preferred_element_type=F32) + p["b_lin"], 0.0)
        h = jnp.concatenate([h.astype(BF16), act_bf], axis=1)
        for wk, bk in (("w_fc0", "b_fc0"), ("w_fc1", "b_fc1"), ("w_fc2", "b_fc2")):
            h = jnp.maximum(jnp.dot(h, p[wk].astype(BF16),
                                    preferred_element_type=F32) + p[bk],
                            0.0).astype(BF16)
        outs.append(jnp.dot(h, p["w_last"].astype(BF16),
                            preferred_element_type=F32) + p["b_last"])
    return jnp.stack(outs, axis=1)


def init_params(key, n_nets, action_dim, n_quantiles, d_out=200):
    """Deterministic, PyTorch-default-style U(-1/sqrt(fan_in), 1/sqrt(fan_in))."""
    state_dim = d_out  # Mlp.forward requires state_dim == D_out == 200

    def uni(k, shape, fan_in):
        b = 1.0 / jnp.sqrt(jnp.float32(fan_in))
        return jax.random.uniform(k, shape, jnp.float32, -b, b)

    params = []
    for _ in range(n_nets):
        key, *ks = jax.random.split(key, 15)
        fc_in = state_dim + action_dim
        params.append({
            "w_conv1": uni(ks[0], (16, 3, 8, 8), 3 * 8 * 8),   # OIHW (PyTorch)
            "b_conv1": uni(ks[1], (16,), 3 * 8 * 8),
            "w_conv2": uni(ks[2], (32, 16, 4, 4), 16 * 4 * 4),
            "b_conv2": uni(ks[3], (32,), 16 * 4 * 4),
            "w_lin":   uni(ks[4], (2592, d_out), 2592),        # stored (in, out)
            "b_lin":   uni(ks[5], (d_out,), 2592),
            "w_fc0":   uni(ks[6], (fc_in, 512), fc_in),
            "b_fc0":   uni(ks[7], (512,), fc_in),
            "w_fc1":   uni(ks[8], (512, 512), 512),
            "b_fc1":   uni(ks[9], (512,), 512),
            "w_fc2":   uni(ks[10], (512, 512), 512),
            "b_fc2":   uni(ks[11], (512,), 512),
            "w_last":  uni(ks[12], (512, n_quantiles), 512),
            "b_last":  uni(ks[13], (n_quantiles,), 512),
        })
    return params


if __name__ == "__main__":
    key = jax.random.PRNGKey(0)
    n_nets, B, action_dim, n_quantiles = 2, 2, 4, 8
    k_state, k_action, k_param = jax.random.split(key, 3)
    # 84x84 is required by Linear(2592, 200) in the module definition.
    state = jax.random.normal(k_state, (n_nets, B, 3, 84, 84), jnp.float32)
    action = jax.random.normal(k_action, (B, action_dim), jnp.float32)
    params = init_params(k_param, n_nets, action_dim, n_quantiles)
    prep = prepare_params(params)   # one-time layout/dtype prep, not per-forward

    fwd = jax.jit(critic_forward_pallas)
    quantiles = jax.block_until_ready(fwd(state, action, prep))
    ref = jax.block_until_ready(critic_forward_ref(state, action, params))

    assert quantiles.shape == (B, n_nets, n_quantiles), quantiles.shape
    max_err = float(jnp.max(jnp.abs(quantiles - ref)))
    assert jnp.allclose(quantiles, ref, atol=2e-3, rtol=2e-3), max_err
    print("KERNEL_OK")
</pallas_src>

<mosaic_0001>
module attributes {stable_mosaic.version = 11 : i64} {
  func.func @_conv_mm_kernel(%arg0: i32, %arg1: i32, %arg2: memref<1x800x192xbf16, #tpu.memory_space<vmem>>, %arg3: memref<1x192x16xbf16, #tpu.memory_space<vmem>>, %arg4: memref<1x1x16xf32, #tpu.memory_space<vmem>>, %arg5: memref<1x800x16xbf16, #tpu.memory_space<vmem>>) attributes {dimension_semantics = [#tpu.dimension_semantics<parallel>, #tpu.dimension_semantics<parallel>], iteration_bounds = array<i64: 2, 1>, scalar_prefetch = 0 : i64, scratch_operands = 0 : i64, tpu.core_type = #tpu.core_type<tc>, window_params = [{transform_indices = @transform_0, window_bounds = array<i64: 1, 800, 192>}, {transform_indices = @transform_1, window_bounds = array<i64: 1, 192, 16>}, {transform_indices = @transform_2, window_bounds = array<i64: 1, 1, 16>}, {transform_indices = @transform_3, window_bounds = array<i64: 1, 800, 16>}]} {
    %c0 = arith.constant 0 : index
    %c0_0 = arith.constant 0 : index
    %c0_1 = arith.constant 0 : index
    %0 = vector.load %arg2[%c0, %c0_0, %c0_1] : memref<1x800x192xbf16, #tpu.memory_space<vmem>>, vector<1x800x192xbf16>
    %1 = vector.shape_cast %0 : vector<1x800x192xbf16> to vector<800x192xbf16>
    %c0_2 = arith.constant 0 : index
    %c0_3 = arith.constant 0 : index
    %c0_4 = arith.constant 0 : index
    %2 = vector.load %arg3[%c0_2, %c0_3, %c0_4] : memref<1x192x16xbf16, #tpu.memory_space<vmem>>, vector<1x192x16xbf16>
    %3 = vector.shape_cast %2 : vector<1x192x16xbf16> to vector<192x16xbf16>
    %cst = arith.constant dense<0.000000e+00> : vector<800x16xf32>
    %4 = tpu.matmul %1, %3, %cst {dimension_numbers = #tpu.dot_dimension_numbers<[1], [0], [0], [1], [0, 0, 1, 1], [], []>} : vector<800x192xbf16>, vector<192x16xbf16>, vector<800x16xf32> -> vector<800x16xf32>
    %c0_5 = arith.constant 0 : index
    %c0_6 = arith.constant 0 : index
    %c0_7 = arith.constant 0 : index
    %5 = vector.load %arg4[%c0_5, %c0_6, %c0_7] : memref<1x1x16xf32, #tpu.memory_space<vmem>>, vector<1x1x16xf32>
    %6 = vector.shape_cast %5 : vector<1x1x16xf32> to vector<1x16xf32>
    %7 = vector.broadcast %6 : vector<1x16xf32> to vector<800x16xf32>
    %8 = arith.addf %4, %7 : vector<800x16xf32>
    %cst_8 = arith.constant 0.000000e+00 : f32
    %9 = vector.broadcast %cst_8 : f32 to vector<800x16xf32>
    %10 = arith.maximumf %8, %9 : vector<800x16xf32>
    %11 = arith.truncf %10 : vector<800x16xf32> to vector<800x16xbf16>
    %c0_9 = arith.constant 0 : index
    %c0_10 = arith.constant 0 : index
    %c0_11 = arith.constant 0 : index
    %12 = vector.load %arg5[%c0_9, %c0_10, %c0_11] : memref<1x800x16xbf16, #tpu.memory_space<vmem>>, vector<1x800x16xbf16>
    %13 = vector.shape_cast %12 : vector<1x800x16xbf16> to vector<800x16xbf16>
    %14 = vector.shape_cast %11 : vector<800x16xbf16> to vector<1x800x16xbf16>
    tpu.vector_store %arg5[%c0_9, %c0_10, %c0_11], %14 {strides = array<i32>} : memref<1x800x16xbf16, #tpu.memory_space<vmem>>, vector<1x800x16xbf16>,
    return
  }
  func.func @transform_0(%arg0: i32, %arg1: i32) -> (i32, i32, i32) {
    %c0_i32 = arith.constant 0 : i32
    %c0_i32_0 = arith.constant 0 : i32
    return %arg0, %arg1, %c0_i32 : i32, i32, i32
  }
  func.func @transform_1(%arg0: i32, %arg1: i32) -> (i32, i32, i32) {
    %c0_i32 = arith.constant 0 : i32
    %c0_i32_0 = arith.constant 0 : i32
    %c0_i32_1 = arith.constant 0 : i32
    return %arg0, %c0_i32, %c0_i32_0 : i32, i32, i32
  }
  func.func @transform_2(%arg0: i32, %arg1: i32) -> (i32, i32, i32) {
    %c0_i32 = arith.constant 0 : i32
    %c0_i32_0 = arith.constant 0 : i32
    %c0_i32_1 = arith.constant 0 : i32
    return %arg0, %c0_i32, %c0_i32_0 : i32, i32, i32
  }
  func.func @transform_3(%arg0: i32, %arg1: i32) -> (i32, i32, i32) {
    %c0_i32 = arith.constant 0 : i32
    %c0_i32_0 = arith.constant 0 : i32
    return %arg0, %arg1, %c0_i32 : i32, i32, i32
  }
}

module attributes {stable_mosaic.version = 11 : i64} {
  func.func @_conv_mm_kernel(%arg0: i32, %arg1: i32, %arg2: memref<1x162x256xbf16, #tpu.memory_space<vmem>>, %arg3: memref<1x256x32xbf16, #tpu.memory_space<vmem>>, %arg4: memref<1x1x32xf32, #tpu.memory_space<vmem>>, %arg5: memref<1x162x32xbf16, #tpu.memory_space<vmem>>) attributes {dimension_semantics = [#tpu.dimension_semantics<parallel>, #tpu.dimension_semantics<parallel>], iteration_bounds = array<i64: 2, 1>, scalar_prefetch = 0 : i64, scratch_operands = 0 : i64, tpu.core_type = #tpu.core_type<tc>, window_params = [{transform_indices = @transform_0, window_bounds = array<i64: 1, 162, 256>}, {transform_indices = @transform_1, window_bounds = array<i64: 1, 256, 32>}, {transform_indices = @transform_2, window_bounds = array<i64: 1, 1, 32>}, {transform_indices = @transform_3, window_bounds = array<i64: 1, 162, 32>}]} {
    %c0 = arith.constant 0 : index
    %c0_0 = arith.constant 0 : index
    %c0_1 = arith.constant 0 : index
    %0 = vector.load %arg2[%c0, %c0_0, %c0_1] : memref<1x162x256xbf16, #tpu.memory_space<vmem>>, vector<1x162x256xbf16>
    %1 = vector.shape_cast %0 : vector<1x162x256xbf16> to vector<162x256xbf16>
    %c0_2 = arith.constant 0 : index
    %c0_3 = arith.constant 0 : index
    %c0_4 = arith.constant 0 : index
    %2 = vector.load %arg3[%c0_2, %c0_3, %c0_4] : memref<1x256x32xbf16, #tpu.memory_space<vmem>>, vector<1x256x32xbf16>
    %3 = vector.shape_cast %2 : vector<1x256x32xbf16> to vector<256x32xbf16>
    %cst = arith.constant dense<0.000000e+00> : vector<162x32xf32>
    %4 = tpu.matmul %1, %3, %cst {dimension_numbers = #tpu.dot_dimension_numbers<[1], [0], [0], [1], [0, 0, 1, 1], [], []>} : vector<162x256xbf16>, vector<256x32xbf16>, vector<162x32xf32> -> vector<162x32xf32>
    %c0_5 = arith.constant 0 : index
    %c0_6 = arith.constant 0 : index
    %c0_7 = arith.constant 0 : index
    %5 = vector.load %arg4[%c0_5, %c0_6, %c0_7] : memref<1x1x32xf32, #tpu.memory_space<vmem>>, vector<1x1x32xf32>
    %6 = vector.shape_cast %5 : vector<1x1x32xf32> to vector<1x32xf32>
    %7 = vector.broadcast %6 : vector<1x32xf32> to vector<162x32xf32>
    %8 = arith.addf %4, %7 : vector<162x32xf32>
    %cst_8 = arith.constant 0.000000e+00 : f32
    %9 = vector.broadcast %cst_8 : f32 to vector<162x32xf32>
    %10 = arith.maximumf %8, %9 : vector<162x32xf32>
    %11 = arith.truncf %10 : vector<162x32xf32> to vector<162x32xbf16>
    %c0_9 = arith.constant 0 : index
    %c0_10 = arith.constant 0 : index
    %c0_11 = arith.constant 0 : index
    %12 = vector.load %arg5[%c0_9, %c0_10, %c0_11] : memref<1x162x32xbf16, #tpu.memory_space<vmem>>, vector<1x162x32xbf16>
    %13 = vector.shape_cast %12 : vector<1x162x32xbf16> to vector<162x32xbf16>
    %14 = vector.shape_cast %11 : vector<162x32xbf16> to vector<1x162x32xbf16>
    tpu.vector_store %arg5[%c0_9, %c0_10, %c0_11], %14 {strides = array<i32>} : memref<1x162x32xbf16, #tpu.memory_space<vmem>>, vector<1x162x32xbf16>,
    return
  }
  func.func @transform_0(%arg0: i32, %arg1: i32) -> (i32, i32, i32) {
    %c0_i32 = arith.constant 0 : i32
    %c0_i32_0 = arith.constant 0 : i32
    return %arg0, %arg1, %c0_i32 : i32, i32, i32
  }
  func.func @transform_1(%arg0: i32, %arg1: i32) -> (i32, i32, i32) {
    %c0_i32 = arith.constant 0 : i32
    %c0_i32_0 = arith.constant 0 : i32
    %c0_i32_1 = arith.constant 0 : i32
    return %arg0, %c0_i32, %c0_i32_0 : i32, i32, i32
  }
  func.func @transform_2(%arg0: i32, %arg1: i32) -> (i32, i32, i32) {
    %c0_i32 = arith.constant 0 : i32
    %c0_i32_0 = arith.constant 0 : i32
    %c0_i32_1 = arith.constant 0 : i32
    return %arg0, %c0_i32, %c0_i32_0 : i32, i32, i32
  }
  func.func @transform_3(%arg0: i32, %arg1: i32) -> (i32, i32, i32) {
    %c0_i32 = arith.constant 0 : i32
    %c0_i32_0 = arith.constant 0 : i32
    return %arg0, %arg1, %c0_i32 : i32, i32, i32
  }
}

module attributes {stable_mosaic.version = 11 : i64} {
  func.func @_qnet_kernel(%arg0: i32, %arg1: i32, %arg2: memref<1x2x2592xbf16, #tpu.memory_space<vmem>>, %arg3: memref<2x4xbf16, #tpu.memory_space<vmem>>, %arg4: memref<1x2592x200xbf16, #tpu.memory_space<vmem>>, %arg5: memref<1x1x200xf32, #tpu.memory_space<vmem>>, %arg6: memref<1x200x512xbf16, #tpu.memory_space<vmem>>, %arg7: memref<1x4x512xbf16, #tpu.memory_space<vmem>>, %arg8: memref<1x1x512xf32, #tpu.memory_space<vmem>>, %arg9: memref<1x512x512xbf16, #tpu.memory_space<vmem>>, %arg10: memref<1x1x512xf32, #tpu.memory_space<vmem>>, %arg11: memref<1x512x512xbf16, #tpu.memory_space<vmem>>, %arg12: memref<1x1x512xf32, #tpu.memory_space<vmem>>, %arg13: memref<1x512x8xbf16, #tpu.memory_space<vmem>>, %arg14: memref<1x1x8xf32, #tpu.memory_space<vmem>>, %arg15: memref<1x2x8xf32, #tpu.memory_space<vmem>>) attributes {dimension_semantics = [#tpu.dimension_semantics<parallel>, #tpu.dimension_semantics<parallel>], iteration_bounds = array<i64: 2, 1>, scalar_prefetch = 0 : i64, scratch_operands = 0 : i64, tpu.core_type = #tpu.core_type<tc>, window_params = [{transform_indices = @transform_0, window_bounds = array<i64: 1, 2, 2592>}, {transform_indices = @transform_1, window_bounds = array<i64: 2, 4>}, {transform_indices = @transform_2, window_bounds = array<i64: 1, 2592, 200>}, {transform_indices = @transform_3, window_bounds = array<i64: 1, 1, 200>}, {transform_indices = @transform_4, window_bounds = array<i64: 1, 200, 512>}, {transform_indices = @transform_5, window_bounds = array<i64: 1, 4, 512>}, {transform_indices = @transform_6, window_bounds = array<i64: 1, 1, 512>}, {transform_indices = @transform_7, window_bounds = array<i64: 1, 512, 512>}, {transform_indices = @transform_8, window_bounds = array<i64: 1, 1, 512>}, {transform_indices = @transform_9, window_bounds = array<i64: 1, 512, 512>}, {transform_indices = @transform_10, window_bounds = array<i64: 1, 1, 512>}, {transform_indices = @transform_11, window_bounds = array<i64: 1, 512, 8>}, {transform_indices = @transform_12, window_bounds = array<i64: 1, 1, 8>}, {transform_indices = @transform_13, window_bounds = array<i64: 1, 2, 8>}]} {
    %c0 = arith.constant 0 : index
    %c0_0 = arith.constant 0 : index
    %c0_1 = arith.constant 0 : index
    %0 = vector.load %arg2[%c0, %c0_0, %c0_1] : memref<1x2x2592xbf16, #tpu.memory_space<vmem>>, vector<1x2x2592xbf16>
    %1 = vector.shape_cast %0 : vector<1x2x2592xbf16> to vector<2x2592xbf16>
    %c0_2 = arith.constant 0 : index
    %c0_3 = arith.constant 0 : index
    %c0_4 = arith.constant 0 : index
    %2 = vector.load %arg4[%c0_2, %c0_3, %c0_4] : memref<1x2592x200xbf16, #tpu.memory_space<vmem>>, vector<1x2592x200xbf16>
    %3 = vector.shape_cast %2 : vector<1x2592x200xbf16> to vector<2592x200xbf16>
    %cst = arith.constant dense<0.000000e+00> : vector<2x200xf32>
    %4 = tpu.matmul %1, %3, %cst {dimension_numbers = #tpu.dot_dimension_numbers<[1], [0], [0], [1], [0, 0, 1, 1], [], []>} : vector<2x2592xbf16>, vector<2592x200xbf16>, vector<2x200xf32> -> vector<2x200xf32>
    %c0_5 = arith.constant 0 : index
    %c0_6 = arith.constant 0 : index
    %c0_7 = arith.constant 0 : index
    %5 = vector.load %arg5[%c0_5, %c0_6, %c0_7] : memref<1x1x200xf32, #tpu.memory_space<vmem>>, vector<1x1x200xf32>
    %6 = vector.shape_cast %5 : vector<1x1x200xf32> to vector<1x200xf32>
    %7 = vector.broadcast %6 : vector<1x200xf32> to vector<2x200xf32>
    %8 = arith.addf %4, %7 : vector<2x200xf32>
    %cst_8 = arith.constant 0.000000e+00 : f32
    %9 = vector.broadcast %cst_8 : f32 to vector<2x200xf32>
    %10 = arith.maximumf %8, %9 : vector<2x200xf32>
    %11 = arith.truncf %10 : vector<2x200xf32> to vector<2x200xbf16>
    %c0_9 = arith.constant 0 : index
    %c0_10 = arith.constant 0 : index
    %c0_11 = arith.constant 0 : index
    %12 = vector.load %arg6[%c0_9, %c0_10, %c0_11] : memref<1x200x512xbf16, #tpu.memory_space<vmem>>, vector<1x200x512xbf16>
    %13 = vector.shape_cast %12 : vector<1x200x512xbf16> to vector<200x512xbf16>
    %cst_12 = arith.constant dense<0.000000e+00> : vector<2x512xf32>
    %14 = tpu.matmul %11, %13, %cst_12 {dimension_numbers = #tpu.dot_dimension_numbers<[1], [0], [0], [1], [0, 0, 1, 1], [], []>} : vector<2x200xbf16>, vector<200x512xbf16>, vector<2x512xf32> -> vector<2x512xf32>
    %c0_13 = arith.constant 0 : index
    %c0_14 = arith.constant 0 : index
    %15 = vector.load %arg3[%c0_13, %c0_14] : memref<2x4xbf16, #tpu.memory_space<vmem>>, vector<2x4xbf16>
    %c0_15 = arith.constant 0 : index
    %c0_16 = arith.constant 0 : index
    %c0_17 = arith.constant 0 : index
    %16 = vector.load %arg7[%c0_15, %c0_16, %c0_17] : memref<1x4x512xbf16, #tpu.memory_space<vmem>>, vector<1x4x512xbf16>
    %17 = vector.shape_cast %16 : vector<1x4x512xbf16> to vector<4x512xbf16>
    %cst_18 = arith.constant dense<0.000000e+00> : vector<2x512xf32>
    %18 = tpu.matmul %15, %17, %cst_18 {dimension_numbers = #tpu.dot_dimension_numbers<[1], [0], [0], [1], [0, 0, 1, 1], [], []>} : vector<2x4xbf16>, vector<4x512xbf16>, vector<2x512xf32> -> vector<2x512xf32>
    %19 = arith.addf %14, %18 : vector<2x512xf32>
    %c0_19 = arith.constant 0 : index
    %c0_20 = arith.constant 0 : index
    %c0_21 = arith.constant 0 : index
    %20 = vector.load %arg8[%c0_19, %c0_20, %c0_21] : memref<1x1x512xf32, #tpu.memory_space<vmem>>, vector<1x1x512xf32>
    %21 = vector.shape_cast %20 : vector<1x1x512xf32> to vector<1x512xf32>
    %22 = vector.broadcast %21 : vector<1x512xf32> to vector<2x512xf32>
    %23 = arith.addf %19, %22 : vector<2x512xf32>
    %cst_22 = arith.constant 0.000000e+00 : f32
    %24 = vector.broadcast %cst_22 : f32 to vector<2x512xf32>
    %25 = arith.maximumf %23, %24 : vector<2x512xf32>
    %26 = arith.truncf %25 : vector<2x512xf32> to vector<2x512xbf16>
    %c0_23 = arith.constant 0 : index
    %c0_24 = arith.constant 0 : index
    %c0_25 = arith.constant 0 : index
    %27 = vector.load %arg9[%c0_23, %c0_24, %c0_25] : memref<1x512x512xbf16, #tpu.memory_space<vmem>>, vector<1x512x512xbf16>
    %28 = vector.shape_cast %27 : vector<1x512x512xbf16> to vector<512x512xbf16>
    %cst_26 = arith.constant dense<0.000000e+00> : vector<2x512xf32>
    %29 = tpu.matmul %26, %28, %cst_26 {dimension_numbers = #tpu.dot_dimension_numbers<[1], [0], [0], [1], [0, 0, 1, 1], [], []>} : vector<2x512xbf16>, vector<512x512xbf16>, vector<2x512xf32> -> vector<2x512xf32>
    %c0_27 = arith.constant 0 : index
    %c0_28 = arith.constant 0 : index
    %c0_29 = arith.constant 0 : index
    %30 = vector.load %arg10[%c0_27, %c0_28, %c0_29] : memref<1x1x512xf32, #tpu.memory_space<vmem>>, vector<1x1x512xf32>
    %31 = vector.shape_cast %30 : vector<1x1x512xf32> to vector<1x512xf32>
    %32 = vector.broadcast %31 : vector<1x512xf32> to vector<2x512xf32>
    %33 = arith.addf %29, %32 : vector<2x512xf32>
    %cst_30 = arith.constant 0.000000e+00 : f32
    %34 = vector.broadcast %cst_30 : f32 to vector<2x512xf32>
    %35 = arith.maximumf %33, %34 : vector<2x512xf32>
    %36 = arith.truncf %35 : vector<2x512xf32> to vector<2x512xbf16>
    %c0_31 = arith.constant 0 : index
    %c0_32 = arith.constant 0 : index
    %c0_33 = arith.constant 0 : index
    %37 = vector.load %arg11[%c0_31, %c0_32, %c0_33] : memref<1x512x512xbf16, #tpu.memory_space<vmem>>, vector<1x512x512xbf16>
    %38 = vector.shape_cast %37 : vector<1x512x512xbf16> to vector<512x512xbf16>
    %cst_34 = arith.constant dense<0.000000e+00> : vector<2x512xf32>
    %39 = tpu.matmul %36, %38, %cst_34 {dimension_numbers = #tpu.dot_dimension_numbers<[1], [0], [0], [1], [0, 0, 1, 1], [], []>} : vector<2x512xbf16>, vector<512x512xbf16>, vector<2x512xf32> -> vector<2x512xf32>
    %c0_35 = arith.constant 0 : index
    %c0_36 = arith.constant 0 : index
    %c0_37 = arith.constant 0 : index
    %40 = vector.load %arg12[%c0_35, %c0_36, %c0_37] : memref<1x1x512xf32, #tpu.memory_space<vmem>>, vector<1x1x512xf32>
    %41 = vector.shape_cast %40 : vector<1x1x512xf32> to vector<1x512xf32>
    %42 = vector.broadcast %41 : vector<1x512xf32> to vector<2x512xf32>
    %43 = arith.addf %39, %42 : vector<2x512xf32>
    %cst_38 = arith.constant 0.000000e+00 : f32
    %44 = vector.broadcast %cst_38 : f32 to vector<2x512xf32>
    %45 = arith.maximumf %43, %44 : vector<2x512xf32>
    %46 = arith.truncf %45 : vector<2x512xf32> to vector<2x512xbf16>
    %c0_39 = arith.constant 0 : index
    %c0_40 = arith.constant 0 : index
    %c0_41 = arith.constant 0 : index
    %47 = vector.load %arg13[%c0_39, %c0_40, %c0_41] : memref<1x512x8xbf16, #tpu.memory_space<vmem>>, vector<1x512x8xbf16>
    %48 = vector.shape_cast %47 : vector<1x512x8xbf16> to vector<512x8xbf16>
    %cst_42 = arith.constant dense<0.000000e+00> : vector<2x8xf32>
    %49 = tpu.matmul %46, %48, %cst_42 {dimension_numbers = #tpu.dot_dimension_numbers<[1], [0], [0], [1], [0, 0, 1, 1], [], []>} : vector<2x512xbf16>, vector<512x8xbf16>, vector<2x8xf32> -> vector<2x8xf32>
    %c0_43 = arith.constant 0 : index
    %c0_44 = arith.constant 0 : index
    %c0_45 = arith.constant 0 : index
    %50 = vector.load %arg14[%c0_43, %c0_44, %c0_45] : memref<1x1x8xf32, #tpu.memory_space<vmem>>, vector<1x1x8xf32>
    %51 = vector.shape_cast %50 : vector<1x1x8xf32> to vector<1x8xf32>
    %52 = vector.broadcast %51 : vector<1x8xf32> to vector<2x8xf32>
    %53 = arith.addf %49, %52 : vector<2x8xf32>
    %c0_46 = arith.constant 0 : index
    %c0_47 = arith.constant 0 : index
    %c0_48 = arith.constant 0 : index
    %54 = vector.load %arg15[%c0_46, %c0_47, %c0_48] : memref<1x2x8xf32, #tpu.memory_space<vmem>>, vector<1x2x8xf32>
    %55 = vector.shape_cast %54 : vector<1x2x8xf32> to vector<2x8xf32>
    %56 = vector.shape_cast %53 : vector<2x8xf32> to vector<1x2x8xf32>
    tpu.vector_store %arg15[%c0_46, %c0_47, %c0_48], %56 {strides = array<i32>} : memref<1x2x8xf32, #tpu.memory_space<vmem>>, vector<1x2x8xf32>,
    return
  }
  func.func @transform_0(%arg0: i32, %arg1: i32) -> (i32, i32, i32) {
    %c0_i32 = arith.constant 0 : i32
    %c0_i32_0 = arith.constant 0 : i32
    return %arg0, %arg1, %c0_i32 : i32, i32, i32
  }
  func.func @transform_1(%arg0: i32, %arg1: i32) -> (i32, i32) {
    %c0_i32 = arith.constant 0 : i32
    %c0_i32_0 = arith.constant 0 : i32
    return %arg1, %c0_i32 : i32, i32
  }
  func.func @transform_2(%arg0: i32, %arg1: i32) -> (i32, i32, i32) {
    %c0_i32 = arith.constant 0 : i32
    %c0_i32_0 = arith.constant 0 : i32
    %c0_i32_1 = arith.constant 0 : i32
    return %arg0, %c0_i32, %c0_i32_0 : i32, i32, i32
  }
  func.func @transform_3(%arg0: i32, %arg1: i32) -> (i32, i32, i32) {
    %c0_i32 = arith.constant 0 : i32
    %c0_i32_0 = arith.constant 0 : i32
    %c0_i32_1 = arith.constant 0 : i32
    return %arg0, %c0_i32, %c0_i32_0 : i32, i32, i32
  }
  func.func @transform_4(%arg0: i32, %arg1: i32) -> (i32, i32, i32) {
    %c0_i32 = arith.constant 0 : i32
    %c0_i32_0 = arith.constant 0 : i32
    %c0_i32_1 = arith.constant 0 : i32
    return %arg0, %c0_i32, %c0_i32_0 : i32, i32, i32
  }
  func.func @transform_5(%arg0: i32, %arg1: i32) -> (i32, i32, i32) {
    %c0_i32 = arith.constant 0 : i32
    %c0_i32_0 = arith.constant 0 : i32
    %c0_i32_1 = arith.constant 0 : i32
    return %arg0, %c0_i32, %c0_i32_0 : i32, i32, i32
  }
  func.func @transform_6(%arg0: i32, %arg1: i32) -> (i32, i32, i32) {
    %c0_i32 = arith.constant 0 : i32
    %c0_i32_0 = arith.constant 0 : i32
    %c0_i32_1 = arith.constant 0 : i32
    return %arg0, %c0_i32, %c0_i32_0 : i32, i32, i32
  }
  func.func @transform_7(%arg0: i32, %arg1: i32) -> (i32, i32, i32) {
    %c0_i32 = arith.constant 0 : i32
    %c0_i32_0 = arith.constant 0 : i32
    %c0_i32_1 = arith.constant 0 : i32
    return %arg0, %c0_i32, %c0_i32_0 : i32, i32, i32
  }
  func.func @transform_8(%arg0: i32, %arg1: i32) -> (i32, i32, i32) {
    %c0_i32 = arith.constant 0 : i32
    %c0_i32_0 = arith.constant 0 : i32
    %c0_i32_1 = arith.constant 0 : i32
    return %arg0, %c0_i32, %c0_i32_0 : i32, i32, i32
  }
  func.func @transform_9(%arg0: i32, %arg1: i32) -> (i32, i32, i32) {
    %c0_i32 = arith.constant 0 : i32
    %c0_i32_0 = arith.constant 0 : i32
    %c0_i32_1 = arith.constant 0 : i32
    return %arg0, %c0_i32, %c0_i32_0 : i32, i32, i32
  }
  func.func @transform_10(%arg0: i32, %arg1: i32) -> (i32, i32, i32) {
    %c0_i32 = arith.constant 0 : i32
    %c0_i32_0 = arith.constant 0 : i32
    %c0_i32_1 = arith.constant 0 : i32
    return %arg0, %c0_i32, %c0_i32_0 : i32, i32, i32
  }
  func.func @transform_11(%arg0: i32, %arg1: i32) -> (i32, i32, i32) {
    %c0_i32 = arith.constant 0 : i32
    %c0_i32_0 = arith.constant 0 : i32
    %c0_i32_1 = arith.constant 0 : i32
    return %arg0, %c0_i32, %c0_i32_0 : i32, i32, i32
  }
  func.func @transform_12(%arg0: i32, %arg1: i32) -> (i32, i32, i32) {
    %c0_i32 = arith.constant 0 : i32
    %c0_i32_0 = arith.constant 0 : i32
    %c0_i32_1 = arith.constant 0 : i32
    return %arg0, %c0_i32, %c0_i32_0 : i32, i32, i32
  }
  func.func @transform_13(%arg0: i32, %arg1: i32) -> (i32, i32, i32) {
    %c0_i32 = arith.constant 0 : i32
    %c0_i32_0 = arith.constant 0 : i32
    return %arg0, %arg1, %c0_i32 : i32, i32, i32
  }
}

</mosaic_0001>

<bundles_post_ra>
// kernel: critic_forward_pallas.3
= control target key start
LH: loop header
LB: loop body
LE: loop exit
PB: predicated region body
PF: predicated region fallthrough
CT: control target
= control target key end

     0   :  { %s2830_s12 = smov 0   ;;  %s2832_s13 = smov 0   ;;  %s3375_s0 = inlined_call_operand.vmem [shape: bf16[2,800,192], index: 0, kind: input, shape index: {}]   ;;  %s3376_s1 = inlined_call_operand.vmem [shape: bf16[2,192,16], index: 1, kind: input, shape index: {}]   ;;  %s3377_s2 = inlined_call_operand.vmem [shape: f32[2,1,16], index: 2, kind: input, shape index: {}]   ;;  %s3378_s3 = inlined_call_operand.vmem [shape: bf16[2,800,16], index: 3, kind: output, shape index: {}]  }
   0x1   :  { %s2834_s14 = smov 0  }
   0x2 LB: > { %s25_s15 = sadd.s32 1, %s2803_s13  ;;  %p2201_p0 = scmp.ge.s32.totalorder %s2807_s14, 1  ;;  %s2807_s14 = sphi %s2834_s14, %s13_s14   ;;  %s2803_s13 = sphi %s2832_s13, %s3380_s13   ;;  %s2799_s12 = sphi %s2830_s12, %s3379_s12  }
   0x3   : > { %p27_p1 = scmp.ge.s32.totalorder %s25_s15, 2  ;;  %p177_p2 = scmp.lt.s32.totalorder %s2807_s14, 3 }
   0x5   : > { %s3382_s15 = smov (%p27_p1, %s25_s15), 0  ;;  %p178_p3 = pnand %p2201_p0, %p177_p2 }
   0x6   : > { %p219_p4 = scmp.lt.s32.totalorder (!%p178_p3), %s2799_s12, 1  ;;  %v2809_v0 = vmov (!%p178_p3), 0   ;;  %vm901_vm0 = vcmask (!%p178_p3), 523264   ;;  %vm1985_vm1 = vcmask (!%p178_p3), 125952  }
   0x7   : > { %181 = sbr.rel (%p178_p3) target bundleno = 479 (0x1df), region = 32  ;;  %1052 = vmatprep.subr.bf16.mxu0 (!%p178_p3), %v2809_v0  ;;  %2570 = vmatprep.subr.bf16.mxu1 (!%p178_p3), %v2809_v0 }
   0xe   : > { %s3384_s12 = smov (!%p219_p4, %s2799_s12), 1 }
   0xf   : > { %s2595_s16 = smul.u32 96, %s3384_s12  ;;  %s3052_s26 = scalar_lea.vmem %s3377_s2, %s3384_s12 }
  0x10   : > { %s2594_s20 = smul.u32 800, %s3384_s12 }
  0x11   : > { %s2856_s19 = scalar_lea.vmem %s3376_s1, %s2595_s16  ;;  %s2596_s27 = smul.u32 400, %s3384_s12 }
  0x12   : > { %v2622_v1 = vld [vmem:[%s2856_s19] sm:$0xff]   ;;  %v2623_v2 = vld [vmem:[%s2856_s19 + $0x8] sm:$0xff]   ;;  %v2624_v3 = vld [vmem:[%s2856_s19 + $0x10] sm:$0xff]   ;;  %s2870_s23 = scalar_lea.vmem %s3375_s0, %s2594_s20 }
  0x13   : > { %1053 = vmatpush1.bf16.msra.mxu0 %v2622_v1  ;;  %2582 = vmatpush1.bf16.msra.mxu1 %v2622_v1  ;;  %v2625_v4 = vld [vmem:[%s2856_s19 + $0x18] sm:$0xff]   ;;  %v2636_v5 = vld [vmem:[%s2870_s23 + $0x4] ss:$8 sps:$4 sm:$0xff]   ;;  %v2628_v9 = vld [vmem:[%s2856_s19 + $0x30] sm:$0xff]   ;;  %s3065_s30 = scalar_lea.vmem %s3378_s3, %s2596_s27 }
  0x14   : > { %1054 = vmatprep.subr.bf16.mxu0 %v2809_v0  ;;  %2571 = vmatprep.subr.bf16.mxu1 %v2809_v0  ;;  %v2626_v6 = vld [vmem:[%s2856_s19 + $0x20] sm:$0xff]   ;;  %v2639_v7 = vld [vmem:[%s2870_s23 + $0x194] ss:$8 sps:$4 sm:$0xff]   ;;  %v2627_v8 = vld [vmem:[%s2856_s19 + $0x28] sm:$0xff]  }
  0x15   : > { %2318 = vmatprep.mubr.msk.bf16.mxu0 %vm901_vm0, %v2636_v5  ;;  %2343 = vmatprep.mubr.msk.bf16.mxu1 %vm901_vm0, %v2639_v7  ;;  %v2629_v10 = vld [vmem:[%s2856_s19 + $0x38] sm:$0xff]   ;;  %v2630_v11 = vld [vmem:[%s2856_s19 + $0x40] sm:$0xff]   ;;  %v2631_v12 = vld [vmem:[%s2856_s19 + $0x48] sm:$0xff]  }
  0x16   : > { %v2632_v13 = vld [vmem:[%s2856_s19 + $0x50] sm:$0xff]   ;;  %v2633_v14 = vld [vmem:[%s2856_s19 + $0x58] sm:$0xff]   ;;  %v2634_v15 = vld [vmem:[%s2870_s23] ss:$8 sps:$4 sm:$0xff]  }
  0x17   : > { %1055 = vmatpush1.bf16.msra.mxu0 %v2623_v2  ;;  %2583 = vmatpush1.bf16.msra.mxu1 %v2623_v2  ;;  %v2637_v16 = vld [vmem:[%s2870_s23 + $0x190] ss:$8 sps:$4 sm:$0xff]   ;;  %v2640_v17 = vld [vmem:[%s2870_s23 + $0x14] ss:$8 sps:$4 sm:$0xff]   ;;  %v2642_v18 = vld [vmem:[%s2870_s23 + $0x1a4] ss:$8 sps:$4 sm:$0xff]  }
  0x18   : > { %1056 = vmatprep.subr.bf16.mxu0 %v2809_v0  ;;  %2572 = vmatprep.subr.bf16.mxu1 %v2809_v0  ;;  %v2644_v19 = vld [vmem:[%s2870_s23 + $0x10] ss:$8 sps:$4 sm:$0xff]   ;;  %v2645_v20 = vld [vmem:[%s2870_s23 + $0x1a0] ss:$8 sps:$4 sm:$0xff]   ;;  %v2646_v21 = vld [vmem:[%s2870_s23 + $0x24] ss:$8 sps:$4 sm:$0xff]  }
  0x19   : > { %v2648_v22 = vld [vmem:[%s2870_s23 + $0x1b4] ss:$8 sps:$4 sm:$0xff]   ;;  %v2650_v23 = vld [vmem:[%s2870_s23 + $0x20] ss:$8 sps:$4 sm:$0xff]   ;;  %v2651_v24 = vld [vmem:[%s2870_s23 + $0x1b0] ss:$8 sps:$4 sm:$0xff]  }
  0x1a   : > { %v2652_v25 = vld [vmem:[%s2870_s23 + $0x34] ss:$8 sps:$4 sm:$0xff]   ;;  %v2654_v26 = vld [vmem:[%s2870_s23 + $0x1c4] ss:$8 sps:$4 sm:$0xff]   ;;  %v2656_v27 = vld [vmem:[%s2870_s23 + $0x30] ss:$8 sps:$4 sm:$0xff]  }
  0x1b   : > { %1057 = vmatpush1.bf16.msra.mxu0 %v2624_v3  ;;  %2584 = vmatpush1.bf16.msra.mxu1 %v2624_v3  ;;  %v2657_v28 = vld [vmem:[%s2870_s23 + $0x1c0] ss:$8 sps:$4 sm:$0xff]   ;;  %v2658_v29 = vld [vmem:[%s2870_s23 + $0x44] ss:$8 sps:$4 sm:$0xff]   ;;  %v2660_v30 = vld [vmem:[%s2870_s23 + $0x1d4] ss:$8 sps:$4 sm:$0xff]  }
  0x1c   : > { %1058 = vmatprep.subr.bf16.mxu0 %v2809_v0  ;;  %2573 = vmatprep.subr.bf16.mxu1 %v2809_v0  ;;  %v2662_v31 = vld [vmem:[%s2870_s23 + $0x40] ss:$8 sps:$4 sm:$0xff]   ;;  %v2663_v32 = vld [vmem:[%s2870_s23 + $0x1d0] ss:$8 sps:$4 sm:$0xff]   ;;  %v2664_v33 = vld [vmem:[%s2870_s23 + $0x54] ss:$8 sps:$4 sm:$0xff]  }
  0x1d   : > { %v2666_v34 = vld [vmem:[%s2870_s23 + $0x1e4] ss:$8 sps:$4 sm:$0xff]   ;;  %v2668_v35 = vld [vmem:[%s2870_s23 + $0x50] ss:$8 sps:$4 sm:$0xff]   ;;  %v2669_v36 = vld [vmem:[%s2870_s23 + $0x1e0] ss:$8 sps:$4 sm:$0xff]  }
  0x1e   : > { %v2670_v37 = vld [vmem:[%s2870_s23 + $0x64] ss:$8 sps:$4 sm:$0xff]   ;;  %v2672_v38 = vld [vmem:[%s2870_s23 + $0x1f4] ss:$8 sps:$4 sm:$0xff]   ;;  %v2674_v39 = vld [vmem:[%s2870_s23 + $0x60] ss:$8 sps:$4 sm:$0xff]  }
  0x1f   : > { %1059 = vmatpush1.bf16.msra.mxu0 %v2625_v4  ;;  %2585 = vmatpush1.bf16.msra.mxu1 %v2625_v4  ;;  %v2675_v40 = vld [vmem:[%s2870_s23 + $0x1f0] ss:$8 sps:$4 sm:$0xff]   ;;  %v2676_v41 = vld [vmem:[%s2870_s23 + $0x74] ss:$8 sps:$4 sm:$0xff]   ;;  %v2678_v42 = vld [vmem:[%s2870_s23 + $0x204] ss:$8 sps:$4 sm:$0xff]  }
  0x20   : > { %1060 = vmatprep.subr.bf16.mxu0 %v2809_v0  ;;  %2574 = vmatprep.subr.bf16.mxu1 %v2809_v0  ;;  %v2680_v43 = vld [vmem:[%s2870_s23 + $0x70] ss:$8 sps:$4 sm:$0xff]   ;;  %v2681_v44 = vld [vmem:[%s2870_s23 + $0x200] ss:$8 sps:$4 sm:$0xff]   ;;  %v2682_v45 = vld [vmem:[%s2870_s23 + $0x84] ss:$8 sps:$4 sm:$0xff]  }
  0x21   : > { %v2684_v46 = vld [vmem:[%s2870_s23 + $0x214] ss:$8 sps:$4 sm:$0xff]   ;;  %v2686_v47 = vld [vmem:[%s2870_s23 + $0x80] ss:$8 sps:$4 sm:$0xff]   ;;  %v2687_v48 = vld [vmem:[%s2870_s23 + $0x210] ss:$8 sps:$4 sm:$0xff]  }
  0x22   : > { %v2688_v49 = vld [vmem:[%s2870_s23 + $0x94] ss:$8 sps:$4 sm:$0xff]   ;;  %v2690_v50 = vld [vmem:[%s2870_s23 + $0x224] ss:$8 sps:$4 sm:$0xff]   ;;  %v2692_v51 = vld [vmem:[%s2870_s23 + $0x90] ss:$8 sps:$4 sm:$0xff]  }
  0x23   : > { %1061 = vmatpush1.bf16.msra.mxu0 %v2626_v6  ;;  %2586 = vmatpush1.bf16.msra.mxu1 %v2626_v6  ;;  %v2693_v52 = vld [vmem:[%s2870_s23 + $0x220] ss:$8 sps:$4 sm:$0xff]   ;;  %v2694_v53 = vld [vmem:[%s2870_s23 + $0xa4] ss:$8 sps:$4 sm:$0xff]   ;;  %v2696_v54 = vld [vmem:[%s2870_s23 + $0x234] ss:$8 sps:$4 sm:$0xff]  }
  0x24   : > { %1062 = vmatprep.subr.bf16.mxu0 %v2809_v0  ;;  %2575 = vmatprep.subr.bf16.mxu1 %v2809_v0  ;;  %v2698_v55 = vld [vmem:[%s2870_s23 + $0xa0] ss:$8 sps:$4 sm:$0xff]   ;;  %v2699_v56 = vld [vmem:[%s2870_s23 + $0x230] ss:$8 sps:$4 sm:$0xff]   ;;  %v2700_v57 = vld [vmem:[%s2870_s23 + $0xb4] ss:$8 sps:$4 sm:$0xff]  }
  0x25   : > { %v2702_v58 = vld [vmem:[%s2870_s23 + $0x244] ss:$8 sps:$4 sm:$0xff]   ;;  %v2704_v59 = vld [vmem:[%s2870_s23 + $0xb0] ss:$8 sps:$4 sm:$0xff]   ;;  %v2705_v60 = vld [vmem:[%s2870_s23 + $0x240] ss:$8 sps:$4 sm:$0xff]  }
  0x26   : > { %v2706_v61 = vld [vmem:[%s2870_s23 + $0xc4] ss:$8 sps:$4 sm:$0xff]   ;;  %v2708_v62 = vld [vmem:[%s2870_s23 + $0x254] ss:$8 sps:$4 sm:$0xff]   ;;  %v2710_v63 = vld [vmem:[%s2870_s23 + $0xc0] ss:$8 sps:$4 sm:$0xff]  }
  0x27   : > { %1063 = vmatpush1.bf16.msra.mxu0 %v2627_v8  ;;  %2587 = vmatpush1.bf16.msra.mxu1 %v2627_v8  ;;  %v2712_v1 = vld [vmem:[%s2870_s23 + $0xd4] ss:$8 sps:$4 sm:$0xff]   ;;  %v2714_v2 = vld [vmem:[%s2870_s23 + $0x264] ss:$8 sps:$4 sm:$0xff]   ;;  %v2716_v3 = vld [vmem:[%s2870_s23 + $0xd0] ss:$8 sps:$4 sm:$0xff]  }
  0x28   : > { %1064 = vmatprep.subr.bf16.mxu0 %v2809_v0  ;;  %2576 = vmatprep.subr.bf16.mxu1 %v2809_v0  ;;  %v2717_v4 = vld [vmem:[%s2870_s23 + $0x260] ss:$8 sps:$4 sm:$0xff]   ;;  %v2718_v5 = vld [vmem:[%s2870_s23 + $0xe4] ss:$8 sps:$4 sm:$0xff]   ;;  %v2720_v6 = vld [vmem:[%s2870_s23 + $0x274] ss:$8 sps:$4 sm:$0xff]  }
  0x29   : > { %v2722_v7 = vld [vmem:[%s2870_s23 + $0xe0] ss:$8 sps:$4 sm:$0xff]   ;;  %v2723_v8 = vld [vmem:[%s2870_s23 + $0x270] ss:$8 sps:$4 sm:$0xff]  }
  0x2b   : > { %1065 = vmatpush1.bf16.msra.mxu0 %v2628_v9  ;;  %2588 = vmatpush1.bf16.msra.mxu1 %v2628_v9  ;;  %v2724_v9 = vld [vmem:[%s2870_s23 + $0xf4] ss:$8 sps:$4 sm:$0xff]  }
  0x2c   : > { %1066 = vmatprep.subr.bf16.mxu0 %v2809_v0  ;;  %2577 = vmatprep.subr.bf16.mxu1 %v2809_v0 }
  0x2f   : > { %1067 = vmatpush1.bf16.msra.mxu0 %v2629_v10  ;;  %2589 = vmatpush1.bf16.msra.mxu1 %v2629_v10  ;;  %v2726_v10 = vld [vmem:[%s2870_s23 + $0x284] ss:$8 sps:$4 sm:$0xff]  }
  0x30   : > { %1068 = vmatprep.subr.bf16.mxu0 %v2809_v0  ;;  %2578 = vmatprep.subr.bf16.mxu1 %v2809_v0 }
  0x33   : > { %1069 = vmatpush1.bf16.msra.mxu0 %v2630_v11  ;;  %2590 = vmatpush1.bf16.msra.mxu1 %v2630_v11  ;;  %v2728_v11 = vld [vmem:[%s2870_s23 + $0xf0] ss:$8 sps:$4 sm:$0xff]  }
  0x34   : > { %1070 = vmatprep.subr.bf16.mxu0 %v2809_v0  ;;  %2579 = vmatprep.subr.bf16.mxu1 %v2809_v0 }
  0x37   : > { %1071 = vmatpush1.bf16.msra.mxu0 %v2631_v12  ;;  %2591 = vmatpush1.bf16.msra.mxu1 %v2631_v12  ;;  %v2729_v12 = vld [vmem:[%s2870_s23 + $0x280] ss:$8 sps:$4 sm:$0xff]  }
  0x38   : > { %1072 = vmatprep.subr.bf16.mxu0 %v2809_v0  ;;  %2580 = vmatprep.subr.bf16.mxu1 %v2809_v0 }
  0x3b   : > { %1073 = vmatpush1.bf16.msra.mxu0 %v2632_v13  ;;  %2592 = vmatpush1.bf16.msra.mxu1 %v2632_v13  ;;  %v2730_v13 = vld [vmem:[%s2870_s23 + $0x104] ss:$8 sps:$4 sm:$0xff]  }
  0x3c   : > { %1074 = vmatprep.subr.bf16.mxu0 %v2809_v0  ;;  %2581 = vmatprep.subr.bf16.mxu1 %v2809_v0  ;;  %v2711_v0 = vld [vmem:[%s2870_s23 + $0x250] ss:$8 sps:$4 sm:$0xff]  }
  0x3f   : > { %1075 = vmatpush1.bf16.msra.mxu0 %v2633_v14  ;;  %2593 = vmatpush1.bf16.msra.mxu1 %v2633_v14  ;;  %v2732_v14 = vld [vmem:[%s2870_s23 + $0x294] ss:$8 sps:$4 sm:$0xff]  }
  0x42   : > { %1085 = vmatmul.mubr.bf16.vlgmr.msra.gmra.mrb[0].mxu0 %v2634_v15  ;;  %1285 = vmatmul.mubr.bf16.vlgmr.msra.gmra.mrb[0].mxu1 %v2637_v16  ;;  %v2734_v15 = vld [vmem:[%s2870_s23 + $0x100] ss:$8 sps:$4 sm:$0xff]   ;;  %v2735_v16 = vld [vmem:[%s2870_s23 + $0x290] ss:$8 sps:$4 sm:$0xff]  }
  0x43   : > { %2319 = vmatprep.mubr.msk.bf16.mxu0 %vm901_vm0, %v2640_v17  ;;  %2344 = vmatprep.mubr.msk.bf16.mxu1 %vm901_vm0, %v2642_v18  ;;  %v2736_v17 = vld [vmem:[%s2870_s23 + $0x114] ss:$8 sps:$4 sm:$0xff]   ;;  %v2738_v18 = vld [vmem:[%s2870_s23 + $0x2a4] ss:$8 sps:$4 sm:$0xff]  }
  0x4a   : > { %1093 = vmatmul.mubr.bf16.gmra.mrb[4].mxu0 %v2644_v19  ;;  %1293 = vmatmul.mubr.bf16.gmra.mrb[4].mxu1 %v2645_v20  ;;  %v2740_v19 = vld [vmem:[%s2870_s23 + $0x110] ss:$8 sps:$4 sm:$0xff]   ;;  %v2741_v20 = vld [vmem:[%s2870_s23 + $0x2a0] ss:$8 sps:$4 sm:$0xff]  }
  0x4b   : > { %2320 = vmatprep.mubr.msk.bf16.mxu0 %vm901_vm0, %v2646_v21  ;;  %2345 = vmatprep.mubr.msk.bf16.mxu1 %vm901_vm0, %v2648_v22  ;;  %v2742_v21 = vld [vmem:[%s2870_s23 + $0x124] ss:$8 sps:$4 sm:$0xff]   ;;  %v2744_v22 = vld [vmem:[%s2870_s23 + $0x2b4] ss:$8 sps:$4 sm:$0xff]  }
  0x52   : > { %1101 = vmatmul.mubr.bf16.gmra.mrb[8].mxu0 %v2650_v23  ;;  %1301 = vmatmul.mubr.bf16.gmra.mrb[8].mxu1 %v2651_v24  ;;  %v2746_v23 = vld [vmem:[%s2870_s23 + $0x120] ss:$8 sps:$4 sm:$0xff]   ;;  %v2747_v24 = vld [vmem:[%s2870_s23 + $0x2b0] ss:$8 sps:$4 sm:$0xff]  }
  0x53   : > { %2321 = vmatprep.mubr.msk.bf16.mxu0 %vm901_vm0, %v2652_v25  ;;  %2346 = vmatprep.mubr.msk.bf16.mxu1 %vm901_vm0, %v2654_v26  ;;  %v2748_v25 = vld [vmem:[%s2870_s23 + $0x134] ss:$8 sps:$4 sm:$0xff]   ;;  %v2750_v26 = vld [vmem:[%s2870_s23 + $0x2c4] ss:$8 sps:$4 sm:$0xff]  }
  0x5a   : > { %1109 = vmatmul.mubr.bf16.gmra.mrb[12].mxu0 %v2656_v27  ;;  %1309 = vmatmul.mubr.bf16.gmra.mrb[12].mxu1 %v2657_v28  ;;  %v2752_v27 = vld [vmem:[%s2870_s23 + $0x130] ss:$8 sps:$4 sm:$0xff]   ;;  %v2753_v28 = vld [vmem:[%s2870_s23 + $0x2c0] ss:$8 sps:$4 sm:$0xff]  }
  0x5b   : > { %2322 = vmatprep.mubr.msk.bf16.mxu0 %vm901_vm0, %v2658_v29  ;;  %2347 = vmatprep.mubr.msk.bf16.mxu1 %vm901_vm0, %v2660_v30  ;;  %v2754_v29 = vld [vmem:[%s2870_s23 + $0x144] ss:$8 sps:$4 sm:$0xff]   ;;  %v2756_v30 = vld [vmem:[%s2870_s23 + $0x2d4] ss:$8 sps:$4 sm:$0xff]  }
  0x62   : > { %1117 = vmatmul.mubr.bf16.gmra.mrb[16].mxu0 %v2662_v31  ;;  %1317 = vmatmul.mubr.bf16.gmra.mrb[16].mxu1 %v2663_v32  ;;  %v2758_v31 = vld [vmem:[%s2870_s23 + $0x140] ss:$8 sps:$4 sm:$0xff]   ;;  %v2759_v32 = vld [vmem:[%s2870_s23 + $0x2d0] ss:$8 sps:$4 sm:$0xff]  }
  0x63   : > { %2323 = vmatprep.mubr.msk.bf16.mxu0 %vm901_vm0, %v2664_v33  ;;  %2348 = vmatprep.mubr.msk.bf16.mxu1 %vm901_vm0, %v2666_v34  ;;  %v2760_v33 = vld [vmem:[%s2870_s23 + $0x154] ss:$8 sps:$4 sm:$0xff]   ;;  %v2762_v34 = vld [vmem:[%s2870_s23 + $0x2e4] ss:$8 sps:$4 sm:$0xff]  }
  0x6a   : > { %1125 = vmatmul.mubr.bf16.gmra.mrb[20].mxu0 %v2668_v35  ;;  %1325 = vmatmul.mubr.bf16.gmra.mrb[20].mxu1 %v2669_v36  ;;  %v2764_v35 = vld [vmem:[%s2870_s23 + $0x150] ss:$8 sps:$4 sm:$0xff]   ;;  %v2765_v36 = vld [vmem:[%s2870_s23 + $0x2e0] ss:$8 sps:$4 sm:$0xff]  }
  0x6b   : > { %2324 = vmatprep.mubr.msk.bf16.mxu0 %vm901_vm0, %v2670_v37  ;;  %2349 = vmatprep.mubr.msk.bf16.mxu1 %vm901_vm0, %v2672_v38  ;;  %v2766_v37 = vld [vmem:[%s2870_s23 + $0x164] ss:$8 sps:$4 sm:$0xff]   ;;  %v2768_v38 = vld [vmem:[%s2870_s23 + $0x2f4] ss:$8 sps:$4 sm:$0xff]  }
  0x72   : > { %1133 = vmatmul.mubr.bf16.gmra.mrb[24].mxu0 %v2674_v39  ;;  %1333 = vmatmul.mubr.bf16.gmra.mrb[24].mxu1 %v2675_v40  ;;  %v2770_v39 = vld [vmem:[%s2870_s23 + $0x160] ss:$8 sps:$4 sm:$0xff]   ;;  %v2771_v40 = vld [vmem:[%s2870_s23 + $0x2f0] ss:$8 sps:$4 sm:$0xff]  }
  0x73   : > { %2325 = vmatprep.mubr.msk.bf16.mxu0 %vm901_vm0, %v2676_v41  ;;  %2350 = vmatprep.mubr.msk.bf16.mxu1 %vm901_vm0, %v2678_v42  ;;  %v2772_v41 = vld [vmem:[%s2870_s23 + $0x174] ss:$8 sps:$4 sm:$0xff]   ;;  %v2774_v42 = vld [vmem:[%s2870_s23 + $0x304] ss:$8 sps:$4 sm:$0xff]  }
  0x7a   : > { %1141 = vmatmul.mubr.bf16.gmra.mrb[28].mxu0 %v2680_v43  ;;  %1341 = vmatmul.mubr.bf16.gmra.mrb[28].mxu1 %v2681_v44  ;;  %v2776_v43 = vld [vmem:[%s2870_s23 + $0x170] ss:$8 sps:$4 sm:$0xff]   ;;  %v2777_v44 = vld [vmem:[%s2870_s23 + $0x300] ss:$8 sps:$4 sm:$0xff]  }
  0x7b   : > { %2326 = vmatprep.mubr.msk.bf16.mxu0 %vm901_vm0, %v2682_v45  ;;  %2351 = vmatprep.mubr.msk.bf16.mxu1 %vm901_vm0, %v2684_v46  ;;  %v2778_v45 = vld [vmem:[%s2870_s23 + $0x184] ss:$8 sps:$4 sm:$0xff]   ;;  %v2780_v46 = vld [vmem:[%s2870_s23 + $0x314] ss:$8 sps:$4 sm:$0xff]  }
  0x82   : > { %1149 = vmatmul.mubr.bf16.gmra.mrb[32].mxu0 %v2686_v47  ;;  %1349 = vmatmul.mubr.bf16.gmra.mrb[32].mxu1 %v2687_v48  ;;  %v2782_v47 = vld [vmem:[%s2870_s23 + $0x180] ss:$8 sps:$4 sm:$0xff]   ;;  %v2783_v48 = vld [vmem:[%s2870_s23 + $0x310] ss:$8 sps:$4 sm:$0xff]  }
  0x83   : > { %2327 = vmatprep.mubr.msk.bf16.mxu0 %vm901_vm0, %v2688_v49  ;;  %2352 = vmatprep.mubr.msk.bf16.mxu1 %vm901_vm0, %v2690_v50  ;;  %v3055_v49 = vld [vmem:[%s3052_s26] ss:$0 sm:$0xff] }
  0x8a   : > { %1157 = vmatmul.mubr.bf16.gmra.mrb[36].mxu0 %v2692_v51  ;;  %1357 = vmatmul.mubr.bf16.gmra.mrb[36].mxu1 %v2693_v52 }
  0x8b   : > { %2328 = vmatprep.mubr.msk.bf16.mxu0 %vm901_vm0, %v2694_v53  ;;  %2353 = vmatprep.mubr.msk.bf16.mxu1 %vm901_vm0, %v2696_v54 }
  0x92   : > { %1165 = vmatmul.mubr.bf16.gmra.mrb[40].mxu0 %v2698_v55  ;;  %1365 = vmatmul.mubr.bf16.gmra.mrb[40].mxu1 %v2699_v56 }
  0x93   : > { %2329 = vmatprep.mubr.msk.bf16.mxu0 %vm901_vm0, %v2700_v57  ;;  %2354 = vmatprep.mubr.msk.bf16.mxu1 %vm901_vm0, %v2702_v58 }
  0x9a   : > { %1173 = vmatmul.mubr.bf16.gmra.mrb[44].mxu0 %v2704_v59  ;;  %1373 = vmatmul.mubr.bf16.gmra.mrb[44].mxu1 %v2705_v60 }
  0x9b   : > { %2330 = vmatprep.mubr.msk.bf16.mxu0 %vm901_vm0, %v2706_v61  ;;  %2355 = vmatprep.mubr.msk.bf16.mxu1 %vm901_vm0, %v2708_v62 }
  0xa2   : > { %1181 = vmatmul.mubr.bf16.gmra.mrb[48].mxu0 %v2710_v63  ;;  %1381 = vmatmul.mubr.bf16.gmra.mrb[48].mxu1 %v2711_v0 }
  0xa3   : > { %2331 = vmatprep.mubr.msk.bf16.mxu0 %vm901_vm0, %v2712_v1  ;;  %2356 = vmatprep.mubr.msk.bf16.mxu1 %vm901_vm0, %v2714_v2 }
  0xaa   : > { %1189 = vmatmul.mubr.bf16.gmra.mrb[52].mxu0 %v2716_v3  ;;  %1389 = vmatmul.mubr.bf16.gmra.mrb[52].mxu1 %v2717_v4 }
  0xab   : > { %2332 = vmatprep.mubr.msk.bf16.mxu0 %vm901_vm0, %v2718_v5  ;;  %2357 = vmatprep.mubr.msk.bf16.mxu1 %vm901_vm0, %v2720_v6 }
  0xb2   : > { %1197 = vmatmul.mubr.bf16.gmra.mrb[56].mxu0 %v2722_v7  ;;  %1397 = vmatmul.mubr.bf16.gmra.mrb[56].mxu1 %v2723_v8 }
  0xb3   : > { %2333 = vmatprep.mubr.msk.bf16.mxu0 %vm901_vm0, %v2724_v9  ;;  %2358 = vmatprep.mubr.msk.bf16.mxu1 %vm901_vm0, %v2726_v10 }
  0xba   : > { %1205 = vmatmul.mubr.bf16.gmra.mrb[60].mxu0 %v2728_v11  ;;  %1405 = vmatmul.mubr.bf16.gmra.mrb[60].mxu1 %v2729_v12 }
  0xbb   : > { %2334 = vmatprep.mubr.msk.bf16.mxu0 %vm901_vm0, %v2730_v13  ;;  %2359 = vmatprep.mubr.msk.bf16.mxu1 %vm901_vm0, %v2732_v14 }
  0xc2   : > { %1213 = vmatmul.mubr.bf16.gmra.mrb[64].mxu0 %v2734_v15  ;;  %1413 = vmatmul.mubr.bf16.gmra.mrb[64].mxu1 %v2735_v16 }
  0xc3   : > { %2335 = vmatprep.mubr.msk.bf16.mxu0 %vm901_vm0, %v2736_v17  ;;  %2360 = vmatprep.mubr.msk.bf16.mxu1 %vm901_vm0, %v2738_v18 }
  0xca   : > { %1221 = vmatmul.mubr.bf16.gmra.mrb[68].mxu0 %v2740_v19  ;;  %1421 = vmatmul.mubr.bf16.gmra.mrb[68].mxu1 %v2741_v20 }
  0xcb   : > { %2336 = vmatprep.mubr.msk.bf16.mxu0 %vm901_vm0, %v2742_v21  ;;  %2361 = vmatprep.mubr.msk.bf16.mxu1 %vm901_vm0, %v2744_v22 }
  0xd2   : > { %1229 = vmatmul.mubr.bf16.gmra.mrb[72].mxu0 %v2746_v23  ;;  %1429 = vmatmul.mubr.bf16.gmra.mrb[72].mxu1 %v2747_v24 }
  0xd3   : > { %2337 = vmatprep.mubr.msk.bf16.mxu0 %vm901_vm0, %v2748_v25  ;;  %2362 = vmatprep.mubr.msk.bf16.mxu1 %vm901_vm0, %v2750_v26 }
  0xda   : > { %1237 = vmatmul.mubr.bf16.gmra.mrb[76].mxu0 %v2752_v27  ;;  %1437 = vmatmul.mubr.bf16.gmra.mrb[76].mxu1 %v2753_v28 }
  0xdb   : > { %2338 = vmatprep.mubr.msk.bf16.mxu0 %vm901_vm0, %v2754_v29  ;;  %2363 = vmatprep.mubr.msk.bf16.mxu1 %vm901_vm0, %v2756_v30 }
  0xe2   : > { %1245 = vmatmul.mubr.bf16.gmra.mrb[80].mxu0 %v2758_v31  ;;  %1445 = vmatmul.mubr.bf16.gmra.mrb[80].mxu1 %v2759_v32 }
  0xe3   : > { %2339 = vmatprep.mubr.msk.bf16.mxu0 %vm901_vm0, %v2760_v33  ;;  %2364 = vmatprep.mubr.msk.bf16.mxu1 %vm901_vm0, %v2762_v34 }
  0xea   : > { %1253 = vmatmul.mubr.bf16.gmra.mrb[84].mxu0 %v2764_v35  ;;  %1453 = vmatmul.mubr.bf16.gmra.mrb[84].mxu1 %v2765_v36 }
  0xeb   : > { %2340 = vmatprep.mubr.msk.bf16.mxu0 %vm901_vm0, %v2766_v37  ;;  %2365 = vmatprep.mubr.msk.bf16.mxu1 %vm901_vm0, %v2768_v38 }
  0xf2   : > { %1261 = vmatmul.mubr.bf16.gmra.mrb[88].mxu0 %v2770_v39  ;;  %1461 = vmatmul.mubr.bf16.gmra.mrb[88].mxu1 %v2771_v40 }
  0xf3   : > { %2341 = vmatprep.mubr.msk.bf16.mxu0 %vm901_vm0, %v2772_v41  ;;  %2366 = vmatprep.mubr.msk.bf16.mxu1 %vm901_vm0, %v2774_v42 }
  0xfa   : > { %1269 = vmatmul.mubr.bf16.gmra.mrb[92].mxu0 %v2776_v43  ;;  %1469 = vmatmul.mubr.bf16.gmra.mrb[92].mxu1 %v2777_v44 }
  0xfb   : > { %2342 = vmatprep.mubr.msk.bf16.mxu0 %vm901_vm0, %v2778_v45  ;;  %2367 = vmatprep.mubr.msk.bf16.mxu1 %vm901_vm0, %v2780_v46 }
 0x102   : > { %1277 = vmatmul.mubr.bf16.gmra.mrb[96].mxu0 %v2782_v47  ;;  %1477 = vmatmul.mubr.bf16.gmra.mrb[96].mxu1 %v2783_v48 }
 0x115   : > { %v1086_v50 = vpop.f32.mrb[0].mxu0  ;;  %v1286_v51 = vpop.f32.mrb[0].mxu1 }
 0x116   : > { %v1087_v52 = vadd.f32 %v3055_v49, %v1086_v50  ;;  %v1287_v53 = vadd.f32 %v3055_v49, %v1286_v51  ;;  %v1088_v54 = vpop.f32.mrb[1].mxu0  ;;  %v1288_v55 = vpop.f32.mrb[1].mxu1 }
 0x117   : > { %v1089_v56 = vpop.f32.mrb[2].mxu0  ;;  %v1289_v57 = vpop.f32.mrb[2].mxu1 }
 0x118   : > { %v1485_v58 = vmax.f32 %v1087_v52, 0.0  ;;  %v1535_v59 = vmax.f32 %v1287_v53, 0.0  ;;  %v1090_v60 = vadd.f32 %v3055_v49, %v1089_v56  ;;  %v1290_v61 = vadd.f32 %v3055_v49, %v1289_v57  ;;  %v1091_v62 = vpop.f32.mrb[3].mxu0  ;;  %v1291_v63 = vpop.f32.mrb[3].mxu1 }
 0x11a   : > { %v2470_v0 = vpack.c.bf16 %v1485_v58, %v1485_v58  ;;  %v2520_v1 = vpack.c.bf16 %v1535_v59, %v1535_v59  ;;  %v1486_v2 = vmax.f32 %v1090_v60, 0.0  ;;  %v1536_v3 = vmax.f32 %v1290_v61, 0.0 }
 0x11c   : > { %1986 = vst.msk [vmem:[%s3065_s30] sm:$0xf] %vm1985_vm1, %v2470_v0  ;;  %2036 = vst.msk [vmem:[%s3065_s30 + $0xc8] sm:$0xf] %vm1985_vm1, %v2520_v1  ;;  %v2471_v4 = vpack.c.bf16 %v1486_v2, %v1486_v2  ;;  %v2521_v5 = vpack.c.bf16 %v1536_v3, %v1536_v3 }
 0x11d   : > { %v1094_v6 = vpop.f32.mrb[4].mxu0  ;;  %v1294_v7 = vpop.f32.mrb[4].mxu1 }
 0x11e   : > { %1987 = vst.msk [vmem:[%s3065_s30 + $0x4] sm:$0xf] %vm1985_vm1, %v2471_v4  ;;  %2037 = vst.msk [vmem:[%s3065_s30 + $0xcc] sm:$0xf] %vm1985_vm1, %v2521_v5  ;;  %v1095_v8 = vadd.f32 %v3055_v49, %v1094_v6  ;;  %v1295_v9 = vadd.f32 %v3055_v49, %v1294_v7  ;;  %v1096_v10 = vpop.f32.mrb[5].mxu0  ;;  %v1296_v11 = vpop.f32.mrb[5].mxu1 }
 0x11f   : > { %v1097_v12 = vpop.f32.mrb[6].mxu0  ;;  %v1297_v13 = vpop.f32.mrb[6].mxu1 }
 0x120   : > { %v1487_v14 = vmax.f32 %v1095_v8, 0.0  ;;  %v1537_v15 = vmax.f32 %v1295_v9, 0.0  ;;  %v1098_v16 = vadd.f32 %v3055_v49, %v1097_v12  ;;  %v1298_v17 = vadd.f32 %v3055_v49, %v1297_v13  ;;  %v1099_v18 = vpop.f32.mrb[7].mxu0  ;;  %v1299_v19 = vpop.f32.mrb[7].mxu1 }
 0x122   : > { %v2472_v20 = vpack.c.bf16 %v1487_v14, %v1487_v14  ;;  %v2522_v21 = vpack.c.bf16 %v1537_v15, %v1537_v15  ;;  %v1488_v22 = vmax.f32 %v1098_v16, 0.0  ;;  %v1538_v23 = vmax.f32 %v1298_v17, 0.0 }
 0x124   : > { %1988 = vst.msk [vmem:[%s3065_s30 + $0x8] sm:$0xf] %vm1985_vm1, %v2472_v20  ;;  %2038 = vst.msk [vmem:[%s3065_s30 + $0xd0] sm:$0xf] %vm1985_vm1, %v2522_v21  ;;  %v2473_v24 = vpack.c.bf16 %v1488_v22, %v1488_v22  ;;  %v2523_v25 = vpack.c.bf16 %v1538_v23, %v1538_v23 }
 0x125   : > { %v1102_v26 = vpop.f32.mrb[8].mxu0  ;;  %v1302_v27 = vpop.f32.mrb[8].mxu1 }
 0x126   : > { %1989 = vst.msk [vmem:[%s3065_s30 + $0xc] sm:$0xf] %vm1985_vm1, %v2473_v24  ;;  %2039 = vst.msk [vmem:[%s3065_s30 + $0xd4] sm:$0xf] %vm1985_vm1, %v2523_v25  ;;  %v1103_v28 = vadd.f32 %v3055_v49, %v1102_v26  ;;  %v1303_v29 = vadd.f32 %v3055_v49, %v1302_v27  ;;  %v1104_v30 = vpop.f32.mrb[9].mxu0  ;;  %v1304_v31 = vpop.f32.mrb[9].mxu1 }
 0x127   : > { %v1105_v32 = vpop.f32.mrb[10].mxu0  ;;  %v1305_v33 = vpop.f32.mrb[10].mxu1 }
 0x128   : > { %v1489_v34 = vmax.f32 %v1103_v28, 0.0  ;;  %v1539_v35 = vmax.f32 %v1303_v29, 0.0  ;;  %v1106_v36 = vadd.f32 %v3055_v49, %v1105_v32  ;;  %v1306_v37 = vadd.f32 %v3055_v49, %v1305_v33  ;;  %v1107_v38 = vpop.f32.mrb[11].mxu0  ;;  %v1307_v39 = vpop.f32.mrb[11].mxu1 }
 0x12a   : > { %v2474_v40 = vpack.c.bf16 %v1489_v34, %v1489_v34  ;;  %v2524_v41 = vpack.c.bf16 %v1539_v35, %v1539_v35  ;;  %v1490_v42 = vmax.f32 %v1106_v36, 0.0  ;;  %v1540_v43 = vmax.f32 %v1306_v37, 0.0 }
 0x12c   : > { %1990 = vst.msk [vmem:[%s3065_s30 + $0x10] sm:$0xf] %vm1985_vm1, %v2474_v40  ;;  %2040 = vst.msk [vmem:[%s3065_s30 + $0xd8] sm:$0xf] %vm1985_vm1, %v2524_v41  ;;  %v2475_v44 = vpack.c.bf16 %v1490_v42, %v1490_v42  ;;  %v2525_v45 = vpack.c.bf16 %v1540_v43, %v1540_v43 }
 0x12d   : > { %v1110_v46 = vpop.f32.mrb[12].mxu0  ;;  %v1310_v47 = vpop.f32.mrb[12].mxu1 }
 0x12e   : > { %1991 = vst.msk [vmem:[%s3065_s30 + $0x14] sm:$0xf] %vm1985_vm1, %v2475_v44  ;;  %2041 = vst.msk [vmem:[%s3065_s30 + $0xdc] sm:$0xf] %vm1985_vm1, %v2525_v45  ;;  %v1111_v48 = vadd.f32 %v3055_v49, %v1110_v46  ;;  %v1311_v50 = vadd.f32 %v3055_v49, %v1310_v47  ;;  %v1112_v51 = vpop.f32.mrb[13].mxu0  ;;  %v1312_v52 = vpop.f32.mrb[13].mxu1 }
 0x12f   : > { %v1113_v53 = vpop.f32.mrb[14].mxu0  ;;  %v1313_v54 = vpop.f32.mrb[14].mxu1 }
 0x130   : > { %v1491_v55 = vmax.f32 %v1111_v48, 0.0  ;;  %v1541_v56 = vmax.f32 %v1311_v50, 0.0  ;;  %v1114_v57 = vadd.f32 %v3055_v49, %v1113_v53  ;;  %v1314_v58 = vadd.f32 %v3055_v49, %v1313_v54  ;;  %v1115_v59 = vpop.f32.mrb[15].mxu0  ;;  %v1315_v60 = vpop.f32.mrb[15].mxu1 }
 0x132   : > { %v2476_v61 = vpack.c.bf16 %v1491_v55, %v1491_v55  ;;  %v2526_v62 = vpack.c.bf16 %v1541_v56, %v1541_v56  ;;  %v1492_v63 = vmax.f32 %v1114_v57, 0.0  ;;  %v1542_v0 = vmax.f32 %v1314_v58, 0.0 }
 0x134   : > { %1992 = vst.msk [vmem:[%s3065_s30 + $0x18] sm:$0xf] %vm1985_vm1, %v2476_v61  ;;  %2042 = vst.msk [vmem:[%s3065_s30 + $0xe0] sm:$0xf] %vm1985_vm1, %v2526_v62  ;;  %v2477_v1 = vpack.c.bf16 %v1492_v63, %v1492_v63  ;;  %v2527_v2 = vpack.c.bf16 %v1542_v0, %v1542_v0 }
 0x135   : > { %v1118_v3 = vpop.f32.mrb[16].mxu0  ;;  %v1318_v4 = vpop.f32.mrb[16].mxu1 }
 0x136   : > { %1993 = vst.msk [vmem:[%s3065_s30 + $0x1c] sm:$0xf] %vm1985_vm1, %v2477_v1  ;;  %2043 = vst.msk [vmem:[%s3065_s30 + $0xe4] sm:$0xf] %vm1985_vm1, %v2527_v2  ;;  %v1119_v5 = vadd.f32 %v3055_v49, %v1118_v3  ;;  %v1319_v6 = vadd.f32 %v3055_v49, %v1318_v4  ;;  %v1120_v7 = vpop.f32.mrb[17].mxu0  ;;  %v1320_v8 = vpop.f32.mrb[17].mxu1 }
 0x137   : > { %v1121_v9 = vpop.f32.mrb[18].mxu0  ;;  %v1321_v10 = vpop.f32.mrb[18].mxu1 }
 0x138   : > { %v1493_v11 = vmax.f32 %v1119_v5, 0.0  ;;  %v1543_v12 = vmax.f32 %v1319_v6, 0.0  ;;  %v1122_v13 = vadd.f32 %v3055_v49, %v1121_v9  ;;  %v1322_v14 = vadd.f32 %v3055_v49, %v1321_v10  ;;  %v1123_v15 = vpop.f32.mrb[19].mxu0  ;;  %v1323_v16 = vpop.f32.mrb[19].mxu1 }
 0x13a   : > { %v2478_v17 = vpack.c.bf16 %v1493_v11, %v1493_v11  ;;  %v2528_v18 = vpack.c.bf16 %v1543_v12, %v1543_v12  ;;  %v1494_v19 = vmax.f32 %v1122_v13, 0.0  ;;  %v1544_v20 = vmax.f32 %v1322_v14, 0.0 }
 0x13c   : > { %1994 = vst.msk [vmem:[%s3065_s30 + $0x20] sm:$0xf] %vm1985_vm1, %v2478_v17  ;;  %2044 = vst.msk [vmem:[%s3065_s30 + $0xe8] sm:$0xf] %vm1985_vm1, %v2528_v18  ;;  %v2479_v21 = vpack.c.bf16 %v1494_v19, %v1494_v19  ;;  %v2529_v22 = vpack.c.bf16 %v1544_v20, %v1544_v20 }
 0x13d   : > { %v1126_v23 = vpop.f32.mrb[20].mxu0  ;;  %v1326_v24 = vpop.f32.mrb[20].mxu1 }
 0x13e   : > { %1995 = vst.msk [vmem:[%s3065_s30 + $0x24] sm:$0xf] %vm1985_vm1, %v2479_v21  ;;  %2045 = vst.msk [vmem:[%s3065_s30 + $0xec] sm:$0xf] %vm1985_vm1, %v2529_v22  ;;  %v1127_v25 = vadd.f32 %v3055_v49, %v1126_v23  ;;  %v1327_v26 = vadd.f32 %v3055_v49, %v1326_v24  ;;  %v1128_v27 = vpop.f32.mrb[21].mxu0  ;;  %v1328_v28 = vpop.f32.mrb[21].mxu1 }
 0x13f   : > { %v1129_v29 = vpop.f32.mrb[22].mxu0  ;;  %v1329_v30 = vpop.f32.mrb[22].mxu1 }
 0x140   : > { %v1495_v31 = vmax.f32 %v1127_v25, 0.0  ;;  %v1545_v32 = vmax.f32 %v1327_v26, 0.0  ;;  %v1130_v33 = vadd.f32 %v3055_v49, %v1129_v29  ;;  %v1330_v34 = vadd.f32 %v3055_v49, %v1329_v30  ;;  %v1131_v35 = vpop.f32.mrb[23].mxu0  ;;  %v1331_v36 = vpop.f32.mrb[23].mxu1 }
 0x142   : > { %v2480_v37 = vpack.c.bf16 %v1495_v31, %v1495_v31  ;;  %v2530_v38 = vpack.c.bf16 %v1545_v32, %v1545_v32  ;;  %v1496_v39 = vmax.f32 %v1130_v33, 0.0  ;;  %v1546_v40 = vmax.f32 %v1330_v34, 0.0 }
 0x144   : > { %1996 = vst.msk [vmem:[%s3065_s30 + $0x28] sm:$0xf] %vm1985_vm1, %v2480_v37  ;;  %2046 = vst.msk [vmem:[%s3065_s30 + $0xf0] sm:$0xf] %vm1985_vm1, %v2530_v38  ;;  %v2481_v41 = vpack.c.bf16 %v1496_v39, %v1496_v39  ;;  %v2531_v42 = vpack.c.bf16 %v1546_v40, %v1546_v40 }
 0x145   : > { %v1134_v43 = vpop.f32.mrb[24].mxu0  ;;  %v1334_v44 = vpop.f32.mrb[24].mxu1 }
 0x146   : > { %1997 = vst.msk [vmem:[%s3065_s30 + $0x2c] sm:$0xf] %vm1985_vm1, %v2481_v41  ;;  %2047 = vst.msk [vmem:[%s3065_s30 + $0xf4] sm:$0xf] %vm1985_vm1, %v2531_v42  ;;  %v1135_v45 = vadd.f32 %v3055_v49, %v1134_v43  ;;  %v1335_v46 = vadd.f32 %v3055_v49, %v1334_v44  ;;  %v1136_v47 = vpop.f32.mrb[25].mxu0  ;;  %v1336_v48 = vpop.f32.mrb[25].mxu1 }
 0x147   : > { %v1137_v50 = vpop.f32.mrb[26].mxu0  ;;  %v1337_v51 = vpop.f32.mrb[26].mxu1 }
 0x148   : > { %v1497_v52 = vmax.f32 %v1135_v45, 0.0  ;;  %v1547_v53 = vmax.f32 %v1335_v46, 0.0  ;;  %v1138_v54 = vadd.f32 %v3055_v49, %v1137_v50  ;;  %v1338_v55 = vadd.f32 %v3055_v49, %v1337_v51  ;;  %v1139_v56 = vpop.f32.mrb[27].mxu0  ;;  %v1339_v57 = vpop.f32.mrb[27].mxu1 }
 0x14a   : > { %v2482_v58 = vpack.c.bf16 %v1497_v52, %v1497_v52  ;;  %v2532_v59 = vpack.c.bf16 %v1547_v53, %v1547_v53  ;;  %v1498_v60 = vmax.f32 %v1138_v54, 0.0  ;;  %v1548_v61 = vmax.f32 %v1338_v55, 0.0 }
 0x14c   : > { %1998 = vst.msk [vmem:[%s3065_s30 + $0x30] sm:$0xf] %vm1985_vm1, %v2482_v58  ;;  %2048 = vst.msk [vmem:[%s3065_s30 + $0xf8] sm:$0xf] %vm1985_vm1, %v2532_v59  ;;  %v2483_v62 = vpack.c.bf16 %v1498_v60, %v1498_v60  ;;  %v2533_v63 = vpack.c.bf16 %v1548_v61, %v1548_v61 }
 0x14d   : > { %v1142_v0 = vpop.f32.mrb[28].mxu0  ;;  %v1342_v1 = vpop.f32.mrb[28].mxu1 }
 0x14e   : > { %1999 = vst.msk [vmem:[%s3065_s30 + $0x34] sm:$0xf] %vm1985_vm1, %v2483_v62  ;;  %2049 = vst.msk [vmem:[%s3065_s30 + $0xfc] sm:$0xf] %vm1985_vm1, %v2533_v63  ;;  %v1143_v2 = vadd.f32 %v3055_v49, %v1142_v0  ;;  %v1343_v3 = vadd.f32 %v3055_v49, %v1342_v1  ;;  %v1144_v4 = vpop.f32.mrb[29].mxu0  ;;  %v1344_v5 = vpop.f32.mrb[29].mxu1 }
 0x14f   : > { %v1145_v6 = vpop.f32.mrb[30].mxu0  ;;  %v1345_v7 = vpop.f32.mrb[30].mxu1 }
 0x150   : > { %v1499_v8 = vmax.f32 %v1143_v2, 0.0  ;;  %v1549_v9 = vmax.f32 %v1343_v3, 0.0  ;;  %v1146_v10 = vadd.f32 %v3055_v49, %v1145_v6  ;;  %v1346_v11 = vadd.f32 %v3055_v49, %v1345_v7  ;;  %v1147_v12 = vpop.f32.mrb[31].mxu0  ;;  %v1347_v13 = vpop.f32.mrb[31].mxu1 }
 0x152   : > { %v2484_v14 = vpack.c.bf16 %v1499_v8, %v1499_v8  ;;  %v2534_v15 = vpack.c.bf16 %v1549_v9, %v1549_v9  ;;  %v1500_v16 = vmax.f32 %v1146_v10, 0.0  ;;  %v1550_v17 = vmax.f32 %v1346_v11, 0.0 }
 0x154   : > { %2000 = vst.msk [vmem:[%s3065_s30 + $0x38] sm:$0xf] %vm1985_vm1, %v2484_v14  ;;  %2050 = vst.msk [vmem:[%s3065_s30 + $0x100] sm:$0xf] %vm1985_vm1, %v2534_v15  ;;  %v2485_v18 = vpack.c.bf16 %v1500_v16, %v1500_v16  ;;  %v2535_v19 = vpack.c.bf16 %v1550_v17, %v1550_v17 }
 0x155   : > { %v1150_v20 = vpop.f32.mrb[32].mxu0  ;;  %v1350_v21 = vpop.f32.mrb[32].mxu1 }
 0x156   : > { %2001 = vst.msk [vmem:[%s3065_s30 + $0x3c] sm:$0xf] %vm1985_vm1, %v2485_v18  ;;  %2051 = vst.msk [vmem:[%s3065_s30 + $0x104] sm:$0xf] %vm1985_vm1, %v2535_v19  ;;  %v1151_v22 = vadd.f32 %v3055_v49, %v1150_v20  ;;  %v1351_v23 = vadd.f32 %v3055_v49, %v1350_v21  ;;  %v1152_v24 = vpop.f32.mrb[33].mxu0  ;;  %v1352_v25 = vpop.f32.mrb[33].mxu1 }
 0x157   : > { %v1153_v26 = vpop.f32.mrb[34].mxu0  ;;  %v1353_v27 = vpop.f32.mrb[34].mxu1 }
 0x158   : > { %v1501_v28 = vmax.f32 %v1151_v22, 0.0  ;;  %v1551_v29 = vmax.f32 %v1351_v23, 0.0  ;;  %v1154_v30 = vadd.f32 %v3055_v49, %v1153_v26  ;;  %v1354_v31 = vadd.f32 %v3055_v49, %v1353_v27  ;;  %v1155_v32 = vpop.f32.mrb[35].mxu0  ;;  %v1355_v33 = vpop.f32.mrb[35].mxu1 }
 0x15a   : > { %v2486_v34 = vpack.c.bf16 %v1501_v28, %v1501_v28  ;;  %v2536_v35 = vpack.c.bf16 %v1551_v29, %v1551_v29  ;;  %v1502_v36 = vmax.f32 %v1154_v30, 0.0  ;;  %v1552_v37 = vmax.f32 %v1354_v31, 0.0 }
 0x15c   : > { %2002 = vst.msk [vmem:[%s3065_s30 + $0x40] sm:$0xf] %vm1985_vm1, %v2486_v34  ;;  %2052 = vst.msk [vmem:[%s3065_s30 + $0x108] sm:$0xf] %vm1985_vm1, %v2536_v35  ;;  %v2487_v38 = vpack.c.bf16 %v1502_v36, %v1502_v36  ;;  %v2537_v39 = vpack.c.bf16 %v1552_v37, %v1552_v37 }
 0x15d   : > { %v1158_v40 = vpop.f32.mrb[36].mxu0  ;;  %v1358_v41 = vpop.f32.mrb[36].mxu1 }
 0x15e   : > { %2003 = vst.msk [vmem:[%s3065_s30 + $0x44] sm:$0xf] %vm1985_vm1, %v2487_v38  ;;  %2053 = vst.msk [vmem:[%s3065_s30 + $0x10c] sm:$0xf] %vm1985_vm1, %v2537_v39  ;;  %v1159_v42 = vadd.f32 %v3055_v49, %v1158_v40  ;;  %v1359_v43 = vadd.f32 %v3055_v49, %v1358_v41  ;;  %v1160_v44 = vpop.f32.mrb[37].mxu0  ;;  %v1360_v45 = vpop.f32.mrb[37].mxu1 }
 0x15f   : > { %v1161_v46 = vpop.f32.mrb[38].mxu0  ;;  %v1361_v47 = vpop.f32.mrb[38].mxu1 }
 0x160   : > { %v1503_v48 = vmax.f32 %v1159_v42, 0.0  ;;  %v1553_v50 = vmax.f32 %v1359_v43, 0.0  ;;  %v1162_v51 = vadd.f32 %v3055_v49, %v1161_v46  ;;  %v1362_v52 = vadd.f32 %v3055_v49, %v1361_v47  ;;  %v1163_v53 = vpop.f32.mrb[39].mxu0  ;;  %v1363_v54 = vpop.f32.mrb[39].mxu1 }
 0x162   : > { %v2488_v55 = vpack.c.bf16 %v1503_v48, %v1503_v48  ;;  %v2538_v56 = vpack.c.bf16 %v1553_v50, %v1553_v50  ;;  %v1504_v57 = vmax.f32 %v1162_v51, 0.0  ;;  %v1554_v58 = vmax.f32 %v1362_v52, 0.0 }
 0x164   : > { %2004 = vst.msk [vmem:[%s3065_s30 + $0x48] sm:$0xf] %vm1985_vm1, %v2488_v55  ;;  %2054 = vst.msk [vmem:[%s3065_s30 + $0x110] sm:$0xf] %vm1985_vm1, %v2538_v56  ;;  %v2489_v59 = vpack.c.bf16 %v1504_v57, %v1504_v57  ;;  %v2539_v60 = vpack.c.bf16 %v1554_v58, %v1554_v58 }
 0x165   : > { %v1166_v61 = vpop.f32.mrb[40].mxu0  ;;  %v1366_v62 = vpop.f32.mrb[40].mxu1 }
 0x166   : > { %2005 = vst.msk [vmem:[%s3065_s30 + $0x4c] sm:$0xf] %vm1985_vm1, %v2489_v59  ;;  %2055 = vst.msk [vmem:[%s3065_s30 + $0x114] sm:$0xf] %vm1985_vm1, %v2539_v60  ;;  %v1167_v63 = vadd.f32 %v3055_v49, %v1166_v61  ;;  %v1367_v0 = vadd.f32 %v3055_v49, %v1366_v62  ;;  %v1168_v1 = vpop.f32.mrb[41].mxu0  ;;  %v1368_v2 = vpop.f32.mrb[41].mxu1 }
 0x167   : > { %v1169_v3 = vpop.f32.mrb[42].mxu0  ;;  %v1369_v4 = vpop.f32.mrb[42].mxu1 }
 0x168   : > { %v1505_v5 = vmax.f32 %v1167_v63, 0.0  ;;  %v1555_v6 = vmax.f32 %v1367_v0, 0.0  ;;  %v1170_v7 = vadd.f32 %v3055_v49, %v1169_v3  ;;  %v1370_v8 = vadd.f32 %v3055_v49, %v1369_v4  ;;  %v1171_v9 = vpop.f32.mrb[43].mxu0  ;;  %v1371_v10 = vpop.f32.mrb[43].mxu1 }
 0x16a   : > { %v2490_v11 = vpack.c.bf16 %v1505_v5, %v1505_v5  ;;  %v2540_v12 = vpack.c.bf16 %v1555_v6, %v1555_v6  ;;  %v1506_v13 = vmax.f32 %v1170_v7, 0.0  ;;  %v1556_v14 = vmax.f32 %v1370_v8, 0.0 }
 0x16c   : > { %2006 = vst.msk [vmem:[%s3065_s30 + $0x50] sm:$0xf] %vm1985_vm1, %v2490_v11  ;;  %2056 = vst.msk [vmem:[%s3065_s30 + $0x118] sm:$0xf] %vm1985_vm1, %v2540_v12  ;;  %v2491_v15 = vpack.c.bf16 %v1506_v13, %v1506_v13  ;;  %v2541_v16 = vpack.c.bf16 %v1556_v14, %v1556_v14 }
 0x16d   : > { %v1174_v17 = vpop.f32.mrb[44].mxu0  ;;  %v1374_v18 = vpop.f32.mrb[44].mxu1 }
 0x16e   : > { %2007 = vst.msk [vmem:[%s3065_s30 + $0x54] sm:$0xf] %vm1985_vm1, %v2491_v15  ;;  %2057 = vst.msk [vmem:[%s3065_s30 + $0x11c] sm:$0xf] %vm1985_vm1, %v2541_v16  ;;  %v1175_v19 = vadd.f32 %v3055_v49, %v1174_v17  ;;  %v1375_v20 = vadd.f32 %v3055_v49, %v1374_v18  ;;  %v1176_v21 = vpop.f32.mrb[45].mxu0  ;;  %v1376_v22 = vpop.f32.mrb[45].mxu1 }
 0x16f   : > { %v1177_v23 = vpop.f32.mrb[46].mxu0  ;;  %v1377_v24 = vpop.f32.mrb[46].mxu1 }
 0x170   : > { %v1507_v25 = vmax.f32 %v1175_v19, 0.0  ;;  %v1557_v26 = vmax.f32 %v1375_v20, 0.0  ;;  %v1178_v27 = vadd.f32 %v3055_v49, %v1177_v23  ;;  %v1378_v28 = vadd.f32 %v3055_v49, %v1377_v24  ;;  %v1179_v29 = vpop.f32.mrb[47].mxu0  ;;  %v1379_v30 = vpop.f32.mrb[47].mxu1 }
 0x172   : > { %v2492_v31 = vpack.c.bf16 %v1507_v25, %v1507_v25  ;;  %v2542_v32 = vpack.c.bf16 %v1557_v26, %v1557_v26  ;;  %v1508_v33 = vmax.f32 %v1178_v27, 0.0  ;;  %v1558_v34 = vmax.f32 %v1378_v28, 0.0 }
 0x174   : > { %2008 = vst.msk [vmem:[%s3065_s30 + $0x58] sm:$0xf] %vm1985_vm1, %v2492_v31  ;;  %2058 = vst.msk [vmem:[%s3065_s30 + $0x120] sm:$0xf] %vm1985_vm1, %v2542_v32  ;;  %v2493_v35 = vpack.c.bf16 %v1508_v33, %v1508_v33  ;;  %v2543_v36 = vpack.c.bf16 %v1558_v34, %v1558_v34 }
 0x175   : > { %v1182_v37 = vpop.f32.mrb[48].mxu0  ;;  %v1382_v38 = vpop.f32.mrb[48].mxu1 }
 0x176   : > { %2009 = vst.msk [vmem:[%s3065_s30 + $0x5c] sm:$0xf] %vm1985_vm1, %v2493_v35  ;;  %2059 = vst.msk [vmem:[%s3065_s30 + $0x124] sm:$0xf] %vm1985_vm1, %v2543_v36  ;;  %v1183_v39 = vadd.f32 %v3055_v49, %v1182_v37  ;;  %v1383_v40 = vadd.f32 %v3055_v49, %v1382_v38  ;;  %v1184_v41 = vpop.f32.mrb[49].mxu0  ;;  %v1384_v42 = vpop.f32.mrb[49].mxu1 }
 0x177   : > { %v1185_v43 = vpop.f32.mrb[50].mxu0  ;;  %v1385_v44 = vpop.f32.mrb[50].mxu1 }
 0x178   : > { %v1509_v45 = vmax.f32 %v1183_v39, 0.0  ;;  %v1559_v46 = vmax.f32 %v1383_v40, 0.0  ;;  %v1186_v47 = vadd.f32 %v3055_v49, %v1185_v43  ;;  %v1386_v48 = vadd.f32 %v3055_v49, %v1385_v44  ;;  %v1187_v50 = vpop.f32.mrb[51].mxu0  ;;  %v1387_v51 = vpop.f32.mrb[51].mxu1 }
 0x17a   : > { %v2494_v52 = vpack.c.bf16 %v1509_v45, %v1509_v45  ;;  %v2544_v53 = vpack.c.bf16 %v1559_v46, %v1559_v46  ;;  %v1510_v54 = vmax.f32 %v1186_v47, 0.0  ;;  %v1560_v55 = vmax.f32 %v1386_v48, 0.0 }
 0x17c   : > { %2010 = vst.msk [vmem:[%s3065_s30 + $0x60] sm:$0xf] %vm1985_vm1, %v2494_v52  ;;  %2060 = vst.msk [vmem:[%s3065_s30 + $0x128] sm:$0xf] %vm1985_vm1, %v2544_v53  ;;  %v2495_v56 = vpack.c.bf16 %v1510_v54, %v1510_v54  ;;  %v2545_v57 = vpack.c.bf16 %v1560_v55, %v1560_v55 }
 0x17d   : > { %v1190_v58 = vpop.f32.mrb[52].mxu0  ;;  %v1390_v59 = vpop.f32.mrb[52].mxu1 }
 0x17e   : > { %2011 = vst.msk [vmem:[%s3065_s30 + $0x64] sm:$0xf] %vm1985_vm1, %v2495_v56  ;;  %2061 = vst.msk [vmem:[%s3065_s30 + $0x12c] sm:$0xf] %vm1985_vm1, %v2545_v57  ;;  %v1191_v60 = vadd.f32 %v3055_v49, %v1190_v58  ;;  %v1391_v61 = vadd.f32 %v3055_v49, %v1390_v59  ;;  %v1192_v62 = vpop.f32.mrb[53].mxu0  ;;  %v1392_v63 = vpop.f32.mrb[53].mxu1 }
 0x17f   : > { %v1193_v0 = vpop.f32.mrb[54].mxu0  ;;  %v1393_v1 = vpop.f32.mrb[54].mxu1 }
 0x180   : > { %v1511_v2 = vmax.f32 %v1191_v60, 0.0  ;;  %v1561_v3 = vmax.f32 %v1391_v61, 0.0  ;;  %v1194_v4 = vadd.f32 %v3055_v49, %v1193_v0  ;;  %v1394_v5 = vadd.f32 %v3055_v49, %v1393_v1  ;;  %v1195_v6 = vpop.f32.mrb[55].mxu0  ;;  %v1395_v7 = vpop.f32.mrb[55].mxu1 }
 0x182   : > { %v2496_v8 = vpack.c.bf16 %v1511_v2, %v1511_v2  ;;  %v2546_v9 = vpack.c.bf16 %v1561_v3, %v1561_v3  ;;  %v1512_v10 = vmax.f32 %v1194_v4, 0.0  ;;  %v1562_v11 = vmax.f32 %v1394_v5, 0.0 }
 0x184   : > { %2012 = vst.msk [vmem:[%s3065_s30 + $0x68] sm:$0xf] %vm1985_vm1, %v2496_v8  ;;  %2062 = vst.msk [vmem:[%s3065_s30 + $0x130] sm:$0xf] %vm1985_vm1, %v2546_v9  ;;  %v2497_v12 = vpack.c.bf16 %v1512_v10, %v1512_v10  ;;  %v2547_v13 = vpack.c.bf16 %v1562_v11, %v1562_v11 }
 0x185   : > { %v1198_v14 = vpop.f32.mrb[56].mxu0  ;;  %v1398_v15 = vpop.f32.mrb[56].mxu1 }
 0x186   : > { %2013 = vst.msk [vmem:[%s3065_s30 + $0x6c] sm:$0xf] %vm1985_vm1, %v2497_v12  ;;  %2063 = vst.msk [vmem:[%s3065_s30 + $0x134] sm:$0xf] %vm1985_vm1, %v2547_v13  ;;  %v1199_v16 = vadd.f32 %v3055_v49, %v1198_v14  ;;  %v1399_v17 = vadd.f32 %v3055_v49, %v1398_v15  ;;  %v1200_v18 = vpop.f32.mrb[57].mxu0  ;;  %v1400_v19 = vpop.f32.mrb[57].mxu1 }
 0x187   : > { %v1201_v20 = vpop.f32.mrb[58].mxu0  ;;  %v1401_v21 = vpop.f32.mrb[58].mxu1 }
 0x188   : > { %v1513_v22 = vmax.f32 %v1199_v16, 0.0  ;;  %v1563_v23 = vmax.f32 %v1399_v17, 0.0  ;;  %v1202_v24 = vadd.f32 %v3055_v49, %v1201_v20  ;;  %v1402_v25 = vadd.f32 %v3055_v49, %v1401_v21  ;;  %v1203_v26 = vpop.f32.mrb[59].mxu0  ;;  %v1403_v27 = vpop.f32.mrb[59].mxu1 }
 0x18a   : > { %v2498_v28 = vpack.c.bf16 %v1513_v22, %v1513_v22  ;;  %v2548_v29 = vpack.c.bf16 %v1563_v23, %v1563_v23  ;;  %v1514_v30 = vmax.f32 %v1202_v24, 0.0  ;;  %v1564_v31 = vmax.f32 %v1402_v25, 0.0 }
 0x18c   : > { %2014 = vst.msk [vmem:[%s3065_s30 + $0x70] sm:$0xf] %vm1985_vm1, %v2498_v28  ;;  %2064 = vst.msk [vmem:[%s3065_s30 + $0x138] sm:$0xf] %vm1985_vm1, %v2548_v29  ;;  %v2499_v32 = vpack.c.bf16 %v1514_v30, %v1514_v30  ;;  %v2549_v33 = vpack.c.bf16 %v1564_v31, %v1564_v31 }
 0x18d   : > { %v1206_v34 = vpop.f32.mrb[60].mxu0  ;;  %v1406_v35 = vpop.f32.mrb[60].mxu1 }
 0x18e   : > { %2015 = vst.msk [vmem:[%s3065_s30 + $0x74] sm:$0xf] %vm1985_vm1, %v2499_v32  ;;  %2065 = vst.msk [vmem:[%s3065_s30 + $0x13c] sm:$0xf] %vm1985_vm1, %v2549_v33  ;;  %v1207_v36 = vadd.f32 %v3055_v49, %v1206_v34  ;;  %v1407_v37 = vadd.f32 %v3055_v49, %v1406_v35  ;;  %v1208_v38 = vpop.f32.mrb[61].mxu0  ;;  %v1408_v39 = vpop.f32.mrb[61].mxu1 }
 0x18f   : > { %v1209_v40 = vpop.f32.mrb[62].mxu0  ;;  %v1409_v41 = vpop.f32.mrb[62].mxu1 }
 0x190   : > { %v1515_v42 = vmax.f32 %v1207_v36, 0.0  ;;  %v1565_v43 = vmax.f32 %v1407_v37, 0.0  ;;  %v1210_v44 = vadd.f32 %v3055_v49, %v1209_v40  ;;  %v1410_v45 = vadd.f32 %v3055_v49, %v1409_v41  ;;  %v1211_v46 = vpop.f32.mrb[63].mxu0  ;;  %v1411_v47 = vpop.f32.mrb[63].mxu1 }
 0x192   : > { %v2500_v48 = vpack.c.bf16 %v1515_v42, %v1515_v42  ;;  %v2550_v50 = vpack.c.bf16 %v1565_v43, %v1565_v43  ;;  %v1516_v51 = vmax.f32 %v1210_v44, 0.0  ;;  %v1566_v52 = vmax.f32 %v1410_v45, 0.0 }
 0x194   : > { %2016 = vst.msk [vmem:[%s3065_s30 + $0x78] sm:$0xf] %vm1985_vm1, %v2500_v48  ;;  %2066 = vst.msk [vmem:[%s3065_s30 + $0x140] sm:$0xf] %vm1985_vm1, %v2550_v50  ;;  %v2501_v53 = vpack.c.bf16 %v1516_v51, %v1516_v51  ;;  %v2551_v54 = vpack.c.bf16 %v1566_v52, %v1566_v52 }
 0x195   : > { %v1214_v55 = vpop.f32.mrb[64].mxu0  ;;  %v1414_v56 = vpop.f32.mrb[64].mxu1 }
 0x196   : > { %2017 = vst.msk [vmem:[%s3065_s30 + $0x7c] sm:$0xf] %vm1985_vm1, %v2501_v53  ;;  %2067 = vst.msk [vmem:[%s3065_s30 + $0x144] sm:$0xf] %vm1985_vm1, %v2551_v54  ;;  %v1215_v57 = vadd.f32 %v3055_v49, %v1214_v55  ;;  %v1415_v58 = vadd.f32 %v3055_v49, %v1414_v56  ;;  %v1216_v59 = vpop.f32.mrb[65].mxu0  ;;  %v1416_v60 = vpop.f32.mrb[65].mxu1 }
 0x197   : > { %v1217_v61 = vpop.f32.mrb[66].mxu0  ;;  %v1417_v62 = vpop.f32.mrb[66].mxu1 }
 0x198   : > { %v1517_v63 = vmax.f32 %v1215_v57, 0.0  ;;  %v1567_v0 = vmax.f32 %v1415_v58, 0.0  ;;  %v1218_v1 = vadd.f32 %v3055_v49, %v1217_v61  ;;  %v1418_v2 = vadd.f32 %v3055_v49, %v1417_v62  ;;  %v1219_v3 = vpop.f32.mrb[67].mxu0  ;;  %v1419_v4 = vpop.f32.mrb[67].mxu1 }
 0x19a   : > { %v2502_v5 = vpack.c.bf16 %v1517_v63, %v1517_v63  ;;  %v2552_v6 = vpack.c.bf16 %v1567_v0, %v1567_v0  ;;  %v1518_v7 = vmax.f32 %v1218_v1, 0.0  ;;  %v1568_v8 = vmax.f32 %v1418_v2, 0.0 }
 0x19c   : > { %2018 = vst.msk [vmem:[%s3065_s30 + $0x80] sm:$0xf] %vm1985_vm1, %v2502_v5  ;;  %2068 = vst.msk [vmem:[%s3065_s30 + $0x148] sm:$0xf] %vm1985_vm1, %v2552_v6  ;;  %v2503_v9 = vpack.c.bf16 %v1518_v7, %v1518_v7  ;;  %v2553_v10 = vpack.c.bf16 %v1568_v8, %v1568_v8 }
 0x19d   : > { %v1222_v11 = vpop.f32.mrb[68].mxu0  ;;  %v1422_v12 = vpop.f32.mrb[68].mxu1 }
 0x19e   : > { %2019 = vst.msk [vmem:[%s3065_s30 + $0x84] sm:$0xf] %vm1985_vm1, %v2503_v9  ;;  %2069 = vst.msk [vmem:[%s3065_s30 + $0x14c] sm:$0xf] %vm1985_vm1, %v2553_v10  ;;  %v1223_v13 = vadd.f32 %v3055_v49, %v1222_v11  ;;  %v1423_v14 = vadd.f32 %v3055_v49, %v1422_v12  ;;  %v1224_v15 = vpop.f32.mrb[69].mxu0  ;;  %v1424_v16 = vpop.f32.mrb[69].mxu1 }
 0x19f   : > { %v1225_v17 = vpop.f32.mrb[70].mxu0  ;;  %v1425_v18 = vpop.f32.mrb[70].mxu1 }
 0x1a0   : > { %v1519_v19 = vmax.f32 %v1223_v13, 0.0  ;;  %v1569_v20 = vmax.f32 %v1423_v14, 0.0  ;;  %v1226_v21 = vadd.f32 %v3055_v49, %v1225_v17  ;;  %v1426_v22 = vadd.f32 %v3055_v49, %v1425_v18  ;;  %v1227_v23 = vpop.f32.mrb[71].mxu0  ;;  %v1427_v24 = vpop.f32.mrb[71].mxu1 }
 0x1a2   : > { %v2504_v25 = vpack.c.bf16 %v1519_v19, %v1519_v19  ;;  %v2554_v26 = vpack.c.bf16 %v1569_v20, %v1569_v20  ;;  %v1520_v27 = vmax.f32 %v1226_v21, 0.0  ;;  %v1570_v28 = vmax.f32 %v1426_v22, 0.0 }
 0x1a4   : > { %2020 = vst.msk [vmem:[%s3065_s30 + $0x88] sm:$0xf] %vm1985_vm1, %v2504_v25  ;;  %2070 = vst.msk [vmem:[%s3065_s30 + $0x150] sm:$0xf] %vm1985_vm1, %v2554_v26  ;;  %v2505_v29 = vpack.c.bf16 %v1520_v27, %v1520_v27  ;;  %v2555_v30 = vpack.c.bf16 %v1570_v28, %v1570_v28 }
 0x1a5   : > { %v1230_v31 = vpop.f32.mrb[72].mxu0  ;;  %v1430_v32 = vpop.f32.mrb[72].mxu1 }
 0x1a6   : > { %2021 = vst.msk [vmem:[%s3065_s30 + $0x8c] sm:$0xf] %vm1985_vm1, %v2505_v29  ;;  %2071 = vst.msk [vmem:[%s3065_s30 + $0x154] sm:$0xf] %vm1985_vm1, %v2555_v30  ;;  %v1231_v33 = vadd.f32 %v3055_v49, %v1230_v31  ;;  %v1431_v34 = vadd.f32 %v3055_v49, %v1430_v32  ;;  %v1232_v35 = vpop.f32.mrb[73].mxu0  ;;  %v1432_v36 = vpop.f32.mrb[73].mxu1 }
 0x1a7   : > { %v1233_v37 = vpop.f32.mrb[74].mxu0  ;;  %v1433_v38 = vpop.f32.mrb[74].mxu1 }
 0x1a8   : > { %v1521_v39 = vmax.f32 %v1231_v33, 0.0  ;;  %v1571_v40 = vmax.f32 %v1431_v34, 0.0  ;;  %v1234_v41 = vadd.f32 %v3055_v49, %v1233_v37  ;;  %v1434_v42 = vadd.f32 %v3055_v49, %v1433_v38  ;;  %v1235_v43 = vpop.f32.mrb[75].mxu0  ;;  %v1435_v44 = vpop.f32.mrb[75].mxu1  ;;  %v3318_v38 = vld [vmem:[%s3052_s26] ss:$0 sm:$0xff] }
 0x1aa   : > { %v2506_v45 = vpack.c.bf16 %v1521_v39, %v1521_v39  ;;  %v2556_v46 = vpack.c.bf16 %v1571_v40, %v1571_v40  ;;  %v1522_v47 = vmax.f32 %v1234_v41, 0.0  ;;  %v1572_v48 = vmax.f32 %v1434_v42, 0.0 }
 0x1ac   : > { %2022 = vst.msk [vmem:[%s3065_s30 + $0x90] sm:$0xf] %vm1985_vm1, %v2506_v45  ;;  %2072 = vst.msk [vmem:[%s3065_s30 + $0x158] sm:$0xf] %vm1985_vm1, %v2556_v46  ;;  %v2507_v50 = vpack.c.bf16 %v1522_v47, %v1522_v47  ;;  %v2557_v51 = vpack.c.bf16 %v1572_v48, %v1572_v48 }
 0x1ad   : > { %v1238_v52 = vpop.f32.mrb[76].mxu0  ;;  %v1438_v53 = vpop.f32.mrb[76].mxu1 }
 0x1ae   : > { %2023 = vst.msk [vmem:[%s3065_s30 + $0x94] sm:$0xf] %vm1985_vm1, %v2507_v50  ;;  %2073 = vst.msk [vmem:[%s3065_s30 + $0x15c] sm:$0xf] %vm1985_vm1, %v2557_v51  ;;  %v1239_v54 = vadd.f32 %v3055_v49, %v1238_v52  ;;  %v1439_v55 = vadd.f32 %v3055_v49, %v1438_v53  ;;  %v1240_v56 = vpop.f32.mrb[77].mxu0  ;;  %v1440_v57 = vpop.f32.mrb[77].mxu1 }
 0x1af   : > { %v1241_v58 = vpop.f32.mrb[78].mxu0  ;;  %v1441_v59 = vpop.f32.mrb[78].mxu1 }
 0x1b0   : > { %v1523_v60 = vmax.f32 %v1239_v54, 0.0  ;;  %v1573_v61 = vmax.f32 %v1439_v55, 0.0  ;;  %v1242_v62 = vadd.f32 %v3055_v49, %v1241_v58  ;;  %v1442_v63 = vadd.f32 %v3055_v49, %v1441_v59  ;;  %v1243_v0 = vpop.f32.mrb[79].mxu0  ;;  %v1443_v1 = vpop.f32.mrb[79].mxu1 }
 0x1b2   : > { %v2508_v2 = vpack.c.bf16 %v1523_v60, %v1523_v60  ;;  %v2558_v3 = vpack.c.bf16 %v1573_v61, %v1573_v61  ;;  %v1524_v4 = vmax.f32 %v1242_v62, 0.0  ;;  %v1574_v5 = vmax.f32 %v1442_v63, 0.0 }
 0x1b4   : > { %2024 = vst.msk [vmem:[%s3065_s30 + $0x98] sm:$0xf] %vm1985_vm1, %v2508_v2  ;;  %2074 = vst.msk [vmem:[%s3065_s30 + $0x160] sm:$0xf] %vm1985_vm1, %v2558_v3  ;;  %v2509_v6 = vpack.c.bf16 %v1524_v4, %v1524_v4  ;;  %v2559_v7 = vpack.c.bf16 %v1574_v5, %v1574_v5 }
 0x1b5   : > { %v1246_v8 = vpop.f32.mrb[80].mxu0  ;;  %v1446_v9 = vpop.f32.mrb[80].mxu1 }
 0x1b6   : > { %2025 = vst.msk [vmem:[%s3065_s30 + $0x9c] sm:$0xf] %vm1985_vm1, %v2509_v6  ;;  %2075 = vst.msk [vmem:[%s3065_s30 + $0x164] sm:$0xf] %vm1985_vm1, %v2559_v7  ;;  %v1247_v10 = vadd.f32 %v3055_v49, %v1246_v8  ;;  %v1447_v11 = vadd.f32 %v3055_v49, %v1446_v9  ;;  %v1248_v12 = vpop.f32.mrb[81].mxu0  ;;  %v1448_v13 = vpop.f32.mrb[81].mxu1 }
 0x1b7   : > { %v1249_v14 = vpop.f32.mrb[82].mxu0  ;;  %v1449_v15 = vpop.f32.mrb[82].mxu1 }
 0x1b8   : > { %v1525_v16 = vmax.f32 %v1247_v10, 0.0  ;;  %v1575_v17 = vmax.f32 %v1447_v11, 0.0  ;;  %v1250_v18 = vadd.f32 %v3055_v49, %v1249_v14  ;;  %v1450_v19 = vadd.f32 %v3055_v49, %v1449_v15  ;;  %v1251_v20 = vpop.f32.mrb[83].mxu0  ;;  %v1451_v21 = vpop.f32.mrb[83].mxu1 }
 0x1ba   : > { %v2510_v22 = vpack.c.bf16 %v1525_v16, %v1525_v16  ;;  %v2560_v23 = vpack.c.bf16 %v1575_v17, %v1575_v17  ;;  %v1526_v24 = vmax.f32 %v1250_v18, 0.0  ;;  %v1576_v25 = vmax.f32 %v1450_v19, 0.0 }
 0x1bc   : > { %2026 = vst.msk [vmem:[%s3065_s30 + $0xa0] sm:$0xf] %vm1985_vm1, %v2510_v22  ;;  %2076 = vst.msk [vmem:[%s3065_s30 + $0x168] sm:$0xf] %vm1985_vm1, %v2560_v23  ;;  %v2511_v26 = vpack.c.bf16 %v1526_v24, %v1526_v24  ;;  %v2561_v27 = vpack.c.bf16 %v1576_v25, %v1576_v25 }
 0x1bd   : > { %v1254_v28 = vpop.f32.mrb[84].mxu0  ;;  %v1454_v29 = vpop.f32.mrb[84].mxu1 }
 0x1be   : > { %2027 = vst.msk [vmem:[%s3065_s30 + $0xa4] sm:$0xf] %vm1985_vm1, %v2511_v26  ;;  %2077 = vst.msk [vmem:[%s3065_s30 + $0x16c] sm:$0xf] %vm1985_vm1, %v2561_v27  ;;  %v1255_v30 = vadd.f32 %v3055_v49, %v1254_v28  ;;  %v1455_v31 = vadd.f32 %v3055_v49, %v1454_v29  ;;  %v1256_v32 = vpop.f32.mrb[85].mxu0  ;;  %v1456_v33 = vpop.f32.mrb[85].mxu1 }
 0x1bf   : > { %v1257_v34 = vpop.f32.mrb[86].mxu0  ;;  %v1457_v35 = vpop.f32.mrb[86].mxu1 }
 0x1c0   : > { %v1527_v36 = vmax.f32 %v1255_v30, 0.0  ;;  %v1577_v37 = vmax.f32 %v1455_v31, 0.0  ;;  %v1258_v39 = vadd.f32 %v3318_v38, %v1257_v34  ;;  %v1458_v40 = vadd.f32 %v3318_v38, %v1457_v35  ;;  %v1259_v41 = vpop.f32.mrb[87].mxu0  ;;  %v1459_v42 = vpop.f32.mrb[87].mxu1 }
 0x1c2   : > { %v2512_v43 = vpack.c.bf16 %v1527_v36, %v1527_v36  ;;  %v2562_v49 = vpack.c.bf16 %v1577_v37, %v1577_v37  ;;  %v1528_v44 = vmax.f32 %v1258_v39, 0.0  ;;  %v1578_v45 = vmax.f32 %v1458_v40, 0.0 }
 0x1c4   : > { %2028 = vst.msk [vmem:[%s3065_s30 + $0xa8] sm:$0xf] %vm1985_vm1, %v2512_v43  ;;  %2078 = vst.msk [vmem:[%s3065_s30 + $0x170] sm:$0xf] %vm1985_vm1, %v2562_v49  ;;  %v2513_v46 = vpack.c.bf16 %v1528_v44, %v1528_v44  ;;  %v2563_v47 = vpack.c.bf16 %v1578_v45, %v1578_v45 }
 0x1c5   : > { %v1262_v48 = vpop.f32.mrb[88].mxu0  ;;  %v1462_v50 = vpop.f32.mrb[88].mxu1 }
 0x1c6   : > { %2029 = vst.msk [vmem:[%s3065_s30 + $0xac] sm:$0xf] %vm1985_vm1, %v2513_v46  ;;  %2079 = vst.msk [vmem:[%s3065_s30 + $0x174] sm:$0xf] %vm1985_vm1, %v2563_v47  ;;  %v1263_v51 = vadd.f32 %v3318_v38, %v1262_v48  ;;  %v1463_v52 = vadd.f32 %v3318_v38, %v1462_v50  ;;  %v1264_v53 = vpop.f32.mrb[89].mxu0  ;;  %v1464_v54 = vpop.f32.mrb[89].mxu1 }
 0x1c7   : > { %v1265_v55 = vpop.f32.mrb[90].mxu0  ;;  %v1465_v56 = vpop.f32.mrb[90].mxu1 }
 0x1c8   : > { %v1529_v57 = vmax.f32 %v1263_v51, 0.0  ;;  %v1579_v58 = vmax.f32 %v1463_v52, 0.0  ;;  %v1266_v59 = vadd.f32 %v3318_v38, %v1265_v55  ;;  %v1466_v60 = vadd.f32 %v3318_v38, %v1465_v56  ;;  %v1267_v61 = vpop.f32.mrb[91].mxu0  ;;  %v1467_v62 = vpop.f32.mrb[91].mxu1 }
 0x1ca   : > { %v2514_v63 = vpack.c.bf16 %v1529_v57, %v1529_v57  ;;  %v2564_v0 = vpack.c.bf16 %v1579_v58, %v1579_v58  ;;  %v1530_v1 = vmax.f32 %v1266_v59, 0.0  ;;  %v1580_v2 = vmax.f32 %v1466_v60, 0.0 }
 0x1cc   : > { %2030 = vst.msk [vmem:[%s3065_s30 + $0xb0] sm:$0xf] %vm1985_vm1, %v2514_v63  ;;  %2080 = vst.msk [vmem:[%s3065_s30 + $0x178] sm:$0xf] %vm1985_vm1, %v2564_v0  ;;  %v2515_v3 = vpack.c.bf16 %v1530_v1, %v1530_v1  ;;  %v2565_v4 = vpack.c.bf16 %v1580_v2, %v1580_v2 }
 0x1cd   : > { %v1270_v5 = vpop.f32.mrb[92].mxu0  ;;  %v1470_v6 = vpop.f32.mrb[92].mxu1 }
 0x1ce   : > { %2031 = vst.msk [vmem:[%s3065_s30 + $0xb4] sm:$0xf] %vm1985_vm1, %v2515_v3  ;;  %2081 = vst.msk [vmem:[%s3065_s30 + $0x17c] sm:$0xf] %vm1985_vm1, %v2565_v4  ;;  %v1271_v7 = vadd.f32 %v3318_v38, %v1270_v5  ;;  %v1471_v8 = vadd.f32 %v3318_v38, %v1470_v6  ;;  %v1272_v9 = vpop.f32.mrb[93].mxu0  ;;  %v1472_v10 = vpop.f32.mrb[93].mxu1 }
 0x1cf   : > { %v1273_v11 = vpop.f32.mrb[94].mxu0  ;;  %v1473_v12 = vpop.f32.mrb[94].mxu1 }
 0x1d0   : > { %v1531_v13 = vmax.f32 %v1271_v7, 0.0  ;;  %v1581_v14 = vmax.f32 %v1471_v8, 0.0  ;;  %v1274_v15 = vadd.f32 %v3318_v38, %v1273_v11  ;;  %v1474_v16 = vadd.f32 %v3318_v38, %v1473_v12  ;;  %v1275_v17 = vpop.f32.mrb[95].mxu0  ;;  %v1475_v18 = vpop.f32.mrb[95].mxu1 }
 0x1d2   : > { %v2516_v19 = vpack.c.bf16 %v1531_v13, %v1531_v13  ;;  %v2566_v20 = vpack.c.bf16 %v1581_v14, %v1581_v14  ;;  %v1532_v21 = vmax.f32 %v1274_v15, 0.0  ;;  %v1582_v22 = vmax.f32 %v1474_v16, 0.0 }
 0x1d4   : > { %2032 = vst.msk [vmem:[%s3065_s30 + $0xb8] sm:$0xf] %vm1985_vm1, %v2516_v19  ;;  %2082 = vst.msk [vmem:[%s3065_s30 + $0x180] sm:$0xf] %vm1985_vm1, %v2566_v20  ;;  %v2517_v23 = vpack.c.bf16 %v1532_v21, %v1532_v21  ;;  %v2567_v24 = vpack.c.bf16 %v1582_v22, %v1582_v22 }
 0x1d5   : > { %v1278_v25 = vpop.f32.mrb[96].mxu0  ;;  %v1478_v26 = vpop.f32.mrb[96].mxu1 }
 0x1d6   : > { %2033 = vst.msk [vmem:[%s3065_s30 + $0xbc] sm:$0xf] %vm1985_vm1, %v2517_v23  ;;  %2083 = vst.msk [vmem:[%s3065_s30 + $0x184] sm:$0xf] %vm1985_vm1, %v2567_v24  ;;  %v1279_v27 = vadd.f32 %v3318_v38, %v1278_v25  ;;  %v1479_v28 = vadd.f32 %v3318_v38, %v1478_v26  ;;  %v1280_v29 = vpop.f32.mrb[97].mxu0  ;;  %v1480_v30 = vpop.f32.mrb[97].mxu1 }
 0x1d7   : > { %v1281_v31 = vpop.f32.mrb[98].mxu0  ;;  %v1481_v32 = vpop.f32.mrb[98].mxu1 }
 0x1d8   : > { %v1533_v33 = vmax.f32 %v1279_v27, 0.0  ;;  %v1583_v34 = vmax.f32 %v1479_v28, 0.0  ;;  %v1282_v35 = vadd.f32 %v3318_v38, %v1281_v31  ;;  %v1482_v36 = vadd.f32 %v3318_v38, %v1481_v32  ;;  %v1283_v37 = vpop.f32.mrb[99].mxu0  ;;  %v1483_v39 = vpop.f32.mrb[99].mxu1 }
 0x1da   : > { %v2518_v40 = vpack.c.bf16 %v1533_v33, %v1533_v33  ;;  %v2568_v41 = vpack.c.bf16 %v1583_v34, %v1583_v34  ;;  %v1534_v42 = vmax.f32 %v1282_v35, 0.0  ;;  %v1584_v43 = vmax.f32 %v1482_v36, 0.0 }
 0x1dc   : > { %2034 = vst.msk [vmem:[%s3065_s30 + $0xc0] sm:$0xf] %vm1985_vm1, %v2518_v40  ;;  %2084 = vst.msk [vmem:[%s3065_s30 + $0x188] sm:$0xf] %vm1985_vm1, %v2568_v41  ;;  %v2519_v49 = vpack.c.bf16 %v1534_v42, %v1534_v42  ;;  %v2569_v44 = vpack.c.bf16 %v1584_v43, %v1584_v43 }
 0x1de   : > { %2035 = vst.msk [vmem:[%s3065_s30 + $0xc4] sm:$0xf] %vm1985_vm1, %v2519_v49  ;;  %2085 = vst.msk [vmem:[%s3065_s30 + $0x18c] sm:$0xf] %vm1985_vm1, %v2569_v44 }
 0x1df PF: > { %s13_s14 = sadd.s32 1, %s2807_s14   ;;  %s3379_s12 = smov %s2803_s13 }
 0x1e0   : > { %p10_p5 = scmp.ge.s32.totalorder %s13_s14, 4   ;;  %s3380_s13 = smov %s3382_s15 }
 0x1e2   :  { %12 = sbr.rel (!%p10_p5) target bundleno = 2 (0x2), region = 68 }

// kernel: critic_forward_pallas.4
= control target key start
LH: loop header
LB: loop body
LE: loop exit
PB: predicated region body
PF: predicated region fallthrough
CT: control target
= control target key end

     0   :  { %s1180_s12 = smov 0   ;;  %s1182_s13 = smov 0   ;;  %s1332_s0 = inlined_call_operand.vmem [shape: bf16[2,162,256], index: 0, kind: input, shape index: {}]   ;;  %s1333_s1 = inlined_call_operand.vmem [shape: bf16[2,256,32], index: 1, kind: input, shape index: {}]   ;;  %s1334_s2 = inlined_call_operand.vmem [shape: f32[2,1,32], index: 2, kind: input, shape index: {}]   ;;  %s1335_s3 = inlined_call_operand.vmem [shape: bf16[2,162,32], index: 3, kind: output, shape index: {}]  }
   0x1   :  { %s1184_s14 = smov 0  }
   0x2 LB: > { %s25_s15 = sadd.s32 1, %s1154_s13  ;;  %p875_p0 = scmp.ge.s32.totalorder %s1158_s14, 1  ;;  %s1158_s14 = sphi %s1184_s14, %s13_s14   ;;  %s1154_s13 = sphi %s1182_s13, %s1337_s13   ;;  %s1150_s12 = sphi %s1180_s12, %s1336_s12  }
   0x3   : > { %p27_p1 = scmp.ge.s32.totalorder %s25_s15, 2  ;;  %p177_p2 = scmp.lt.s32.totalorder %s1158_s14, 3 }
   0x5   : > { %s1339_s15 = smov (%p27_p1, %s25_s15), 0  ;;  %p178_p3 = pnand %p875_p0, %p177_p2 }
   0x6   : > { %p219_p4 = scmp.lt.s32.totalorder (!%p178_p3), %s1150_s12, 1  ;;  %vm737_vm0 = vcmask (!%p178_p3), 257024   ;;  %vm758_vm1 = vcmask (!%p178_p3), 253952  }
   0x7   : > { %181 = sbr.rel (%p178_p3) target bundleno = 314 (0x13a), region = 32 }
   0xe   : > { %s1341_s12 = smov (!%p219_p4, %s1150_s12), 1 }
   0xf   : > { %s942_s16 = sshll.u32 %s1341_s12, 7  ;;  %s1062_s20 = smul.u32 168, %s1341_s12 }
  0x10   : > { %s1204_s19 = scalar_lea.vmem %s1333_s1, %s942_s16  ;;  %s236_s26 = scalar_lea.vmem %s1334_s2, %s1341_s12 }
  0x11   : > { %v1088_v0 = vld [vmem:[%s1204_s19 + $0x40] sm:$0xff]   ;;  %v1090_v2 = vld [vmem:[%s1204_s19 + $0x48] sm:$0xff]   ;;  %v1092_v4 = vld [vmem:[%s1204_s19 + $0x50] sm:$0xff]   ;;  %s1219_s23 = scalar_lea.vmem %s1332_s0, %s1062_s20  ;;  %s1063_s27 = smul.u32 84, %s1341_s12 }
  0x12   : > { %v1089_v1 = vld [vmem:[%s1204_s19] sm:$0xff]   ;;  %964 = vmatprep.subr.bf16.mxu0 %v1088_v0  ;;  %1046 = vmatprep.subr.bf16.mxu1 %v1088_v0  ;;  %v1091_v3 = vld [vmem:[%s1204_s19 + $0x8] sm:$0xff]   ;;  %v1093_v5 = vld [vmem:[%s1204_s19 + $0x10] sm:$0xff]  }
  0x13   : > { %965 = vmatpush3.bf16.msra.mxu0 %v1089_v1  ;;  %1054 = vmatpush3.bf16.msra.mxu1 %v1089_v1  ;;  %v1094_v6 = vld [vmem:[%s1204_s19 + $0x58] sm:$0xff]   ;;  %v1096_v8 = vld [vmem:[%s1204_s19 + $0x60] sm:$0xff]   ;;  %v1098_v10 = vld [vmem:[%s1204_s19 + $0x68] sm:$0xff]   ;;  %s1263_s30 = scalar_lea.vmem %s1335_s3, %s1063_s27 }
  0x14   : > { %966 = vmatprep.subr.bf16.mxu0 %v1090_v2  ;;  %1047 = vmatprep.subr.bf16.mxu1 %v1090_v2  ;;  %v1095_v7 = vld [vmem:[%s1204_s19 + $0x18] sm:$0xff]   ;;  %v1097_v9 = vld [vmem:[%s1204_s19 + $0x20] sm:$0xff]   ;;  %v1099_v13 = vld [vmem:[%s1204_s19 + $0x28] sm:$0xff]  }
  0x15   : > { %v1106_v11 = vld [vmem:[%s1219_s23 + $0x4] ss:$8 sps:$4 sm:$0xff]   ;;  %v1100_v14 = vld [vmem:[%s1204_s19 + $0x70] sm:$0xff]   ;;  %v1102_v16 = vld [vmem:[%s1204_s19 + $0x78] sm:$0xff]  }
  0x16   : > { %v1109_v12 = vld [vmem:[%s1219_s23 + $0x64] ss:$8 sps:$4 sm:$0xff]   ;;  %543 = vmatprep.mubr.bf16.mxu0 %v1106_v11  ;;  %v1101_v15 = vld [vmem:[%s1204_s19 + $0x30] sm:$0xff]   ;;  %v1103_v17 = vld [vmem:[%s1204_s19 + $0x38] sm:$0xff]  }
  0x17   : > { %967 = vmatpush3.bf16.msra.mxu0 %v1091_v3  ;;  %1055 = vmatpush3.bf16.msra.mxu1 %v1091_v3  ;;  %v1104_v18 = vld [vmem:[%s1219_s23] ss:$8 sps:$4 sm:$0xff]   ;;  %v1110_v20 = vld [vmem:[%s1219_s23 + $0x14] ss:$8 sps:$4 sm:$0xff]   ;;  %v1112_v22 = vld [vmem:[%s1219_s23 + $0x10] ss:$8 sps:$4 sm:$0xff]  }
  0x18   : > { %968 = vmatprep.subr.bf16.mxu0 %v1092_v4  ;;  %1048 = vmatprep.subr.bf16.mxu1 %v1092_v4  ;;  %v1107_v19 = vld [vmem:[%s1219_s23 + $0x60] ss:$8 sps:$4 sm:$0xff]   ;;  %v1113_v21 = vld [vmem:[%s1219_s23 + $0x74] ss:$8 sps:$4 sm:$0xff]   ;;  %v1117_v23 = vld [vmem:[%s1219_s23 + $0x70] ss:$8 sps:$4 sm:$0xff]  }
  0x19   : > { %591 = vmatprep.mubr.bf16.mxu1 %v1109_v12  ;;  %v1115_v24 = vld [vmem:[%s1219_s23 + $0x24] ss:$8 sps:$4 sm:$0xff]   ;;  %v1118_v26 = vld [vmem:[%s1219_s23 + $0x20] ss:$8 sps:$4 sm:$0xff]   ;;  %v1121_v28 = vld [vmem:[%s1219_s23 + $0x34] ss:$8 sps:$4 sm:$0xff]  }
  0x1a   : > { %v1119_v25 = vld [vmem:[%s1219_s23 + $0x84] ss:$8 sps:$4 sm:$0xff]   ;;  %v1123_v27 = vld [vmem:[%s1219_s23 + $0x80] ss:$8 sps:$4 sm:$0xff]   ;;  %v1125_v29 = vld [vmem:[%s1219_s23 + $0x94] ss:$8 sps:$4 sm:$0xff]  }
  0x1b   : > { %969 = vmatpush3.bf16.msra.mxu0 %v1093_v5  ;;  %1056 = vmatpush3.bf16.msra.mxu1 %v1093_v5  ;;  %v268_v30 = vld [vmem:[%s1219_s23 + $0xa0] sm:$0x11]  ;;  %v1124_v31 = vld [vmem:[%s1219_s23 + $0x30] ss:$8 sps:$4 sm:$0xff]   ;;  %v1132_v37 = vld [vmem:[%s1219_s23 + $0x54] ss:$8 sps:$4 sm:$0xff]  }
  0x1c   : > { %970 = vmatprep.subr.bf16.mxu0 %v1094_v6  ;;  %1049 = vmatprep.subr.bf16.mxu1 %v1094_v6  ;;  %v1129_v32 = vld [vmem:[%s1219_s23 + $0x90] ss:$8 sps:$4 sm:$0xff]   ;;  %v1127_v33 = vld [vmem:[%s1219_s23 + $0x44] ss:$8 sps:$4 sm:$0xff]   ;;  %v902_v34 = vcombine.high %v268_v30, %v268_v30  ;;  %v1130_v35 = vld [vmem:[%s1219_s23 + $0x40] ss:$8 sps:$4 sm:$0xff]   ;;  %v901_v36 = vcombine.low %v268_v30, %v268_v30 }
  0x1d   : > { %v1135_v38 = vld [vmem:[%s1219_s23 + $0x50] ss:$8 sps:$4 sm:$0xff]   ;;  %v1253_v41 = vld [vmem:[%s236_s26] ss:$0 sm:$0xff] }
  0x1f   : > { %971 = vmatpush3.bf16.msra.mxu0 %v1095_v7  ;;  %1057 = vmatpush3.bf16.msra.mxu1 %v1095_v7 }
  0x20   : > { %972 = vmatprep.subr.bf16.mxu0 %v1096_v8  ;;  %1050 = vmatprep.subr.bf16.mxu1 %v1096_v8 }
  0x23   : > { %973 = vmatpush3.bf16.msra.mxu0 %v1097_v9  ;;  %1058 = vmatpush3.bf16.msra.mxu1 %v1097_v9 }
  0x24   : > { %974 = vmatprep.subr.bf16.mxu0 %v1098_v10  ;;  %1051 = vmatprep.subr.bf16.mxu1 %v1098_v10 }
  0x27   : > { %975 = vmatpush3.bf16.msra.mxu0 %v1099_v13  ;;  %1059 = vmatpush3.bf16.msra.mxu1 %v1099_v13 }
  0x28   : > { %976 = vmatprep.subr.bf16.mxu0 %v1100_v14  ;;  %1052 = vmatprep.subr.bf16.mxu1 %v1100_v14 }
  0x2b   : > { %977 = vmatpush3.bf16.msra.mxu0 %v1101_v15  ;;  %1060 = vmatpush3.bf16.msra.mxu1 %v1101_v15 }
  0x2c   : > { %978 = vmatprep.subr.bf16.mxu0 %v1102_v16  ;;  %1053 = vmatprep.subr.bf16.mxu1 %v1102_v16 }
  0x2f   : > { %979 = vmatpush3.bf16.msra.mxu0 %v1103_v17  ;;  %1061 = vmatpush3.bf16.msra.mxu1 %v1103_v17 }
  0x32   : > { %544 = vmatmul.mubr.bf16.vlgmr.msra.gmra.mrb[0].mxu0 %v1104_v18  ;;  %592 = vmatmul.mubr.bf16.vlgmr.msra.gmra.mrb[0].mxu1 %v1107_v19 }
  0x33   : > { %551 = vmatprep.mubr.bf16.mxu0 %v1110_v20  ;;  %599 = vmatprep.mubr.bf16.mxu1 %v1113_v21 }
  0x3a   : > { %552 = vmatmul.mubr.bf16.gmra.mrb[4].mxu0 %v1112_v22  ;;  %600 = vmatmul.mubr.bf16.gmra.mrb[4].mxu1 %v1117_v23 }
  0x3b   : > { %559 = vmatprep.mubr.bf16.mxu0 %v1115_v24  ;;  %607 = vmatprep.mubr.bf16.mxu1 %v1119_v25 }
  0x42   : > { %560 = vmatmul.mubr.bf16.gmra.mrb[8].mxu0 %v1118_v26  ;;  %608 = vmatmul.mubr.bf16.gmra.mrb[8].mxu1 %v1123_v27 }
  0x43   : > { %567 = vmatprep.mubr.bf16.mxu0 %v1121_v28  ;;  %615 = vmatprep.mubr.bf16.mxu1 %v1125_v29 }
  0x4a   : > { %568 = vmatmul.mubr.bf16.gmra.mrb[12].mxu0 %v1124_v31  ;;  %616 = vmatmul.mubr.bf16.gmra.mrb[12].mxu1 %v1129_v32 }
  0x4b   : > { %575 = vmatprep.mubr.bf16.mxu0 %v1127_v33  ;;  %623 = vmatprep.mubr.bf16.mxu1 %v902_v34 }
  0x52   : > { %576 = vmatmul.mubr.bf16.gmra.mrb[16].mxu0 %v1130_v35  ;;  %624 = vmatmul.mubr.bf16.gmra.mrb[16].mxu1 %v901_v36 }
  0x53   : > { %583 = vmatprep.mubr.bf16.mxu0 %v1132_v37 }
  0x5a   : > { %584 = vmatmul.mubr.bf16.gmra.mrb[20].mxu0 %v1135_v38 }
 0x105   : > { %v980_v39 = vpop.f32.mrb[0].mxu0  ;;  %v1016_v40 = vpop.f32.mrb[0].mxu1 }
 0x106   : > { %v981_v42 = vpop.f32.mrb[1].mxu0  ;;  %v1017_v43 = vpop.f32.mrb[1].mxu1 }
 0x107   : > { %v982_v44 = vadd.f32 %v981_v42, %v980_v39  ;;  %v983_v45 = vpop.f32.mrb[2].mxu0  ;;  %v1018_v46 = vadd.f32 %v1017_v43, %v1016_v40  ;;  %v1019_v47 = vpop.f32.mrb[2].mxu1 }
 0x108   : > { %v984_v48 = vpop.f32.mrb[3].mxu0  ;;  %v1020_v49 = vpop.f32.mrb[3].mxu1 }
 0x109   : > { %v546_v50 = vadd.f32 %v982_v44, %v1253_v41  ;;  %v985_v51 = vadd.f32 %v984_v48, %v983_v45  ;;  %v594_v52 = vadd.f32 %v1018_v46, %v1253_v41  ;;  %v1021_v53 = vadd.f32 %v1020_v49, %v1019_v47 }
 0x10b   : > { %v631_v54 = vmax.f32 %v546_v50, 0.0  ;;  %v549_v55 = vadd.f32 %v985_v51, %v1253_v41  ;;  %v643_v56 = vmax.f32 %v594_v52, 0.0  ;;  %v597_v57 = vadd.f32 %v1021_v53, %v1253_v41 }
 0x10d   : > { %v943_v58 = vpack.c.bf16 %v631_v54, %v631_v54  ;;  %v632_v59 = vmax.f32 %v549_v55, 0.0  ;;  %v986_v60 = vpop.f32.mrb[4].mxu0  ;;  %v955_v61 = vpack.c.bf16 %v643_v56, %v643_v56  ;;  %v644_v62 = vmax.f32 %v597_v57, 0.0  ;;  %v1022_v63 = vpop.f32.mrb[4].mxu1 }
 0x10e   : > { %v987_v0 = vpop.f32.mrb[5].mxu0  ;;  %v1023_v1 = vpop.f32.mrb[5].mxu1 }
 0x10f   : > { %738 = vst.msk [vmem:[%s1263_s30] sm:$0xf] %vm737_vm0, %v943_v58  ;;  %v944_v2 = vpack.c.bf16 %v632_v59, %v632_v59  ;;  %750 = vst.msk [vmem:[%s1263_s30 + $0x30] sm:$0xf] %vm737_vm0, %v955_v61  ;;  %v988_v3 = vadd.f32 %v987_v0, %v986_v60  ;;  %v989_v4 = vpop.f32.mrb[6].mxu0  ;;  %v956_v5 = vpack.c.bf16 %v644_v62, %v644_v62  ;;  %v1025_v7 = vpop.f32.mrb[6].mxu1 }
 0x110   : > { %v1024_v6 = vadd.f32 %v1023_v1, %v1022_v63  ;;  %v990_v8 = vpop.f32.mrb[7].mxu0  ;;  %v1026_v9 = vpop.f32.mrb[7].mxu1 }
 0x111   : > { %739 = vst.msk [vmem:[%s1263_s30 + $0x4] sm:$0xf] %vm737_vm0, %v944_v2  ;;  %v554_v10 = vadd.f32 %v988_v3, %v1253_v41  ;;  %751 = vst.msk [vmem:[%s1263_s30 + $0x34] sm:$0xf] %vm737_vm0, %v956_v5  ;;  %v991_v11 = vadd.f32 %v990_v8, %v989_v4  ;;  %v1027_v13 = vadd.f32 %v1026_v9, %v1025_v7 }
 0x112   : > { %v602_v12 = vadd.f32 %v1024_v6, %v1253_v41 }
 0x113   : > { %v633_v14 = vmax.f32 %v554_v10, 0.0  ;;  %v557_v15 = vadd.f32 %v991_v11, %v1253_v41  ;;  %v605_v17 = vadd.f32 %v1027_v13, %v1253_v41 }
 0x114   : > { %v645_v16 = vmax.f32 %v602_v12, 0.0 }
 0x115   : > { %v945_v18 = vpack.c.bf16 %v633_v14, %v633_v14  ;;  %v634_v19 = vmax.f32 %v557_v15, 0.0  ;;  %v992_v20 = vpop.f32.mrb[8].mxu0  ;;  %v646_v22 = vmax.f32 %v605_v17, 0.0  ;;  %v1028_v23 = vpop.f32.mrb[8].mxu1 }
 0x116   : > { %v957_v21 = vpack.c.bf16 %v645_v16, %v645_v16  ;;  %v993_v24 = vpop.f32.mrb[9].mxu0  ;;  %v1029_v25 = vpop.f32.mrb[9].mxu1 }
 0x117   : > { %740 = vst.msk [vmem:[%s1263_s30 + $0x8] sm:$0xf] %vm737_vm0, %v945_v18  ;;  %v946_v26 = vpack.c.bf16 %v634_v19, %v634_v19  ;;  %v994_v27 = vadd.f32 %v993_v24, %v992_v20  ;;  %v995_v28 = vpop.f32.mrb[10].mxu0  ;;  %v958_v29 = vpack.c.bf16 %v646_v22, %v646_v22  ;;  %v1030_v30 = vadd.f32 %v1029_v25, %v1028_v23  ;;  %v1031_v31 = vpop.f32.mrb[10].mxu1 }
 0x118   : > { %752 = vst.msk [vmem:[%s1263_s30 + $0x38] sm:$0xf] %vm737_vm0, %v957_v21  ;;  %v996_v32 = vpop.f32.mrb[11].mxu0  ;;  %v1032_v33 = vpop.f32.mrb[11].mxu1 }
 0x119   : > { %741 = vst.msk [vmem:[%s1263_s30 + $0xc] sm:$0xf] %vm737_vm0, %v946_v26  ;;  %v562_v34 = vadd.f32 %v994_v27, %v1253_v41  ;;  %753 = vst.msk [vmem:[%s1263_s30 + $0x3c] sm:$0xf] %vm737_vm0, %v958_v29  ;;  %v997_v35 = vadd.f32 %v996_v32, %v995_v28  ;;  %v610_v36 = vadd.f32 %v1030_v30, %v1253_v41 }
 0x11a   : > { %v1033_v37 = vadd.f32 %v1032_v33, %v1031_v31 }
 0x11b   : > { %v635_v38 = vmax.f32 %v562_v34, 0.0  ;;  %v565_v39 = vadd.f32 %v997_v35, %v1253_v41  ;;  %v647_v40 = vmax.f32 %v610_v36, 0.0 }
 0x11c   : > { %v613_v42 = vadd.f32 %v1033_v37, %v1253_v41 }
 0x11d   : > { %v947_v43 = vpack.c.bf16 %v635_v38, %v635_v38  ;;  %v636_v44 = vmax.f32 %v565_v39, 0.0  ;;  %v998_v45 = vpop.f32.mrb[12].mxu0  ;;  %v959_v46 = vpack.c.bf16 %v647_v40, %v647_v40  ;;  %v1034_v48 = vpop.f32.mrb[12].mxu1 }
 0x11e   : > { %v648_v47 = vmax.f32 %v613_v42, 0.0  ;;  %v999_v49 = vpop.f32.mrb[13].mxu0  ;;  %v1035_v50 = vpop.f32.mrb[13].mxu1 }
 0x11f   : > { %742 = vst.msk [vmem:[%s1263_s30 + $0x10] sm:$0xf] %vm737_vm0, %v947_v43  ;;  %v948_v51 = vpack.c.bf16 %v636_v44, %v636_v44  ;;  %754 = vst.msk [vmem:[%s1263_s30 + $0x40] sm:$0xf] %vm737_vm0, %v959_v46  ;;  %v1000_v52 = vadd.f32 %v999_v49, %v998_v45  ;;  %v1001_v53 = vpop.f32.mrb[14].mxu0  ;;  %v1036_v55 = vadd.f32 %v1035_v50, %v1034_v48  ;;  %v1037_v56 = vpop.f32.mrb[14].mxu1 }
 0x120   : > { %v960_v54 = vpack.c.bf16 %v648_v47, %v648_v47  ;;  %v1002_v57 = vpop.f32.mrb[15].mxu0  ;;  %v1038_v58 = vpop.f32.mrb[15].mxu1 }
 0x121   : > { %743 = vst.msk [vmem:[%s1263_s30 + $0x14] sm:$0xf] %vm737_vm0, %v948_v51  ;;  %v570_v59 = vadd.f32 %v1000_v52, %v1253_v41  ;;  %v1003_v60 = vadd.f32 %v1002_v57, %v1001_v53  ;;  %v618_v61 = vadd.f32 %v1036_v55, %v1253_v41  ;;  %v1039_v62 = vadd.f32 %v1038_v58, %v1037_v56 }
 0x122   : > { %755 = vst.msk [vmem:[%s1263_s30 + $0x44] sm:$0xf] %vm737_vm0, %v960_v54 }
 0x123   : > { %v637_v63 = vmax.f32 %v570_v59, 0.0  ;;  %v573_v0 = vadd.f32 %v1003_v60, %v1253_v41  ;;  %v649_v1 = vmax.f32 %v618_v61, 0.0  ;;  %v621_v2 = vadd.f32 %v1039_v62, %v1253_v41 }
 0x125   : > { %v949_v3 = vpack.c.bf16 %v637_v63, %v637_v63  ;;  %v638_v4 = vmax.f32 %v573_v0, 0.0  ;;  %v1004_v5 = vpop.f32.mrb[16].mxu0  ;;  %v961_v6 = vpack.c.bf16 %v649_v1, %v649_v1  ;;  %v650_v7 = vmax.f32 %v621_v2, 0.0  ;;  %v1040_v8 = vpop.f32.mrb[16].mxu1 }
 0x126   : > { %v1005_v9 = vpop.f32.mrb[17].mxu0  ;;  %v1041_v10 = vpop.f32.mrb[17].mxu1 }
 0x127   : > { %744 = vst.msk [vmem:[%s1263_s30 + $0x18] sm:$0xf] %vm737_vm0, %v949_v3  ;;  %v950_v11 = vpack.c.bf16 %v638_v4, %v638_v4  ;;  %756 = vst.msk [vmem:[%s1263_s30 + $0x48] sm:$0xf] %vm737_vm0, %v961_v6  ;;  %v1006_v12 = vadd.f32 %v1005_v9, %v1004_v5  ;;  %v1007_v13 = vpop.f32.mrb[18].mxu0  ;;  %v962_v14 = vpack.c.bf16 %v650_v7, %v650_v7  ;;  %v1043_v16 = vpop.f32.mrb[18].mxu1 }
 0x128   : > { %v1042_v15 = vadd.f32 %v1041_v10, %v1040_v8  ;;  %v1008_v17 = vpop.f32.mrb[19].mxu0  ;;  %v1044_v18 = vpop.f32.mrb[19].mxu1 }
 0x129   : > { %745 = vst.msk [vmem:[%s1263_s30 + $0x1c] sm:$0xf] %vm737_vm0, %v950_v11  ;;  %v578_v19 = vadd.f32 %v1006_v12, %v1253_v41  ;;  %757 = vst.msk [vmem:[%s1263_s30 + $0x4c] sm:$0xf] %vm737_vm0, %v962_v14  ;;  %v1009_v20 = vadd.f32 %v1008_v17, %v1007_v13 }
 0x12a   : > { %v626_v21 = vadd.f32 %v1042_v15, %v1253_v41 }
 0x12b   : > { %v639_v22 = vmax.f32 %v578_v19, 0.0  ;;  %v581_v23 = vadd.f32 %v1009_v20, %v1253_v41 }
 0x12c   : > { %v651_v24 = vmax.f32 %v626_v21, 0.0 }
 0x12d   : > { %v951_v25 = vpack.c.bf16 %v639_v22, %v639_v22  ;;  %v640_v26 = vmax.f32 %v581_v23, 0.0  ;;  %v1010_v27 = vpop.f32.mrb[20].mxu0 }
 0x12e   : > { %v963_v28 = vpack.c.bf16 %v651_v24, %v651_v24  ;;  %v1011_v29 = vpop.f32.mrb[21].mxu0 }
 0x12f   : > { %746 = vst.msk [vmem:[%s1263_s30 + $0x20] sm:$0xf] %vm737_vm0, %v951_v25  ;;  %v952_v30 = vpack.c.bf16 %v640_v26, %v640_v26  ;;  %v1012_v31 = vadd.f32 %v1011_v29, %v1010_v27  ;;  %v1013_v32 = vpop.f32.mrb[22].mxu0 }
 0x130   : > { %759 = vst.msk [vmem:[%s1263_s30 + $0x50] sm:$0x1] %vm758_vm1, %v963_v28  ;;  %v1014_v33 = vpop.f32.mrb[23].mxu0 }
 0x131   : > { %747 = vst.msk [vmem:[%s1263_s30 + $0x24] sm:$0xf] %vm737_vm0, %v952_v30  ;;  %v586_v34 = vadd.f32 %v1012_v31, %v1253_v41  ;;  %v1015_v35 = vadd.f32 %v1014_v33, %v1013_v32 }
 0x133   : > { %v641_v36 = vmax.f32 %v586_v34, 0.0  ;;  %v589_v37 = vadd.f32 %v1015_v35, %v1253_v41 }
 0x135   : > { %v953_v38 = vpack.c.bf16 %v641_v36, %v641_v36  ;;  %v642_v39 = vmax.f32 %v589_v37, 0.0 }
 0x137   : > { %748 = vst.msk [vmem:[%s1263_s30 + $0x28] sm:$0xf] %vm737_vm0, %v953_v38  ;;  %v954_v40 = vpack.c.bf16 %v642_v39, %v642_v39 }
 0x139   : > { %749 = vst.msk [vmem:[%s1263_s30 + $0x2c] sm:$0xf] %vm737_vm0, %v954_v40 }
 0x13a PF: > { %s13_s14 = sadd.s32 1, %s1158_s14   ;;  %s1336_s12 = smov %s1154_s13 }
 0x13b   : > { %p10_p5 = scmp.ge.s32.totalorder %s13_s14, 4   ;;  %s1337_s13 = smov %s1339_s15 }
 0x13d   :  { %12 = sbr.rel (!%p10_p5) target bundleno = 2 (0x2), region = 68 }

// kernel: critic_forward_pallas.5
= control target key start
LH: loop header
LB: loop body
LE: loop exit
PB: predicated region body
PF: predicated region fallthrough
CT: control target
= control target key end

     0   :  { %s8223_s25 = smov 0   ;;  %s8225_s26 = smov 0   ;;  %s9183_s0 = inlined_call_operand.vmem [shape: bf16[2,2,2592], index: 0, kind: input, shape index: {}]   ;;  %s9184_s1 = inlined_call_operand.vmem [shape: bf16[2,4], index: 1, kind: input, shape index: {}]   ;;  %s9185_s2 = inlined_call_operand.vmem [shape: bf16[2,2592,200], index: 2, kind: input, shape index: {}]   ;;  %s9186_s3 = inlined_call_operand.vmem [shape: f32[2,1,200], index: 3, kind: input, shape index: {}]   ;;  %s9187_s4 = inlined_call_operand.vmem [shape: bf16[2,200,512], index: 4, kind: input, shape index: {}]   ;;  %s9188_s5 = inlined_call_operand.vmem [shape: bf16[2,4,512], index: 5, kind: input, shape index: {}]   ;;  %s9189_s6 = inlined_call_operand.vmem [shape: f32[2,1,512], index: 6, kind: input, shape index: {}]   ;;  %s9190_s7 = inlined_call_operand.vmem [shape: bf16[2,512,512], index: 7, kind: input, shape index: {}]   ;;  %s9191_s8 = inlined_call_operand.vmem [shape: f32[2,1,512], index: 8, kind: input, shape index: {}]   ;;  %s9192_s9 = inlined_call_operand.vmem [shape: bf16[2,512,512], index: 9, kind: input, shape index: {}]   ;;  %s9193_s10 = inlined_call_operand.vmem [shape: f32[2,1,512], index: 10, kind: input, shape index: {}]   ;;  %s9194_s11 = inlined_call_operand.vmem [shape: bf16[2,512,8], index: 11, kind: input, shape index: {}]   ;;  %s9195_s12 = inlined_call_operand.vmem [shape: f32[2,1,8], index: 12, kind: input, shape index: {}]   ;;  %s9196_s13 = inlined_call_operand.vmem [shape: f32[2,2,8], index: 13, kind: output, shape index: {}]  }
   0x1   :  { %s8227_s27 = smov 0  }
   0x2 LB: > { %s35_s28 = sadd.s32 1, %s8144_s26  ;;  %p6310_p0 = scmp.ge.s32.totalorder %s8148_s27, 1  ;;  %s8148_s27 = sphi %s8227_s27, %s23_s27   ;;  %s8144_s26 = sphi %s8225_s26, %s9198_s26   ;;  %s8140_s25 = sphi %s8223_s25, %s9197_s25  }
   0x3   : > { %p37_p1 = scmp.ge.s32.totalorder %s35_s28, 2  ;;  %p518_p2 = scmp.lt.s32.totalorder %s8148_s27, 3 }
   0x5   : > { %s9200_s28 = smov (%p37_p1, %s35_s28), 0  ;;  %p519_p3 = pnand %p6310_p0, %p518_p2 }
   0x6   : > { %p619_p4 = scmp.lt.s32.totalorder (!%p519_p3), %s8140_s25, 1  ;;  %v1016_v7 = vlaneseq (!%p519_p3)  ;;  %v8150_v8 = vmov (!%p519_p3), 1966171168   ;;  %vm2806_vm0 = vcmask (!%p519_p3), 261120   ;;  %vm3339_vm1 = vcmask (!%p519_p3), 1041408  }
   0x7   : > { %522 = sbr.rel (%p519_p3) target bundleno = 2081 (0x821), region = 72  ;;  %v1031_v9 = vunpack.c.l.s4 (!%p519_p3), %v8150_v8  ;;  %vm3335_vm2 = vcmask (!%p519_p3), 31744   ;;  %vm3688_vm3 = vcmask (!%p519_p3), 1043456   ;;  %vm3684_vm4 = vcmask (!%p519_p3), 588800  }
   0x8   : > { %v8259_v12 = vshrl.u32 (!%p519_p3), %v1016_v7, 7  ;;  %vm6084_vm5 = vcmask (!%p519_p3), 58368  }
   0x9   : > { %v1032_v13 = vunpack.c.0.s8 (!%p519_p3), %v1031_v9 }
   0xb   : > { %v8269_v16 = vsub.s32 (!%p519_p3), %v1032_v13, %v8259_v12 }
   0xe   : > { %s9202_s25 = smov (!%p619_p4, %s8140_s25), 1 }
   0xf   : > { %s7115_s29 = smul.u32 2592, %s9202_s25  ;;  %s7002_s20 = sshll.u32 %s9202_s25, 3 }
  0x10   : > { %s7114_s16 = smul.u32 21, %s9202_s25  ;;  %s648_s23 = scalar_lea.vmem %s9188_s5, %s7002_s20 }
  0x11   : > { %s8247_s15 = scalar_lea.vmem %s9185_s2, %s7115_s29  ;;  %s7116_s24 = smul.u32 400, %s9202_s25 }
  0x12   : > { %v7144_v0 = vld [vmem:[%s8247_s15 + $0x4] ss:$8 sps:$4 sm:$0xff]   ;;  %v7146_v1 = vld [vmem:[%s8247_s15] ss:$8 sps:$4 sm:$0xff]   ;;  %v7147_v2 = vld [vmem:[%s8247_s15 + $0x14] ss:$8 sps:$4 sm:$0xff]   ;;  %s8266_s19 = scalar_lea.vmem %s9183_s0, %s7114_s16 }
  0x13   : > { %2810 = vmatprep.subr.bf16.mxu0 %v7144_v0  ;;  %v7149_v3 = vld [vmem:[%s8247_s15 + $0x10] ss:$8 sps:$4 sm:$0xff]   ;;  %v7150_v4 = vld [vmem:[%s8247_s15 + $0x24] ss:$8 sps:$4 sm:$0xff]   ;;  %v7152_v5 = vld [vmem:[%s8247_s15 + $0x20] ss:$8 sps:$4 sm:$0xff]   ;;  %s8619_s14 = scalar_lea.vmem %s9187_s4, %s7116_s24 }
  0x14   : > { %2811 = vmatpush1.bf16.msra.mxu0 %v7146_v1  ;;  %v7153_v6 = vld [vmem:[%s8247_s15 + $0x34] ss:$8 sps:$4 sm:$0xff]   ;;  %v7155_v10 = vld [vmem:[%s8247_s15 + $0x30] ss:$8 sps:$4 sm:$0xff]   ;;  %v7156_v11 = vld [vmem:[%s8247_s15 + $0x44] ss:$8 sps:$4 sm:$0xff]  }
  0x15   : > { %2812 = vmatprep.subr.bf16.mxu0 %v7147_v2  ;;  %v7158_v14 = vld [vmem:[%s8247_s15 + $0x40] ss:$8 sps:$4 sm:$0xff]   ;;  %v7159_v15 = vld [vmem:[%s8247_s15 + $0x54] ss:$8 sps:$4 sm:$0xff]   ;;  %v7161_v17 = vld [vmem:[%s8247_s15 + $0x50] ss:$8 sps:$4 sm:$0xff]  }
  0x16   : > { %v7162_v18 = vld [vmem:[%s8247_s15 + $0x64] ss:$8 sps:$4 sm:$0xff]   ;;  %v7164_v21 = vld [vmem:[%s8247_s15 + $0x60] ss:$8 sps:$4 sm:$0xff]   ;;  %v7165_v22 = vld [vmem:[%s8247_s15 + $0x74] ss:$8 sps:$4 sm:$0xff]  }
  0x17   : > { %v8274_v19 = vld [vmem:[%s8266_s19] sm:$0xff]  ;;  %v7167_v25 = vld [vmem:[%s8247_s15 + $0x70] ss:$8 sps:$4 sm:$0xff]   ;;  %v7171_v28 = vld [vmem:[%s8247_s15 + $0x94] ss:$8 sps:$4 sm:$0xff]   ;;  %s6312_s21 = sshll.u32 %s9202_s25, 1 }
  0x18   : > { %2813 = vmatpush1.bf16.msra.mxu0 %v7149_v3  ;;  %v1036_v20 = vrot.slane %v8274_v19, %v8269_v16  ;;  %v7168_v26 = vld [vmem:[%s8247_s15 + $0x84] ss:$8 sps:$4 sm:$0xff]   ;;  %v7170_v27 = vld [vmem:[%s8247_s15 + $0x80] ss:$8 sps:$4 sm:$0xff]   ;;  %v7173_v29 = vld [vmem:[%s8247_s15 + $0x90] ss:$8 sps:$4 sm:$0xff]   ;;  %v1029_v7 = vcombine.high %v8274_v19, %v8274_v19  ;;  %s638_s24 = scalar_lea.vmem %s9186_s3, %s6312_s21 }
  0x19   : > { %2814 = vmatprep.subr.bf16.mxu0 %v7150_v4  ;;  %v7174_v30 = vld [vmem:[%s8247_s15 + $0xa4] ss:$8 sps:$4 sm:$0xff]   ;;  %v7176_v31 = vld [vmem:[%s8247_s15 + $0xa0] ss:$8 sps:$4 sm:$0xff]   ;;  %v7177_v32 = vld [vmem:[%s8247_s15 + $0xb4] ss:$8 sps:$4 sm:$0xff]  }
  0x1a   : > { %v1044_v23 = vcombine.high %v1036_v20, %v1036_v20  ;;  %v7179_v33 = vld [vmem:[%s8247_s15 + $0xb0] ss:$8 sps:$4 sm:$0xff]   ;;  %v7180_v34 = vld [vmem:[%s8247_s15 + $0xc4] ss:$8 sps:$4 sm:$0xff]   ;;  %v7182_v35 = vld [vmem:[%s8247_s15 + $0xc0] ss:$8 sps:$4 sm:$0xff]   ;;  %v8300_v43 = vrot.slane %v1036_v20, %v8269_v16  ;;  %v8336_v13 = vrot.slane %v1029_v7, %v8269_v16 }
  0x1b   : > { %v7183_v36 = vld [vmem:[%s8247_s15 + $0xd4] ss:$8 sps:$4 sm:$0xff]   ;;  %v7185_v37 = vld [vmem:[%s8247_s15 + $0xd0] ss:$8 sps:$4 sm:$0xff]   ;;  %v7186_v38 = vld [vmem:[%s8247_s15 + $0xe4] ss:$8 sps:$4 sm:$0xff]  }
  0x1c   : > { %2815 = vmatpush1.bf16.msra.mxu0 %v7152_v5  ;;  %v1066_v24 = vrot.slane %v1044_v23, %v8269_v16  ;;  %v7188_v39 = vld [vmem:[%s8247_s15 + $0xe0] ss:$8 sps:$4 sm:$0xff]   ;;  %v7189_v40 = vld [vmem:[%s8247_s15 + $0xf4] ss:$8 sps:$4 sm:$0xff]   ;;  %v7191_v41 = vld [vmem:[%s8247_s15 + $0xf0] ss:$8 sps:$4 sm:$0xff]  }
  0x1d   : > { %2816 = vmatprep.subr.bf16.mxu0 %v7153_v6  ;;  %v7195_v42 = vld [vmem:[%s8247_s15 + $0x104] ss:$8 sps:$4 sm:$0xff]   ;;  %v7193_v45 = vld [vmem:[%s8247_s15 + $0x100] ss:$8 sps:$4 sm:$0xff]   ;;  %v7198_v46 = vld [vmem:[%s8247_s15 + $0x114] ss:$8 sps:$4 sm:$0xff]  }
  0x1e   : > { %2842 = vmatprep.mubr.bf16.mxu0 %v1066_v24  ;;  %v1076_v44 = vcombine.high %v1066_v24, %v1066_v24  ;;  %v7196_v47 = vld [vmem:[%s8247_s15 + $0x110] ss:$8 sps:$4 sm:$0xff]   ;;  %v7201_v48 = vld [vmem:[%s8247_s15 + $0x124] ss:$8 sps:$4 sm:$0xff]   ;;  %v7199_v49 = vld [vmem:[%s8247_s15 + $0x120] ss:$8 sps:$4 sm:$0xff]  }
  0x1f   : > { %v7204_v50 = vld [vmem:[%s8247_s15 + $0x134] ss:$8 sps:$4 sm:$0xff]   ;;  %v7202_v51 = vld [vmem:[%s8247_s15 + $0x130] ss:$8 sps:$4 sm:$0xff]   ;;  %v7207_v52 = vld [vmem:[%s8247_s15 + $0x144] ss:$8 sps:$4 sm:$0xff]  }
  0x20   : > { %2817 = vmatpush1.bf16.msra.mxu0 %v7155_v10  ;;  %v7205_v53 = vld [vmem:[%s8247_s15 + $0x140] ss:$8 sps:$4 sm:$0xff]   ;;  %v7210_v54 = vld [vmem:[%s8247_s15 + $0x154] ss:$8 sps:$4 sm:$0xff]   ;;  %v7208_v55 = vld [vmem:[%s8247_s15 + $0x150] ss:$8 sps:$4 sm:$0xff]  }
  0x21   : > { %2818 = vmatprep.subr.bf16.mxu0 %v7156_v11  ;;  %v7213_v56 = vld [vmem:[%s8247_s15 + $0x164] ss:$8 sps:$4 sm:$0xff]   ;;  %v7211_v57 = vld [vmem:[%s8247_s15 + $0x160] ss:$8 sps:$4 sm:$0xff]   ;;  %v7216_v58 = vld [vmem:[%s8247_s15 + $0x174] ss:$8 sps:$4 sm:$0xff]  }
  0x22   : > { %v7214_v59 = vld [vmem:[%s8247_s15 + $0x170] ss:$8 sps:$4 sm:$0xff]   ;;  %v7219_v60 = vld [vmem:[%s8247_s15 + $0x184] ss:$8 sps:$4 sm:$0xff]   ;;  %v7217_v61 = vld [vmem:[%s8247_s15 + $0x180] ss:$8 sps:$4 sm:$0xff]  }
  0x23   : > { %v7222_v62 = vld [vmem:[%s8247_s15 + $0x194] ss:$8 sps:$4 sm:$0xff]   ;;  %v7220_v63 = vld [vmem:[%s8247_s15 + $0x190] ss:$8 sps:$4 sm:$0xff]   ;;  %v7225_v0 = vld [vmem:[%s8247_s15 + $0x1a4] ss:$8 sps:$4 sm:$0xff]  }
  0x24   : > { %2819 = vmatpush1.bf16.msra.mxu0 %v7158_v14  ;;  %v7223_v1 = vld [vmem:[%s8247_s15 + $0x1a0] ss:$8 sps:$4 sm:$0xff]   ;;  %v7228_v2 = vld [vmem:[%s8247_s15 + $0x1b4] ss:$8 sps:$4 sm:$0xff]   ;;  %v7226_v3 = vld [vmem:[%s8247_s15 + $0x1b0] ss:$8 sps:$4 sm:$0xff]  }
  0x25   : > { %2820 = vmatprep.subr.bf16.mxu0 %v7159_v15  ;;  %v7231_v4 = vld [vmem:[%s8247_s15 + $0x1c4] ss:$8 sps:$4 sm:$0xff]   ;;  %v7229_v5 = vld [vmem:[%s8247_s15 + $0x1c0] ss:$8 sps:$4 sm:$0xff]   ;;  %v7234_v6 = vld [vmem:[%s8247_s15 + $0x1d4] ss:$8 sps:$4 sm:$0xff]  }
  0x26   : > { %v7232_v8 = vld [vmem:[%s8247_s15 + $0x1d0] ss:$8 sps:$4 sm:$0xff]   ;;  %v7237_v9 = vld [vmem:[%s8247_s15 + $0x1e4] ss:$8 sps:$4 sm:$0xff]   ;;  %v7235_v10 = vld [vmem:[%s8247_s15 + $0x1e0] ss:$8 sps:$4 sm:$0xff]  }
  0x27   : > { %v7240_v11 = vld [vmem:[%s8247_s15 + $0x1f4] ss:$8 sps:$4 sm:$0xff]   ;;  %v7238_v14 = vld [vmem:[%s8247_s15 + $0x1f0] ss:$8 sps:$4 sm:$0xff]   ;;  %v7243_v15 = vld [vmem:[%s8247_s15 + $0x204] ss:$8 sps:$4 sm:$0xff]  }
  0x28   : > { %2821 = vmatpush1.bf16.msra.mxu0 %v7161_v17  ;;  %v1045_v17 = vcombine.high %v8336_v13, %v8336_v13  ;;  %v7241_v19 = vld [vmem:[%s8247_s15 + $0x200] ss:$8 sps:$4 sm:$0xff]   ;;  %v7246_v20 = vld [vmem:[%s8247_s15 + $0x214] ss:$8 sps:$4 sm:$0xff]   ;;  %v7249_v23 = vld [vmem:[%s8247_s15 + $0x224] ss:$8 sps:$4 sm:$0xff]  }
  0x29   : > { %2822 = vmatprep.subr.bf16.mxu0 %v7162_v18  ;;  %v1074_v18 = vcombine.high %v8300_v43, %v8300_v43  ;;  %v7247_v24 = vld [vmem:[%s8247_s15 + $0x220] ss:$8 sps:$4 sm:$0xff]   ;;  %v7318_v7 = vld [vmem:[%s8247_s15 + $0x394] ss:$8 sps:$4 sm:$0xff]   ;;  %s8817_s29 = sshll.u32 %s9202_s25, 2 }
  0x2a   : > { %s652_s16 = scalar_lea.vmem %s9189_s6, %s8817_s29  ;;  %s661_s22 = scalar_lea.vmem %s9191_s8, %s8817_s29 }
  0x2b   : > { %s670_s18 = scalar_lea.vmem %s9193_s10, %s8817_s29 }
  0x2c   : > { %2823 = vmatpush1.bf16.msra.mxu0 %v7164_v21  ;;  %v8347_v21 = vrot.slane %v1045_v17, %v8269_v16  ;;  %v7330_v17 = vld [vmem:[%s8247_s15 + $0x3d4] ss:$8 sps:$4 sm:$0xff]  }
  0x2d   : > { %2824 = vmatprep.subr.bf16.mxu0 %v7165_v22  ;;  %v7244_v22 = vld [vmem:[%s8247_s15 + $0x210] ss:$8 sps:$4 sm:$0xff]  }
  0x30   : > { %2825 = vmatpush1.bf16.msra.mxu0 %v7167_v25  ;;  %v7252_v25 = vld [vmem:[%s8247_s15 + $0x234] ss:$8 sps:$4 sm:$0xff]  }
  0x31   : > { %2826 = vmatprep.subr.bf16.mxu0 %v7168_v26  ;;  %v7250_v26 = vld [vmem:[%s8247_s15 + $0x230] ss:$8 sps:$4 sm:$0xff]  }
  0x34   : > { %2827 = vmatpush1.bf16.msra.mxu0 %v7170_v27  ;;  %v7255_v27 = vld [vmem:[%s8247_s15 + $0x244] ss:$8 sps:$4 sm:$0xff]  }
  0x35   : > { %2828 = vmatprep.subr.bf16.mxu0 %v7171_v28  ;;  %v7253_v28 = vld [vmem:[%s8247_s15 + $0x240] ss:$8 sps:$4 sm:$0xff]  }
  0x38   : > { %2829 = vmatpush1.bf16.msra.mxu0 %v7173_v29  ;;  %v7258_v29 = vld [vmem:[%s8247_s15 + $0x254] ss:$8 sps:$4 sm:$0xff]  }
  0x39   : > { %2830 = vmatprep.subr.bf16.mxu0 %v7174_v30  ;;  %v7256_v30 = vld [vmem:[%s8247_s15 + $0x250] ss:$8 sps:$4 sm:$0xff]  }
  0x3c   : > { %2831 = vmatpush1.bf16.msra.mxu0 %v7176_v31  ;;  %v7261_v31 = vld [vmem:[%s8247_s15 + $0x264] ss:$8 sps:$4 sm:$0xff]  }
  0x3d   : > { %2832 = vmatprep.subr.bf16.mxu0 %v7177_v32  ;;  %v7259_v32 = vld [vmem:[%s8247_s15 + $0x260] ss:$8 sps:$4 sm:$0xff]  }
  0x40   : > { %2833 = vmatpush1.bf16.msra.mxu0 %v7179_v33  ;;  %v7264_v33 = vld [vmem:[%s8247_s15 + $0x274] ss:$8 sps:$4 sm:$0xff]  }
  0x41   : > { %2834 = vmatprep.subr.bf16.mxu0 %v7180_v34  ;;  %v7262_v34 = vld [vmem:[%s8247_s15 + $0x270] ss:$8 sps:$4 sm:$0xff]  }
  0x44   : > { %2835 = vmatpush1.bf16.msra.mxu0 %v7182_v35  ;;  %v7267_v35 = vld [vmem:[%s8247_s15 + $0x284] ss:$8 sps:$4 sm:$0xff]  }
  0x45   : > { %2836 = vmatprep.subr.bf16.mxu0 %v7183_v36  ;;  %v7265_v36 = vld [vmem:[%s8247_s15 + $0x280] ss:$8 sps:$4 sm:$0xff]  }
  0x48   : > { %2837 = vmatpush1.bf16.msra.mxu0 %v7185_v37  ;;  %v7270_v37 = vld [vmem:[%s8247_s15 + $0x294] ss:$8 sps:$4 sm:$0xff]  }
  0x49   : > { %2838 = vmatprep.subr.bf16.mxu0 %v7186_v38  ;;  %v7268_v38 = vld [vmem:[%s8247_s15 + $0x290] ss:$8 sps:$4 sm:$0xff]  }
  0x4c   : > { %2839 = vmatpush1.bf16.msra.mxu0 %v7188_v39  ;;  %v7273_v39 = vld [vmem:[%s8247_s15 + $0x2a4] ss:$8 sps:$4 sm:$0xff]  }
  0x4d   : > { %2840 = vmatprep.subr.bf16.mxu0 %v7189_v40  ;;  %v7271_v40 = vld [vmem:[%s8247_s15 + $0x2a0] ss:$8 sps:$4 sm:$0xff]  }
  0x50   : > { %2841 = vmatpush1.bf16.msra.mxu0 %v7191_v41  ;;  %v7276_v41 = vld [vmem:[%s8247_s15 + $0x2b4] ss:$8 sps:$4 sm:$0xff]  }
  0x51   : > { %2851 = vmatprep.subr.bf16.mxu0 %v7195_v42  ;;  %v7274_v42 = vld [vmem:[%s8247_s15 + $0x2b0] ss:$8 sps:$4 sm:$0xff]  }
  0x53   : > { %2843 = vmatmul.mubr.bf16.vlgmr.msra.gmra.mrb[0].mxu0 %v8300_v43  ;;  %v7279_v43 = vld [vmem:[%s8247_s15 + $0x2c4] ss:$8 sps:$4 sm:$0xff]  }
  0x54   : > { %2852 = vmatpush1.bf16.msra.mxu0 %v7193_v45  ;;  %2883 = vmatprep.mubr.bf16.mxu0 %v1076_v44  ;;  %v7277_v44 = vld [vmem:[%s8247_s15 + $0x2c0] ss:$8 sps:$4 sm:$0xff]   ;;  %v7282_v45 = vld [vmem:[%s8247_s15 + $0x2d4] ss:$8 sps:$4 sm:$0xff]  }
  0x55   : > { %2853 = vmatprep.subr.bf16.mxu0 %v7198_v46  ;;  %v7280_v46 = vld [vmem:[%s8247_s15 + $0x2d0] ss:$8 sps:$4 sm:$0xff]  }
  0x58   : > { %2854 = vmatpush1.bf16.msra.mxu0 %v7196_v47  ;;  %v7285_v47 = vld [vmem:[%s8247_s15 + $0x2e4] ss:$8 sps:$4 sm:$0xff]  }
  0x59   : > { %2855 = vmatprep.subr.bf16.mxu0 %v7201_v48  ;;  %v7283_v48 = vld [vmem:[%s8247_s15 + $0x2e0] ss:$8 sps:$4 sm:$0xff]  }
  0x5c   : > { %2856 = vmatpush1.bf16.msra.mxu0 %v7199_v49  ;;  %v7288_v49 = vld [vmem:[%s8247_s15 + $0x2f4] ss:$8 sps:$4 sm:$0xff]  }
  0x5d   : > { %2857 = vmatprep.subr.bf16.mxu0 %v7204_v50  ;;  %v7286_v50 = vld [vmem:[%s8247_s15 + $0x2f0] ss:$8 sps:$4 sm:$0xff]  }
  0x60   : > { %2858 = vmatpush1.bf16.msra.mxu0 %v7202_v51  ;;  %v7291_v51 = vld [vmem:[%s8247_s15 + $0x304] ss:$8 sps:$4 sm:$0xff]  }
  0x61   : > { %2859 = vmatprep.subr.bf16.mxu0 %v7207_v52  ;;  %v8382_v52 = vrot.slane %v8336_v13, %v8269_v16  ;;  %v7322_v13 = vld [vmem:[%s8247_s15 + $0x3b0] ss:$8 sps:$4 sm:$0xff]  }
  0x64   : > { %2860 = vmatpush1.bf16.msra.mxu0 %v7205_v53  ;;  %v7289_v53 = vld [vmem:[%s8247_s15 + $0x300] ss:$8 sps:$4 sm:$0xff]  }
  0x65   : > { %2861 = vmatprep.subr.bf16.mxu0 %v7210_v54  ;;  %v1077_v54 = vcombine.high %v8347_v21, %v8347_v21 }
  0x68   : > { %2862 = vmatpush1.bf16.msra.mxu0 %v7208_v55  ;;  %v7294_v55 = vld [vmem:[%s8247_s15 + $0x314] ss:$8 sps:$4 sm:$0xff]  }
  0x69   : > { %2863 = vmatprep.subr.bf16.mxu0 %v7213_v56  ;;  %v7292_v56 = vld [vmem:[%s8247_s15 + $0x310] ss:$8 sps:$4 sm:$0xff]  }
  0x6c   : > { %2864 = vmatpush1.bf16.msra.mxu0 %v7211_v57  ;;  %v7297_v57 = vld [vmem:[%s8247_s15 + $0x324] ss:$8 sps:$4 sm:$0xff]  }
  0x6d   : > { %2865 = vmatprep.subr.bf16.mxu0 %v7216_v58  ;;  %v7295_v58 = vld [vmem:[%s8247_s15 + $0x320] ss:$8 sps:$4 sm:$0xff]  }
  0x70   : > { %2866 = vmatpush1.bf16.msra.mxu0 %v7214_v59  ;;  %v7300_v59 = vld [vmem:[%s8247_s15 + $0x334] ss:$8 sps:$4 sm:$0xff]  }
  0x71   : > { %2867 = vmatprep.subr.bf16.mxu0 %v7219_v60  ;;  %v7298_v60 = vld [vmem:[%s8247_s15 + $0x330] ss:$8 sps:$4 sm:$0xff]  }
  0x74   : > { %2868 = vmatpush1.bf16.msra.mxu0 %v7217_v61  ;;  %v7303_v61 = vld [vmem:[%s8247_s15 + $0x344] ss:$8 sps:$4 sm:$0xff]  }
  0x75   : > { %2869 = vmatprep.subr.bf16.mxu0 %v7222_v62  ;;  %v7301_v62 = vld [vmem:[%s8247_s15 + $0x340] ss:$8 sps:$4 sm:$0xff]  }
  0x78   : > { %2870 = vmatpush1.bf16.msra.mxu0 %v7220_v63  ;;  %v7306_v63 = vld [vmem:[%s8247_s15 + $0x354] ss:$8 sps:$4 sm:$0xff]  }
  0x79   : > { %2871 = vmatprep.subr.bf16.mxu0 %v7225_v0  ;;  %v7304_v0 = vld [vmem:[%s8247_s15 + $0x350] ss:$8 sps:$4 sm:$0xff]  }
  0x7c   : > { %2872 = vmatpush1.bf16.msra.mxu0 %v7223_v1  ;;  %v7309_v1 = vld [vmem:[%s8247_s15 + $0x364] ss:$8 sps:$4 sm:$0xff]  }
  0x7d   : > { %2873 = vmatprep.subr.bf16.mxu0 %v7228_v2  ;;  %v7307_v2 = vld [vmem:[%s8247_s15 + $0x360] ss:$8 sps:$4 sm:$0xff]  }
  0x80   : > { %2874 = vmatpush1.bf16.msra.mxu0 %v7226_v3  ;;  %v7312_v3 = vld [vmem:[%s8247_s15 + $0x374] ss:$8 sps:$4 sm:$0xff]  }
  0x81   : > { %2875 = vmatprep.subr.bf16.mxu0 %v7231_v4  ;;  %v7310_v4 = vld [vmem:[%s8247_s15 + $0x370] ss:$8 sps:$4 sm:$0xff]  }
  0x84   : > { %2876 = vmatpush1.bf16.msra.mxu0 %v7229_v5  ;;  %v7315_v5 = vld [vmem:[%s8247_s15 + $0x384] ss:$8 sps:$4 sm:$0xff]  }
  0x85   : > { %2877 = vmatprep.subr.bf16.mxu0 %v7234_v6  ;;  %v7313_v6 = vld [vmem:[%s8247_s15 + $0x380] ss:$8 sps:$4 sm:$0xff]  }
  0x88   : > { %2878 = vmatpush1.bf16.msra.mxu0 %v7232_v8  ;;  %v7316_v8 = vld [vmem:[%s8247_s15 + $0x390] ss:$8 sps:$4 sm:$0xff]  }
  0x89   : > { %2879 = vmatprep.subr.bf16.mxu0 %v7237_v9  ;;  %v7321_v9 = vld [vmem:[%s8247_s15 + $0x3a4] ss:$8 sps:$4 sm:$0xff]  }
  0x8c   : > { %2880 = vmatpush1.bf16.msra.mxu0 %v7235_v10  ;;  %v7319_v10 = vld [vmem:[%s8247_s15 + $0x3a0] ss:$8 sps:$4 sm:$0xff]  }
  0x8d   : > { %2881 = vmatprep.subr.bf16.mxu0 %v7240_v11  ;;  %v7324_v11 = vld [vmem:[%s8247_s15 + $0x3b4] ss:$8 sps:$4 sm:$0xff]  }
  0x90   : > { %2882 = vmatpush1.bf16.msra.mxu0 %v7238_v14  ;;  %v7327_v14 = vld [vmem:[%s8247_s15 + $0x3c4] ss:$8 sps:$4 sm:$0xff]  }
  0x91   : > { %2892 = vmatprep.subr.bf16.mxu0 %v7243_v15  ;;  %v7325_v15 = vld [vmem:[%s8247_s15 + $0x3c0] ss:$8 sps:$4 sm:$0xff]  }
  0x93   : > { %2884 = vmatmul.mubr.bf16.vlgmr.msra.gmra.mrb[0].mxu0 %v1074_v18  ;;  %v7328_v18 = vld [vmem:[%s8247_s15 + $0x3d0] ss:$8 sps:$4 sm:$0xff]  }
  0x94   : > { %2893 = vmatpush1.bf16.msra.mxu0 %v7241_v19  ;;  %2924 = vmatprep.mubr.bf16.mxu0 %v8347_v21  ;;  %v7333_v19 = vld [vmem:[%s8247_s15 + $0x3e4] ss:$8 sps:$4 sm:$0xff]   ;;  %v7331_v21 = vld [vmem:[%s8247_s15 + $0x3e0] ss:$8 sps:$4 sm:$0xff]  }
  0x95   : > { %2894 = vmatprep.subr.bf16.mxu0 %v7246_v20  ;;  %v8416_v20 = vld [vmem:[%s8266_s19 + $0x8] sm:$0xff] }
  0x98   : > { %2895 = vmatpush1.bf16.msra.mxu0 %v7244_v22  ;;  %v8421_v22 = vrot.slane %v8416_v20, %v8269_v16 }
  0x99   : > { %2896 = vmatprep.subr.bf16.mxu0 %v7249_v23  ;;  %v7336_v23 = vld [vmem:[%s8247_s15 + $0x3f4] ss:$8 sps:$4 sm:$0xff]  }
  0x9c   : > { %2897 = vmatpush1.bf16.msra.mxu0 %v7247_v24  ;;  %v7334_v24 = vld [vmem:[%s8247_s15 + $0x3f0] ss:$8 sps:$4 sm:$0xff]  }
  0x9d   : > { %2898 = vmatprep.subr.bf16.mxu0 %v7252_v25  ;;  %v1093_v25 = vcombine.high %v8421_v22, %v8421_v22 }
  0xa0   : > { %2899 = vmatpush1.bf16.msra.mxu0 %v7250_v26  ;;  %v7339_v26 = vld [vmem:[%s8247_s15 + $0x404] ss:$8 sps:$4 sm:$0xff]  }
  0xa1   : > { %2900 = vmatprep.subr.bf16.mxu0 %v7255_v27  ;;  %v1075_v27 = vcombine.high %v8382_v52, %v8382_v52 }
  0xa4   : > { %2901 = vmatpush1.bf16.msra.mxu0 %v7253_v28  ;;  %v7337_v28 = vld [vmem:[%s8247_s15 + $0x400] ss:$8 sps:$4 sm:$0xff]  }
  0xa5   : > { %2902 = vmatprep.subr.bf16.mxu0 %v7258_v29  ;;  %v8432_v29 = vrot.slane %v1093_v25, %v8269_v16  ;;  %v7423_v25 = vld [vmem:[%s8247_s15 + $0x5c4] ss:$8 sps:$4 sm:$0xff]  }
  0xa8   : > { %2903 = vmatpush1.bf16.msra.mxu0 %v7256_v30  ;;  %v7342_v30 = vld [vmem:[%s8247_s15 + $0x414] ss:$8 sps:$4 sm:$0xff]  }
  0xa9   : > { %2904 = vmatprep.subr.bf16.mxu0 %v7261_v31  ;;  %v7340_v31 = vld [vmem:[%s8247_s15 + $0x410] ss:$8 sps:$4 sm:$0xff]  }
  0xac   : > { %2905 = vmatpush1.bf16.msra.mxu0 %v7259_v32  ;;  %v7345_v32 = vld [vmem:[%s8247_s15 + $0x424] ss:$8 sps:$4 sm:$0xff]  }
  0xad   : > { %2906 = vmatprep.subr.bf16.mxu0 %v7264_v33  ;;  %v7343_v33 = vld [vmem:[%s8247_s15 + $0x420] ss:$8 sps:$4 sm:$0xff]  }
  0xb0   : > { %2907 = vmatpush1.bf16.msra.mxu0 %v7262_v34  ;;  %v7348_v34 = vld [vmem:[%s8247_s15 + $0x434] ss:$8 sps:$4 sm:$0xff]  }
  0xb1   : > { %2908 = vmatprep.subr.bf16.mxu0 %v7267_v35  ;;  %v7346_v35 = vld [vmem:[%s8247_s15 + $0x430] ss:$8 sps:$4 sm:$0xff]  }
  0xb4   : > { %2909 = vmatpush1.bf16.msra.mxu0 %v7265_v36  ;;  %v7351_v36 = vld [vmem:[%s8247_s15 + $0x444] ss:$8 sps:$4 sm:$0xff]  }
  0xb5   : > { %2910 = vmatprep.subr.bf16.mxu0 %v7270_v37  ;;  %v7349_v37 = vld [vmem:[%s8247_s15 + $0x440] ss:$8 sps:$4 sm:$0xff]  }
  0xb8   : > { %2911 = vmatpush1.bf16.msra.mxu0 %v7268_v38  ;;  %v7354_v38 = vld [vmem:[%s8247_s15 + $0x454] ss:$8 sps:$4 sm:$0xff]  }
  0xb9   : > { %2912 = vmatprep.subr.bf16.mxu0 %v7273_v39  ;;  %v7352_v39 = vld [vmem:[%s8247_s15 + $0x450] ss:$8 sps:$4 sm:$0xff]  }
  0xbc   : > { %2913 = vmatpush1.bf16.msra.mxu0 %v7271_v40  ;;  %v7357_v40 = vld [vmem:[%s8247_s15 + $0x464] ss:$8 sps:$4 sm:$0xff]  }
  0xbd   : > { %2914 = vmatprep.subr.bf16.mxu0 %v7276_v41  ;;  %v7355_v41 = vld [vmem:[%s8247_s15 + $0x460] ss:$8 sps:$4 sm:$0xff]  }
  0xc0   : > { %2915 = vmatpush1.bf16.msra.mxu0 %v7274_v42  ;;  %v7360_v42 = vld [vmem:[%s8247_s15 + $0x474] ss:$8 sps:$4 sm:$0xff]  }
  0xc1   : > { %2916 = vmatprep.subr.bf16.mxu0 %v7279_v43  ;;  %v7358_v43 = vld [vmem:[%s8247_s15 + $0x470] ss:$8 sps:$4 sm:$0xff]  }
  0xc4   : > { %2917 = vmatpush1.bf16.msra.mxu0 %v7277_v44  ;;  %v7363_v44 = vld [vmem:[%s8247_s15 + $0x484] ss:$8 sps:$4 sm:$0xff]  }
  0xc5   : > { %2918 = vmatprep.subr.bf16.mxu0 %v7282_v45  ;;  %v7361_v45 = vld [vmem:[%s8247_s15 + $0x480] ss:$8 sps:$4 sm:$0xff]  }
  0xc8   : > { %2919 = vmatpush1.bf16.msra.mxu0 %v7280_v46  ;;  %v7366_v46 = vld [vmem:[%s8247_s15 + $0x494] ss:$8 sps:$4 sm:$0xff]  }
  0xc9   : > { %2920 = vmatprep.subr.bf16.mxu0 %v7285_v47  ;;  %v7364_v47 = vld [vmem:[%s8247_s15 + $0x490] ss:$8 sps:$4 sm:$0xff]  }
  0xcc   : > { %2921 = vmatpush1.bf16.msra.mxu0 %v7283_v48  ;;  %v7369_v48 = vld [vmem:[%s8247_s15 + $0x4a4] ss:$8 sps:$4 sm:$0xff]  }
  0xcd   : > { %2922 = vmatprep.subr.bf16.mxu0 %v7288_v49  ;;  %v7367_v49 = vld [vmem:[%s8247_s15 + $0x4a0] ss:$8 sps:$4 sm:$0xff]  }
  0xd0   : > { %2923 = vmatpush1.bf16.msra.mxu0 %v7286_v50  ;;  %v7372_v50 = vld [vmem:[%s8247_s15 + $0x4b4] ss:$8 sps:$4 sm:$0xff]  }
  0xd1   : > { %2933 = vmatprep.subr.bf16.mxu0 %v7291_v51  ;;  %v7370_v51 = vld [vmem:[%s8247_s15 + $0x4b0] ss:$8 sps:$4 sm:$0xff]  }
  0xd3   : > { %2925 = vmatmul.mubr.bf16.vlgmr.msra.gmra.mrb[0].mxu0 %v8382_v52  ;;  %v7375_v52 = vld [vmem:[%s8247_s15 + $0x4c4] ss:$8 sps:$4 sm:$0xff]  }
  0xd4   : > { %2934 = vmatpush1.bf16.msra.mxu0 %v7289_v53  ;;  %2965 = vmatprep.mubr.bf16.mxu0 %v1077_v54  ;;  %v7373_v53 = vld [vmem:[%s8247_s15 + $0x4c0] ss:$8 sps:$4 sm:$0xff]   ;;  %v7378_v54 = vld [vmem:[%s8247_s15 + $0x4d4] ss:$8 sps:$4 sm:$0xff]  }
  0xd5   : > { %2935 = vmatprep.subr.bf16.mxu0 %v7294_v55  ;;  %v7376_v55 = vld [vmem:[%s8247_s15 + $0x4d0] ss:$8 sps:$4 sm:$0xff]  }
  0xd8   : > { %2936 = vmatpush1.bf16.msra.mxu0 %v7292_v56  ;;  %v7381_v56 = vld [vmem:[%s8247_s15 + $0x4e4] ss:$8 sps:$4 sm:$0xff]  }
  0xd9   : > { %2937 = vmatprep.subr.bf16.mxu0 %v7297_v57  ;;  %v7379_v57 = vld [vmem:[%s8247_s15 + $0x4e0] ss:$8 sps:$4 sm:$0xff]  }
  0xdc   : > { %2938 = vmatpush1.bf16.msra.mxu0 %v7295_v58  ;;  %v7384_v58 = vld [vmem:[%s8247_s15 + $0x4f4] ss:$8 sps:$4 sm:$0xff]  }
  0xdd   : > { %2939 = vmatprep.subr.bf16.mxu0 %v7300_v59  ;;  %v7382_v59 = vld [vmem:[%s8247_s15 + $0x4f0] ss:$8 sps:$4 sm:$0xff]  }
  0xe0   : > { %2940 = vmatpush1.bf16.msra.mxu0 %v7298_v60  ;;  %v7387_v60 = vld [vmem:[%s8247_s15 + $0x504] ss:$8 sps:$4 sm:$0xff]  }
  0xe1   : > { %2941 = vmatprep.subr.bf16.mxu0 %v7303_v61  ;;  %v8468_v61 = vrot.slane %v8421_v22, %v8269_v16  ;;  %v7415_v22 = vld [vmem:[%s8247_s15 + $0x5a0] ss:$8 sps:$4 sm:$0xff]  }
  0xe4   : > { %2942 = vmatpush1.bf16.msra.mxu0 %v7301_v62  ;;  %v7385_v62 = vld [vmem:[%s8247_s15 + $0x500] ss:$8 sps:$4 sm:$0xff]  }
  0xe5   : > { %2943 = vmatprep.subr.bf16.mxu0 %v7306_v63  ;;  %v1125_v63 = vcombine.high %v8432_v29, %v8432_v29 }
  0xe8   : > { %2944 = vmatpush1.bf16.msra.mxu0 %v7304_v0  ;;  %v7390_v0 = vld [vmem:[%s8247_s15 + $0x514] ss:$8 sps:$4 sm:$0xff]  }
  0xe9   : > { %2945 = vmatprep.subr.bf16.mxu0 %v7309_v1  ;;  %v7388_v1 = vld [vmem:[%s8247_s15 + $0x510] ss:$8 sps:$4 sm:$0xff]  }
  0xec   : > { %2946 = vmatpush1.bf16.msra.mxu0 %v7307_v2  ;;  %v7393_v2 = vld [vmem:[%s8247_s15 + $0x524] ss:$8 sps:$4 sm:$0xff]  }
  0xed   : > { %2947 = vmatprep.subr.bf16.mxu0 %v7312_v3  ;;  %v7391_v3 = vld [vmem:[%s8247_s15 + $0x520] ss:$8 sps:$4 sm:$0xff]  }
  0xf0   : > { %2948 = vmatpush1.bf16.msra.mxu0 %v7310_v4  ;;  %v7396_v4 = vld [vmem:[%s8247_s15 + $0x534] ss:$8 sps:$4 sm:$0xff]  }
  0xf1   : > { %2949 = vmatprep.subr.bf16.mxu0 %v7315_v5  ;;  %v7394_v5 = vld [vmem:[%s8247_s15 + $0x530] ss:$8 sps:$4 sm:$0xff]  }
  0xf4   : > { %2950 = vmatpush1.bf16.msra.mxu0 %v7313_v6  ;;  %v7399_v6 = vld [vmem:[%s8247_s15 + $0x544] ss:$8 sps:$4 sm:$0xff]  }
  0xf5   : > { %2951 = vmatprep.subr.bf16.mxu0 %v7318_v7  ;;  %v7397_v7 = vld [vmem:[%s8247_s15 + $0x540] ss:$8 sps:$4 sm:$0xff]  }
  0xf8   : > { %2952 = vmatpush1.bf16.msra.mxu0 %v7316_v8  ;;  %v7402_v8 = vld [vmem:[%s8247_s15 + $0x554] ss:$8 sps:$4 sm:$0xff]  }
  0xf9   : > { %2953 = vmatprep.subr.bf16.mxu0 %v7321_v9  ;;  %v7400_v9 = vld [vmem:[%s8247_s15 + $0x550] ss:$8 sps:$4 sm:$0xff]  }
  0xfc   : > { %2954 = vmatpush1.bf16.msra.mxu0 %v7319_v10  ;;  %v7405_v10 = vld [vmem:[%s8247_s15 + $0x564] ss:$8 sps:$4 sm:$0xff]  }
  0xfd   : > { %2955 = vmatprep.subr.bf16.mxu0 %v7324_v11  ;;  %v7403_v11 = vld [vmem:[%s8247_s15 + $0x560] ss:$8 sps:$4 sm:$0xff]  }
 0x100   : > { %2956 = vmatpush1.bf16.msra.mxu0 %v7322_v13  ;;  %v7408_v13 = vld [vmem:[%s8247_s15 + $0x574] ss:$8 sps:$4 sm:$0xff]  }
 0x101   : > { %2957 = vmatprep.subr.bf16.mxu0 %v7327_v14  ;;  %v7406_v14 = vld [vmem:[%s8247_s15 + $0x570] ss:$8 sps:$4 sm:$0xff]  }
 0x104   : > { %2958 = vmatpush1.bf16.msra.mxu0 %v7325_v15  ;;  %v7411_v15 = vld [vmem:[%s8247_s15 + $0x584] ss:$8 sps:$4 sm:$0xff]  }
 0x105   : > { %2959 = vmatprep.subr.bf16.mxu0 %v7330_v17  ;;  %v7409_v17 = vld [vmem:[%s8247_s15 + $0x580] ss:$8 sps:$4 sm:$0xff]  }
 0x108   : > { %2960 = vmatpush1.bf16.msra.mxu0 %v7328_v18  ;;  %v7414_v18 = vld [vmem:[%s8247_s15 + $0x594] ss:$8 sps:$4 sm:$0xff]  }
 0x109   : > { %2961 = vmatprep.subr.bf16.mxu0 %v7333_v19  ;;  %v7412_v19 = vld [vmem:[%s8247_s15 + $0x590] ss:$8 sps:$4 sm:$0xff]  }
 0x10c   : > { %2962 = vmatpush1.bf16.msra.mxu0 %v7331_v21  ;;  %v7417_v21 = vld [vmem:[%s8247_s15 + $0x5a4] ss:$8 sps:$4 sm:$0xff]  }
 0x10d   : > { %2963 = vmatprep.subr.bf16.mxu0 %v7336_v23  ;;  %v7420_v23 = vld [vmem:[%s8247_s15 + $0x5b4] ss:$8 sps:$4 sm:$0xff]  }
 0x110   : > { %2964 = vmatpush1.bf16.msra.mxu0 %v7334_v24  ;;  %v7418_v24 = vld [vmem:[%s8247_s15 + $0x5b0] ss:$8 sps:$4 sm:$0xff]  }
 0x111   : > { %2974 = vmatprep.subr.bf16.mxu0 %v7339_v26  ;;  %v7421_v26 = vld [vmem:[%s8247_s15 + $0x5c0] ss:$8 sps:$4 sm:$0xff]  }
 0x113   : > { %2966 = vmatmul.mubr.bf16.vlgmr.msra.gmra.mrb[0].mxu0 %v1075_v27  ;;  %v7426_v27 = vld [vmem:[%s8247_s15 + $0x5d4] ss:$8 sps:$4 sm:$0xff]  }
 0x114   : > { %2975 = vmatpush1.bf16.msra.mxu0 %v7337_v28  ;;  %3006 = vmatprep.mubr.bf16.mxu0 %v8432_v29  ;;  %v7424_v28 = vld [vmem:[%s8247_s15 + $0x5d0] ss:$8 sps:$4 sm:$0xff]   ;;  %v1078_v29 = vcombine.high %v8416_v20, %v8416_v20  ;;  %v7435_v20 = vld [vmem:[%s8247_s15 + $0x604] ss:$8 sps:$4 sm:$0xff]  }
 0x115   : > { %2976 = vmatprep.subr.bf16.mxu0 %v7342_v30  ;;  %v7429_v30 = vld [vmem:[%s8247_s15 + $0x5e4] ss:$8 sps:$4 sm:$0xff]  }
 0x118   : > { %2977 = vmatpush1.bf16.msra.mxu0 %v7340_v31  ;;  %v7427_v31 = vld [vmem:[%s8247_s15 + $0x5e0] ss:$8 sps:$4 sm:$0xff]  }
 0x119   : > { %2978 = vmatprep.subr.bf16.mxu0 %v7345_v32  ;;  %v8505_v32 = vrot.slane %v1078_v29, %v8269_v16  ;;  %v7509_v29 = vld [vmem:[%s8247_s15 + $0x790] ss:$8 sps:$4 sm:$0xff]  }
 0x11c   : > { %2979 = vmatpush1.bf16.msra.mxu0 %v7343_v33  ;;  %v7432_v33 = vld [vmem:[%s8247_s15 + $0x5f4] ss:$8 sps:$4 sm:$0xff]  }
 0x11d   : > { %2980 = vmatprep.subr.bf16.mxu0 %v7348_v34  ;;  %v7430_v34 = vld [vmem:[%s8247_s15 + $0x5f0] ss:$8 sps:$4 sm:$0xff]  }
 0x120   : > { %2981 = vmatpush1.bf16.msra.mxu0 %v7346_v35  ;;  %v1094_v35 = vcombine.high %v8505_v32, %v8505_v32 }
 0x121   : > { %2982 = vmatprep.subr.bf16.mxu0 %v7351_v36  ;;  %v1123_v36 = vcombine.high %v8468_v61, %v8468_v61 }
 0x124   : > { %2983 = vmatpush1.bf16.msra.mxu0 %v7349_v37  ;;  %v7433_v37 = vld [vmem:[%s8247_s15 + $0x600] ss:$8 sps:$4 sm:$0xff]  }
 0x125   : > { %2984 = vmatprep.subr.bf16.mxu0 %v7354_v38  ;;  %v8516_v38 = vrot.slane %v1094_v35, %v8269_v16  ;;  %v7518_v35 = vld [vmem:[%s8247_s15 + $0x7c0] ss:$8 sps:$4 sm:$0xff]  }
 0x128   : > { %2985 = vmatpush1.bf16.msra.mxu0 %v7352_v39  ;;  %v7438_v39 = vld [vmem:[%s8247_s15 + $0x614] ss:$8 sps:$4 sm:$0xff]  }
 0x129   : > { %2986 = vmatprep.subr.bf16.mxu0 %v7357_v40  ;;  %v7436_v40 = vld [vmem:[%s8247_s15 + $0x610] ss:$8 sps:$4 sm:$0xff]  }
 0x12c   : > { %2987 = vmatpush1.bf16.msra.mxu0 %v7355_v41  ;;  %v7441_v41 = vld [vmem:[%s8247_s15 + $0x624] ss:$8 sps:$4 sm:$0xff]  }
 0x12d   : > { %2988 = vmatprep.subr.bf16.mxu0 %v7360_v42  ;;  %v7439_v42 = vld [vmem:[%s8247_s15 + $0x620] ss:$8 sps:$4 sm:$0xff]  }
 0x130   : > { %2989 = vmatpush1.bf16.msra.mxu0 %v7358_v43  ;;  %v7444_v43 = vld [vmem:[%s8247_s15 + $0x634] ss:$8 sps:$4 sm:$0xff]  }
 0x131   : > { %2990 = vmatprep.subr.bf16.mxu0 %v7363_v44  ;;  %v7442_v44 = vld [vmem:[%s8247_s15 + $0x630] ss:$8 sps:$4 sm:$0xff]  }
 0x134   : > { %2991 = vmatpush1.bf16.msra.mxu0 %v7361_v45  ;;  %v7447_v45 = vld [vmem:[%s8247_s15 + $0x644] ss:$8 sps:$4 sm:$0xff]  }
 0x135   : > { %2992 = vmatprep.subr.bf16.mxu0 %v7366_v46  ;;  %v7445_v46 = vld [vmem:[%s8247_s15 + $0x640] ss:$8 sps:$4 sm:$0xff]  }
 0x138   : > { %2993 = vmatpush1.bf16.msra.mxu0 %v7364_v47  ;;  %v7450_v47 = vld [vmem:[%s8247_s15 + $0x654] ss:$8 sps:$4 sm:$0xff]  }
 0x139   : > { %2994 = vmatprep.subr.bf16.mxu0 %v7369_v48  ;;  %v7448_v48 = vld [vmem:[%s8247_s15 + $0x650] ss:$8 sps:$4 sm:$0xff]  }
 0x13c   : > { %2995 = vmatpush1.bf16.msra.mxu0 %v7367_v49  ;;  %v7453_v49 = vld [vmem:[%s8247_s15 + $0x664] ss:$8 sps:$4 sm:$0xff]  }
 0x13d   : > { %2996 = vmatprep.subr.bf16.mxu0 %v7372_v50  ;;  %v7451_v50 = vld [vmem:[%s8247_s15 + $0x660] ss:$8 sps:$4 sm:$0xff]  }
 0x140   : > { %2997 = vmatpush1.bf16.msra.mxu0 %v7370_v51  ;;  %v7456_v51 = vld [vmem:[%s8247_s15 + $0x674] ss:$8 sps:$4 sm:$0xff]  }
 0x141   : > { %2998 = vmatprep.subr.bf16.mxu0 %v7375_v52  ;;  %v7454_v52 = vld [vmem:[%s8247_s15 + $0x670] ss:$8 sps:$4 sm:$0xff]  }
 0x144   : > { %2999 = vmatpush1.bf16.msra.mxu0 %v7373_v53  ;;  %v7459_v53 = vld [vmem:[%s8247_s15 + $0x684] ss:$8 sps:$4 sm:$0xff]  }
 0x145   : > { %3000 = vmatprep.subr.bf16.mxu0 %v7378_v54  ;;  %v7457_v54 = vld [vmem:[%s8247_s15 + $0x680] ss:$8 sps:$4 sm:$0xff]  }
 0x148   : > { %3001 = vmatpush1.bf16.msra.mxu0 %v7376_v55  ;;  %v7462_v55 = vld [vmem:[%s8247_s15 + $0x694] ss:$8 sps:$4 sm:$0xff]  }
 0x149   : > { %3002 = vmatprep.subr.bf16.mxu0 %v7381_v56  ;;  %v7460_v56 = vld [vmem:[%s8247_s15 + $0x690] ss:$8 sps:$4 sm:$0xff]  }
 0x14c   : > { %3003 = vmatpush1.bf16.msra.mxu0 %v7379_v57  ;;  %v7465_v57 = vld [vmem:[%s8247_s15 + $0x6a4] ss:$8 sps:$4 sm:$0xff]  }
 0x14d   : > { %3004 = vmatprep.subr.bf16.mxu0 %v7384_v58  ;;  %v7463_v58 = vld [vmem:[%s8247_s15 + $0x6a0] ss:$8 sps:$4 sm:$0xff]  }
 0x150   : > { %3005 = vmatpush1.bf16.msra.mxu0 %v7382_v59  ;;  %v7468_v59 = vld [vmem:[%s8247_s15 + $0x6b4] ss:$8 sps:$4 sm:$0xff]  }
 0x151   : > { %3015 = vmatprep.subr.bf16.mxu0 %v7387_v60  ;;  %v7466_v60 = vld [vmem:[%s8247_s15 + $0x6b0] ss:$8 sps:$4 sm:$0xff]  }
 0x153   : > { %3007 = vmatmul.mubr.bf16.vlgmr.msra.gmra.mrb[0].mxu0 %v8468_v61  ;;  %v7471_v61 = vld [vmem:[%s8247_s15 + $0x6c4] ss:$8 sps:$4 sm:$0xff]  }
 0x154   : > { %3016 = vmatpush1.bf16.msra.mxu0 %v7385_v62  ;;  %3047 = vmatprep.mubr.bf16.mxu0 %v1125_v63  ;;  %v7469_v62 = vld [vmem:[%s8247_s15 + $0x6c0] ss:$8 sps:$4 sm:$0xff]   ;;  %v7474_v63 = vld [vmem:[%s8247_s15 + $0x6d4] ss:$8 sps:$4 sm:$0xff]  }
 0x155   : > { %3017 = vmatprep.subr.bf16.mxu0 %v7390_v0  ;;  %v7472_v0 = vld [vmem:[%s8247_s15 + $0x6d0] ss:$8 sps:$4 sm:$0xff]  }
 0x158   : > { %3018 = vmatpush1.bf16.msra.mxu0 %v7388_v1  ;;  %v7477_v1 = vld [vmem:[%s8247_s15 + $0x6e4] ss:$8 sps:$4 sm:$0xff]  }
 0x159   : > { %3019 = vmatprep.subr.bf16.mxu0 %v7393_v2  ;;  %v7475_v2 = vld [vmem:[%s8247_s15 + $0x6e0] ss:$8 sps:$4 sm:$0xff]  }
 0x15c   : > { %3020 = vmatpush1.bf16.msra.mxu0 %v7391_v3  ;;  %v7480_v3 = vld [vmem:[%s8247_s15 + $0x6f4] ss:$8 sps:$4 sm:$0xff]  }
 0x15d   : > { %3021 = vmatprep.subr.bf16.mxu0 %v7396_v4  ;;  %v7478_v4 = vld [vmem:[%s8247_s15 + $0x6f0] ss:$8 sps:$4 sm:$0xff]  }
 0x160   : > { %3022 = vmatpush1.bf16.msra.mxu0 %v7394_v5  ;;  %v7484_v5 = vld [vmem:[%s8247_s15 + $0x704] ss:$8 sps:$4 sm:$0xff]  }
 0x161   : > { %3023 = vmatprep.subr.bf16.mxu0 %v7399_v6  ;;  %v8552_v6 = vrot.slane %v8505_v32, %v8269_v16  ;;  %v7517_v32 = vld [vmem:[%s8247_s15 + $0x7b4] ss:$8 sps:$4 sm:$0xff]  }
 0x164   : > { %3024 = vmatpush1.bf16.msra.mxu0 %v7397_v7  ;;  %v7482_v7 = vld [vmem:[%s8247_s15 + $0x700] ss:$8 sps:$4 sm:$0xff]  }
 0x165   : > { %3025 = vmatprep.subr.bf16.mxu0 %v7402_v8  ;;  %v1126_v8 = vcombine.high %v8516_v38, %v8516_v38 }
 0x168   : > { %3026 = vmatpush1.bf16.msra.mxu0 %v7400_v9  ;;  %v7487_v9 = vld [vmem:[%s8247_s15 + $0x714] ss:$8 sps:$4 sm:$0xff]  }
 0x169   : > { %3027 = vmatprep.subr.bf16.mxu0 %v7405_v10  ;;  %v7485_v10 = vld [vmem:[%s8247_s15 + $0x710] ss:$8 sps:$4 sm:$0xff]  }
 0x16c   : > { %3028 = vmatpush1.bf16.msra.mxu0 %v7403_v11  ;;  %v7490_v11 = vld [vmem:[%s8247_s15 + $0x724] ss:$8 sps:$4 sm:$0xff]  }
 0x16d   : > { %3029 = vmatprep.subr.bf16.mxu0 %v7408_v13  ;;  %v7488_v13 = vld [vmem:[%s8247_s15 + $0x720] ss:$8 sps:$4 sm:$0xff]  }
 0x170   : > { %3030 = vmatpush1.bf16.msra.mxu0 %v7406_v14  ;;  %v7493_v14 = vld [vmem:[%s8247_s15 + $0x734] ss:$8 sps:$4 sm:$0xff]  }
 0x171   : > { %3031 = vmatprep.subr.bf16.mxu0 %v7411_v15  ;;  %v7491_v15 = vld [vmem:[%s8247_s15 + $0x730] ss:$8 sps:$4 sm:$0xff]  }
 0x174   : > { %3032 = vmatpush1.bf16.msra.mxu0 %v7409_v17  ;;  %v7496_v17 = vld [vmem:[%s8247_s15 + $0x744] ss:$8 sps:$4 sm:$0xff]  }
 0x175   : > { %3033 = vmatprep.subr.bf16.mxu0 %v7414_v18  ;;  %v7494_v18 = vld [vmem:[%s8247_s15 + $0x740] ss:$8 sps:$4 sm:$0xff]  }
 0x178   : > { %3034 = vmatpush1.bf16.msra.mxu0 %v7412_v19  ;;  %v7499_v19 = vld [vmem:[%s8247_s15 + $0x754] ss:$8 sps:$4 sm:$0xff]  }
 0x179   : > { %3035 = vmatprep.subr.bf16.mxu0 %v7417_v21  ;;  %v7497_v21 = vld [vmem:[%s8247_s15 + $0x750] ss:$8 sps:$4 sm:$0xff]  }
 0x17c   : > { %3036 = vmatpush1.bf16.msra.mxu0 %v7415_v22  ;;  %v7502_v22 = vld [vmem:[%s8247_s15 + $0x764] ss:$8 sps:$4 sm:$0xff]  }
 0x17d   : > { %3037 = vmatprep.subr.bf16.mxu0 %v7420_v23  ;;  %v7500_v23 = vld [vmem:[%s8247_s15 + $0x760] ss:$8 sps:$4 sm:$0xff]  }
 0x180   : > { %3038 = vmatpush1.bf16.msra.mxu0 %v7418_v24  ;;  %v7505_v24 = vld [vmem:[%s8247_s15 + $0x774] ss:$8 sps:$4 sm:$0xff]  }
 0x181   : > { %3039 = vmatprep.subr.bf16.mxu0 %v7423_v25  ;;  %v7503_v25 = vld [vmem:[%s8247_s15 + $0x770] ss:$8 sps:$4 sm:$0xff]  }
 0x184   : > { %3040 = vmatpush1.bf16.msra.mxu0 %v7421_v26  ;;  %v7508_v26 = vld [vmem:[%s8247_s15 + $0x784] ss:$8 sps:$4 sm:$0xff]  }
 0x185   : > { %3041 = vmatprep.subr.bf16.mxu0 %v7426_v27  ;;  %v7506_v27 = vld [vmem:[%s8247_s15 + $0x780] ss:$8 sps:$4 sm:$0xff]  }
 0x188   : > { %3042 = vmatpush1.bf16.msra.mxu0 %v7424_v28  ;;  %v7511_v28 = vld [vmem:[%s8247_s15 + $0x794] ss:$8 sps:$4 sm:$0xff]  }
 0x189   : > { %3043 = vmatprep.subr.bf16.mxu0 %v7429_v30  ;;  %v7514_v30 = vld [vmem:[%s8247_s15 + $0x7a4] ss:$8 sps:$4 sm:$0xff]  }
 0x18c   : > { %3044 = vmatpush1.bf16.msra.mxu0 %v7427_v31  ;;  %v7512_v31 = vld [vmem:[%s8247_s15 + $0x7a0] ss:$8 sps:$4 sm:$0xff]  }
 0x18d   : > { %3045 = vmatprep.subr.bf16.mxu0 %v7432_v33  ;;  %v7515_v33 = vld [vmem:[%s8247_s15 + $0x7b0] ss:$8 sps:$4 sm:$0xff]  }
 0x190   : > { %3046 = vmatpush1.bf16.msra.mxu0 %v7430_v34  ;;  %v7520_v34 = vld [vmem:[%s8247_s15 + $0x7c4] ss:$8 sps:$4 sm:$0xff]  }
 0x191   : > { %3056 = vmatprep.subr.bf16.mxu0 %v7435_v20  ;;  %v7523_v20 = vld [vmem:[%s8247_s15 + $0x7d4] ss:$8 sps:$4 sm:$0xff]  }
 0x193   : > { %3048 = vmatmul.mubr.bf16.vlgmr.msra.gmra.mrb[0].mxu0 %v1123_v36  ;;  %v7521_v36 = vld [vmem:[%s8247_s15 + $0x7d0] ss:$8 sps:$4 sm:$0xff]  }
 0x194   : > { %3057 = vmatpush1.bf16.msra.mxu0 %v7433_v37  ;;  %3088 = vmatprep.mubr.bf16.mxu0 %v8516_v38  ;;  %v7526_v37 = vld [vmem:[%s8247_s15 + $0x7e4] ss:$8 sps:$4 sm:$0xff]   ;;  %v689_v38 = vld [vmem:[%s8266_s19 + $0x10] sm:$0x1f] }
 0x195   : > { %3058 = vmatprep.subr.bf16.mxu0 %v7438_v39  ;;  %v7524_v39 = vld [vmem:[%s8247_s15 + $0x7e0] ss:$8 sps:$4 sm:$0xff]  }
 0x198   : > { %3059 = vmatpush1.bf16.msra.mxu0 %v7436_v40  ;;  %v8588_v40 = vrot.slane %v689_v38, %v8269_v16 }
 0x199   : > { %3060 = vmatprep.subr.bf16.mxu0 %v7441_v41  ;;  %v7621_v41 = vld [vmem:[%s8247_s15 + $0xa04] ss:$8 sps:$4 sm:$0xff]  }
 0x19a   : > { %3220 = vmatprep.subr.bf16.mxu1 %v7621_v41  ;;  %v7563_v41 = vld [vmem:[%s8247_s15 + $0x8b0] ss:$8 sps:$4 sm:$0xff]  }
 0x19c   : > { %3061 = vmatpush1.bf16.msra.mxu0 %v7439_v42  ;;  %v7529_v42 = vld [vmem:[%s8247_s15 + $0x7f4] ss:$8 sps:$4 sm:$0xff]  }
 0x19d   : > { %3062 = vmatprep.subr.bf16.mxu0 %v7444_v43  ;;  %v7626_v43 = vld [vmem:[%s8247_s15 + $0xa00] ss:$8 sps:$4 sm:$0xff]  }
 0x19e   : > { %3221 = vmatpush1.bf16.msra.mxu1 %v7626_v43  ;;  %v7568_v43 = vld [vmem:[%s8247_s15 + $0x8c4] ss:$8 sps:$4 sm:$0xff]  }
 0x1a0   : > { %3063 = vmatpush1.bf16.msra.mxu0 %v7442_v44  ;;  %v1127_v44 = vcombine.high %v689_v38, %v689_v38  ;;  %v7565_v38 = vld [vmem:[%s8247_s15 + $0x8b4] ss:$8 sps:$4 sm:$0xff]  }
 0x1a1   : > { %3064 = vmatprep.subr.bf16.mxu0 %v7447_v45  ;;  %v7527_v45 = vld [vmem:[%s8247_s15 + $0x7f0] ss:$8 sps:$4 sm:$0xff]  }
 0x1a4   : > { %3065 = vmatpush1.bf16.msra.mxu0 %v7445_v46  ;;  %v1142_v46 = vcombine.high %v8588_v40, %v8588_v40 }
 0x1a5   : > { %3066 = vmatprep.subr.bf16.mxu0 %v7450_v47  ;;  %v7627_v47 = vld [vmem:[%s8247_s15 + $0xa14] ss:$8 sps:$4 sm:$0xff]  }
 0x1a6   : > { %3222 = vmatprep.subr.bf16.mxu1 %v7627_v47  ;;  %v7571_v47 = vld [vmem:[%s8247_s15 + $0x8d4] ss:$8 sps:$4 sm:$0xff]  }
 0x1a8   : > { %3067 = vmatpush1.bf16.msra.mxu0 %v7448_v48  ;;  %v7532_v48 = vld [vmem:[%s8247_s15 + $0x804] ss:$8 sps:$4 sm:$0xff]  }
 0x1a9   : > { %3068 = vmatprep.subr.bf16.mxu0 %v7453_v49  ;;  %v7632_v49 = vld [vmem:[%s8247_s15 + $0xa10] ss:$8 sps:$4 sm:$0xff]  }
 0x1aa   : > { %3223 = vmatpush1.bf16.msra.mxu1 %v7632_v49  ;;  %v7569_v49 = vld [vmem:[%s8247_s15 + $0x8d0] ss:$8 sps:$4 sm:$0xff]  }
 0x1ac   : > { %3069 = vmatpush1.bf16.msra.mxu0 %v7451_v50  ;;  %v1141_v50 = vrot.slane %v1127_v44, %v8269_v16  ;;  %v7652_v44 = vld [vmem:[%s8619_s14 + $0xc0] ss:$16 sps:$4 sm:$0xff]  }
 0x1ad   : > { %3070 = vmatprep.subr.bf16.mxu0 %v7456_v51  ;;  %v1124_v51 = vcombine.high %v8552_v6, %v8552_v6 }
 0x1b0   : > { %3071 = vmatpush1.bf16.msra.mxu0 %v7454_v52  ;;  %v7530_v52 = vld [vmem:[%s8247_s15 + $0x800] ss:$8 sps:$4 sm:$0xff]  }
 0x1b1   : > { %3072 = vmatprep.subr.bf16.mxu0 %v7459_v53  ;;  %v8604_v53 = vrot.slane %v1142_v46, %v8269_v16  ;;  %v7657_v46 = vld [vmem:[%s8619_s14 + $0xe4] ss:$16 sps:$4 sm:$0xff]  }
 0x1b4   : > { %3073 = vmatpush1.bf16.msra.mxu0 %v7457_v54  ;;  %v1156_v54 = vrot.slane %v1141_v50, %v8269_v16  ;;  %v7660_v50 = vld [vmem:[%s8619_s14 + $0x104] ss:$16 sps:$4 sm:$0xff]  }
 0x1b5   : > { %3074 = vmatprep.subr.bf16.mxu0 %v7462_v55  ;;  %v7535_v55 = vld [vmem:[%s8247_s15 + $0x814] ss:$8 sps:$4 sm:$0xff]  }
 0x1b8   : > { %3075 = vmatpush1.bf16.msra.mxu0 %v7460_v56  ;;  %v8151_v56 = vmov 0  }
 0x1b9   : > { %3076 = vmatprep.subr.bf16.mxu0 %v7465_v57  ;;  %3252 = vmatprep.mubr.bf16.mxu1 %v8151_v56  ;;  %v7533_v57 = vld [vmem:[%s8247_s15 + $0x810] ss:$8 sps:$4 sm:$0xff]  }
 0x1ba   : > { %6650 = vmatmul.mubr.msk.bf16.vlgmr.msra.gmra.mrb[0].mxu1 %vm2806_vm0, %v1156_v54  ;;  %v7572_v54 = vld [vmem:[%s8247_s15 + $0x8e0] ss:$8 sps:$4 sm:$0xff]  }
 0x1bb   : > { %3384 = vmatprep.mubr.bf16.mxu1 %v8151_v56 }
 0x1bc   : > { %3077 = vmatpush1.bf16.msra.mxu0 %v7463_v58  ;;  %v8152_v58 = vmov 1983009808  }
 0x1bd   : > { %3078 = vmatprep.subr.bf16.mxu0 %v7468_v59  ;;  %v3320_v59 = vunpack.c.l.s4 %v8152_v58  ;;  %v7575_v58 = vld [vmem:[%s8247_s15 + $0x8f0] ss:$8 sps:$4 sm:$0xff]  }
 0x1c0   : > { %3079 = vmatpush1.bf16.msra.mxu0 %v7466_v60  ;;  %v7538_v60 = vld [vmem:[%s8247_s15 + $0x824] ss:$8 sps:$4 sm:$0xff]  }
 0x1c1   : > { %3080 = vmatprep.subr.bf16.mxu0 %v7471_v61  ;;  %v3316_v61 = vld [vmem:[%s648_s23] sm:$0xff]  ;;  %s7005_s23 = sshll.u32 %s9202_s25, 8 }
 0x1c4   : > { %3081 = vmatpush1.bf16.msra.mxu0 %v7469_v62  ;;  %v3321_v62 = vunpack.c.0.s8 %v3320_v59  ;;  %v7666_v59 = vld [vmem:[%s8619_s14 + $0x144] ss:$16 sps:$4 sm:$0xff]  }
 0x1c5   : > { %3082 = vmatprep.subr.bf16.mxu0 %v7474_v63  ;;  %v3318_v63 = vcombine.high %v3316_v61, %v3316_v61 }
 0x1c8   : > { %3083 = vmatpush1.bf16.msra.mxu0 %v7472_v0  ;;  %v7536_v0 = vld [vmem:[%s8247_s15 + $0x820] ss:$8 sps:$4 sm:$0xff]  }
 0x1c9   : > { %3084 = vmatprep.subr.bf16.mxu0 %v7477_v1  ;;  %v3324_v1 = vsub.s32 %v3321_v62, %v8259_v12  ;;  %v7664_v62 = vld [vmem:[%s8619_s14 + $0x140] ss:$16 sps:$4 sm:$0xff]  }
 0x1cc   : > { %3085 = vmatpush1.bf16.msra.mxu0 %v7475_v2  ;;  %v7541_v2 = vld [vmem:[%s8247_s15 + $0x834] ss:$8 sps:$4 sm:$0xff]  }
 0x1cd   : > { %3086 = vmatprep.subr.bf16.mxu0 %v7480_v3  ;;  %v3325_v3 = vrot.slane %v3316_v61, %v3324_v1  ;;  %v8682_v61 = vrot.slane %v8588_v40, %v8269_v16  ;;  %v7582_v16 = vld [vmem:[%s8247_s15 + $0x910] ss:$8 sps:$4 sm:$0xff]   ;;  %v7587_v40 = vld [vmem:[%s8247_s15 + $0x924] ss:$8 sps:$4 sm:$0xff]  }
 0x1d0   : > { %3087 = vmatpush1.bf16.msra.mxu0 %v7478_v4  ;;  %v3332_v4 = vrot.slane %v3318_v63, %v3324_v1  ;;  %v7579_v63 = vld [vmem:[%s8247_s15 + $0x900] ss:$8 sps:$4 sm:$0xff]   ;;  %v7584_v1 = vld [vmem:[%s8247_s15 + $0x914] ss:$8 sps:$4 sm:$0xff]  }
 0x1d1   : > { %3097 = vmatprep.subr.bf16.mxu0 %v7484_v5  ;;  %v7539_v5 = vld [vmem:[%s8247_s15 + $0x830] ss:$8 sps:$4 sm:$0xff]  }
 0x1d3   : > { %3089 = vmatmul.mubr.bf16.vlgmr.msra.gmra.mrb[0].mxu0 %v8552_v6  ;;  %v3333_v6 = vcombine.high %v3325_v3, %v3325_v3 }
 0x1d4   : > { %3098 = vmatpush1.bf16.msra.mxu0 %v7482_v7  ;;  %3129 = vmatprep.mubr.bf16.mxu0 %v1126_v8  ;;  %v3341_v7 = vsel %vm3339_vm1, %v3325_v3, 0  ;;  %v3334_v8 = vcombine.high %v3332_v4, %v3332_v4  ;;  %v7588_v3 = vld [vmem:[%s8247_s15 + $0x930] ss:$8 sps:$4 sm:$0xff]  }
 0x1d5   : > { %3099 = vmatprep.subr.bf16.mxu0 %v7487_v9  ;;  %v7544_v9 = vld [vmem:[%s8247_s15 + $0x844] ss:$8 sps:$4 sm:$0xff]   ;;  %6651 = vmatprep.subr.msk.bf16.mxu1 %vm3339_vm1, %v3333_v6  ;;  %v7596_v6 = vld [vmem:[%s8247_s15 + $0x954] ss:$8 sps:$4 sm:$0xff]  }
 0x1d6   : > { %3353 = vmatpush1.bf16.msra.mxu1 %v3341_v7  ;;  %v7594_v7 = vld [vmem:[%s8247_s15 + $0x950] ss:$8 sps:$4 sm:$0xff]  }
 0x1d7   : > { %6653 = vmatprep.subr.msk.bf16.mxu1 %vm3339_vm1, %v3334_v8  ;;  %v7599_v8 = vld [vmem:[%s8247_s15 + $0x964] ss:$8 sps:$4 sm:$0xff]  }
 0x1d8   : > { %3100 = vmatpush1.bf16.msra.mxu0 %v7485_v10  ;;  %v7542_v10 = vld [vmem:[%s8247_s15 + $0x840] ss:$8 sps:$4 sm:$0xff]  }
 0x1d9   : > { %3101 = vmatprep.subr.bf16.mxu0 %v7490_v11  ;;  %v3315_v11 = vld [vmem:[%s9184_s1] sm:$0x1] }
 0x1da   : > { %6652 = vmatmul.mubr.msk.bf16.vlgmr.msra.gmra.mrb[4].mxu1 %vm3335_vm2, %v3315_v11 }
 0x1db   : > { %3425 = vmatprep.mubr.bf16.mxu1 %v8151_v56  ;;  %v7577_v56 = vld [vmem:[%s8247_s15 + $0x8f4] ss:$8 sps:$4 sm:$0xff]  }
 0x1dc   : > { %3102 = vmatpush1.bf16.msra.mxu0 %v7488_v13  ;;  %v3347_v13 = vsel %vm3339_vm1, %v3332_v4, 0  ;;  %v7593_v4 = vld [vmem:[%s8247_s15 + $0x944] ss:$8 sps:$4 sm:$0xff]  }
 0x1dd   : > { %3103 = vmatprep.subr.bf16.mxu0 %v7493_v14  ;;  %v7636_v14 = vld [vmem:[%s8619_s14 + $0x4] ss:$16 sps:$4 sm:$0xff]   ;;  %3394 = vmatpush1.bf16.msra.mxu1 %v3347_v13 }
 0x1de   : > { %3701 = vmatprep.subr.bf16.mxu1 %v7636_v14  ;;  %v7605_v13 = vld [vmem:[%s8247_s15 + $0x984] ss:$8 sps:$4 sm:$0xff]   ;;  %v7603_v14 = vld [vmem:[%s8247_s15 + $0x980] ss:$8 sps:$4 sm:$0xff]  }
 0x1e0   : > { %3104 = vmatpush1.bf16.msra.mxu0 %v7491_v15  ;;  %v7547_v15 = vld [vmem:[%s8247_s15 + $0x854] ss:$8 sps:$4 sm:$0xff]  }
 0x1e1   : > { %3105 = vmatprep.subr.bf16.mxu0 %v7496_v17  ;;  %v7545_v17 = vld [vmem:[%s8247_s15 + $0x850] ss:$8 sps:$4 sm:$0xff]  }
 0x1e2   : > { %6654 = vmatmul.mubr.msk.bf16.vlgmr.msra.gmra.mrb[8].mxu1 %vm3335_vm2, %v3315_v11  ;;  %v7600_v11 = vld [vmem:[%s8247_s15 + $0x970] ss:$8 sps:$4 sm:$0xff]  }
 0x1e4   : > { %3106 = vmatpush1.bf16.msra.mxu0 %v7494_v18  ;;  %v7550_v18 = vld [vmem:[%s8247_s15 + $0x864] ss:$8 sps:$4 sm:$0xff]  }
 0x1e5   : > { %3107 = vmatprep.subr.bf16.mxu0 %v7499_v19  ;;  %v7634_v19 = vld [vmem:[%s8619_s14] ss:$16 sps:$4 sm:$0xff]  }
 0x1e6   : > { %3702 = vmatpush1.bf16.msra.mxu1 %v7634_v19  ;;  %v7609_v19 = vld [vmem:[%s8247_s15 + $0x9a0] ss:$8 sps:$4 sm:$0xff]  }
 0x1e8   : > { %3108 = vmatpush1.bf16.msra.mxu0 %v7497_v21  ;;  %v7548_v21 = vld [vmem:[%s8247_s15 + $0x860] ss:$8 sps:$4 sm:$0xff]  }
 0x1e9   : > { %3109 = vmatprep.subr.bf16.mxu0 %v7502_v22  ;;  %v7639_v22 = vld [vmem:[%s8619_s14 + $0x24] ss:$16 sps:$4 sm:$0xff]  }
 0x1ea   : > { %3703 = vmatprep.subr.bf16.mxu1 %v7639_v22  ;;  %v7612_v22 = vld [vmem:[%s8247_s15 + $0x9b0] ss:$8 sps:$4 sm:$0xff]  }
 0x1ec   : > { %3110 = vmatpush1.bf16.msra.mxu0 %v7500_v23  ;;  %v7553_v23 = vld [vmem:[%s8247_s15 + $0x874] ss:$8 sps:$4 sm:$0xff]  }
 0x1ed   : > { %3111 = vmatprep.subr.bf16.mxu0 %v7505_v24  ;;  %v7637_v24 = vld [vmem:[%s8619_s14 + $0x20] ss:$16 sps:$4 sm:$0xff]  }
 0x1ee   : > { %3704 = vmatpush1.bf16.msra.mxu1 %v7637_v24  ;;  %v7615_v24 = vld [vmem:[%s8247_s15 + $0x9c0] ss:$8 sps:$4 sm:$0xff]  }
 0x1f0   : > { %3112 = vmatpush1.bf16.msra.mxu0 %v7503_v25  ;;  %v7551_v25 = vld [vmem:[%s8247_s15 + $0x870] ss:$8 sps:$4 sm:$0xff]  }
 0x1f1   : > { %3113 = vmatprep.subr.bf16.mxu0 %v7508_v26  ;;  %v7642_v26 = vld [vmem:[%s8619_s14 + $0x44] ss:$16 sps:$4 sm:$0xff]  }
 0x1f2   : > { %3705 = vmatprep.subr.bf16.mxu1 %v7642_v26  ;;  %v7618_v26 = vld [vmem:[%s8247_s15 + $0x9d0] ss:$8 sps:$4 sm:$0xff]  }
 0x1f4   : > { %3114 = vmatpush1.bf16.msra.mxu0 %v7506_v27  ;;  %v7556_v27 = vld [vmem:[%s8247_s15 + $0x884] ss:$8 sps:$4 sm:$0xff]  }
 0x1f5   : > { %3115 = vmatprep.subr.bf16.mxu0 %v7511_v28  ;;  %v7640_v28 = vld [vmem:[%s8619_s14 + $0x40] ss:$16 sps:$4 sm:$0xff]  }
 0x1f6   : > { %3706 = vmatpush1.bf16.msra.mxu1 %v7640_v28  ;;  %v7623_v28 = vld [vmem:[%s8247_s15 + $0x9e0] ss:$8 sps:$4 sm:$0xff]  }
 0x1f8   : > { %3116 = vmatpush1.bf16.msra.mxu0 %v7509_v29  ;;  %v7554_v29 = vld [vmem:[%s8247_s15 + $0x880] ss:$8 sps:$4 sm:$0xff]  }
 0x1f9   : > { %3117 = vmatprep.subr.bf16.mxu0 %v7514_v30  ;;  %v7645_v30 = vld [vmem:[%s8619_s14 + $0x64] ss:$16 sps:$4 sm:$0xff]  }
 0x1fa   : > { %3707 = vmatprep.subr.bf16.mxu1 %v7645_v30  ;;  %v7629_v30 = vld [vmem:[%s8247_s15 + $0x9f0] ss:$8 sps:$4 sm:$0xff]  }
 0x1fc   : > { %3118 = vmatpush1.bf16.msra.mxu0 %v7512_v31  ;;  %v7559_v31 = vld [vmem:[%s8247_s15 + $0x894] ss:$8 sps:$4 sm:$0xff]  }
 0x1fd   : > { %3119 = vmatprep.subr.bf16.mxu0 %v7517_v32  ;;  %v7643_v32 = vld [vmem:[%s8619_s14 + $0x60] ss:$16 sps:$4 sm:$0xff]  }
 0x1fe   : > { %3708 = vmatpush1.bf16.msra.mxu1 %v7643_v32 }
 0x200   : > { %3120 = vmatpush1.bf16.msra.mxu0 %v7515_v33  ;;  %v7557_v33 = vld [vmem:[%s8247_s15 + $0x890] ss:$8 sps:$4 sm:$0xff]  }
 0x201   : > { %3121 = vmatprep.subr.bf16.mxu0 %v7520_v34  ;;  %v7648_v34 = vld [vmem:[%s8619_s14 + $0x84] ss:$16 sps:$4 sm:$0xff]  }
 0x202   : > { %3709 = vmatprep.subr.bf16.mxu1 %v7648_v34  ;;  %v7669_v34 = vld [vmem:[%s8619_s14 + $0x164] ss:$16 sps:$4 sm:$0xff]  }
 0x204   : > { %3122 = vmatpush1.bf16.msra.mxu0 %v7518_v35  ;;  %v7562_v35 = vld [vmem:[%s8247_s15 + $0x8a4] ss:$8 sps:$4 sm:$0xff]  }
 0x205   : > { %3123 = vmatprep.subr.bf16.mxu0 %v7523_v20  ;;  %v7646_v20 = vld [vmem:[%s8619_s14 + $0x80] ss:$16 sps:$4 sm:$0xff]  }
 0x206   : > { %3710 = vmatpush1.bf16.msra.mxu1 %v7646_v20  ;;  %v7667_v20 = vld [vmem:[%s8619_s14 + $0x160] ss:$16 sps:$4 sm:$0xff]  }
 0x208   : > { %3124 = vmatpush1.bf16.msra.mxu0 %v7521_v36  ;;  %v7560_v36 = vld [vmem:[%s8247_s15 + $0x8a0] ss:$8 sps:$4 sm:$0xff]  }
 0x209   : > { %3125 = vmatprep.subr.bf16.mxu0 %v7526_v37  ;;  %v7651_v37 = vld [vmem:[%s8619_s14 + $0xa4] ss:$16 sps:$4 sm:$0xff]  }
 0x20a   : > { %3711 = vmatprep.subr.bf16.mxu1 %v7651_v37  ;;  %v3313_v37 = vld [vmem:[%s8619_s14 + $0x180] sm:$0xff] }
 0x20c   : > { %3126 = vmatpush1.bf16.msra.mxu0 %v7524_v39  ;;  %v7649_v39 = vld [vmem:[%s8619_s14 + $0xa0] ss:$16 sps:$4 sm:$0xff]  }
 0x20d   : > { %3127 = vmatprep.subr.bf16.mxu0 %v7529_v42  ;;  %v7654_v42 = vld [vmem:[%s8619_s14 + $0xc4] ss:$16 sps:$4 sm:$0xff]   ;;  %3712 = vmatpush1.bf16.msra.mxu1 %v7649_v39  ;;  %v6703_v39 = vcombine.low %v3313_v37, %v3313_v37 }
 0x20e   : > { %3713 = vmatprep.subr.bf16.mxu1 %v7654_v42  ;;  %v7674_v42 = vld [vmem:[%s8619_s14 + $0xc] ss:$16 sps:$4 sm:$0xff]  }
 0x210   : > { %3128 = vmatpush1.bf16.msra.mxu0 %v7527_v45  ;;  %v7566_v45 = vld [vmem:[%s8247_s15 + $0x8c0] ss:$8 sps:$4 sm:$0xff]  }
 0x211   : > { %3138 = vmatprep.subr.bf16.mxu0 %v7532_v48  ;;  %3714 = vmatpush1.bf16.msra.mxu1 %v7652_v44  ;;  %v7655_v48 = vld [vmem:[%s8619_s14 + $0xe0] ss:$16 sps:$4 sm:$0xff]  }
 0x212   : > { %3715 = vmatprep.subr.bf16.mxu1 %v7657_v46 }
 0x213   : > { %3130 = vmatmul.mubr.bf16.vlgmr.msra.gmra.mrb[0].mxu0 %v1124_v51  ;;  %v7574_v51 = vld [vmem:[%s8247_s15 + $0x8e4] ss:$8 sps:$4 sm:$0xff]  }
 0x214   : > { %3139 = vmatpush1.bf16.msra.mxu0 %v7530_v52  ;;  %3170 = vmatprep.mubr.bf16.mxu0 %v8604_v53  ;;  %v7658_v52 = vld [vmem:[%s8619_s14 + $0x100] ss:$16 sps:$4 sm:$0xff]  }
 0x215   : > { %3140 = vmatprep.subr.bf16.mxu0 %v7535_v55  ;;  %3716 = vmatpush1.bf16.msra.mxu1 %v7655_v48  ;;  %v7663_v55 = vld [vmem:[%s8619_s14 + $0x124] ss:$16 sps:$4 sm:$0xff]  }
 0x216   : > { %3717 = vmatprep.subr.bf16.mxu1 %v7660_v50 }
 0x218   : > { %3141 = vmatpush1.bf16.msra.mxu0 %v7533_v57  ;;  %v7661_v57 = vld [vmem:[%s8619_s14 + $0x120] ss:$16 sps:$4 sm:$0xff]  }
 0x219   : > { %3142 = vmatprep.subr.bf16.mxu0 %v7538_v60  ;;  %3718 = vmatpush1.bf16.msra.mxu1 %v7658_v52  ;;  %v7581_v60 = vld [vmem:[%s8247_s15 + $0x904] ss:$8 sps:$4 sm:$0xff]   ;;  %v1014_v52 = vld [vmem:[%s638_s24] sm:$0x3] }
 0x21a   : > { %3719 = vmatprep.subr.bf16.mxu1 %v7663_v55 }
 0x21c   : > { %3143 = vmatpush1.bf16.msra.mxu0 %v7536_v0  ;;  %v1165_v0 = vcombine.high %v8604_v53, %v8604_v53  ;;  %v7590_v53 = vld [vmem:[%s8247_s15 + $0x934] ss:$8 sps:$4 sm:$0xff]  }
 0x21d   : > { %3144 = vmatprep.subr.bf16.mxu0 %v7541_v2  ;;  %3720 = vmatpush1.bf16.msra.mxu1 %v7661_v57  ;;  %v7585_v2 = vld [vmem:[%s8247_s15 + $0x920] ss:$8 sps:$4 sm:$0xff]  }
 0x21e   : > { %3721 = vmatprep.subr.bf16.mxu1 %v7666_v59 }
 0x220   : > { %3145 = vmatpush1.bf16.msra.mxu0 %v7539_v5  ;;  %v7591_v5 = vld [vmem:[%s8247_s15 + $0x940] ss:$8 sps:$4 sm:$0xff]  }
 0x221   : > { %3146 = vmatprep.subr.bf16.mxu0 %v7544_v9  ;;  %3722 = vmatpush1.bf16.msra.mxu1 %v7664_v62  ;;  %v7597_v9 = vld [vmem:[%s8247_s15 + $0x960] ss:$8 sps:$4 sm:$0xff]  }
 0x222   : > { %3723 = vmatprep.subr.bf16.mxu1 %v7669_v34 }
 0x224   : > { %3147 = vmatpush1.bf16.msra.mxu0 %v7542_v10  ;;  %v7602_v10 = vld [vmem:[%s8247_s15 + $0x974] ss:$8 sps:$4 sm:$0xff]  }
 0x225   : > { %3148 = vmatprep.subr.bf16.mxu0 %v7547_v15  ;;  %v7608_v15 = vld [vmem:[%s8247_s15 + $0x994] ss:$8 sps:$4 sm:$0xff]   ;;  %3724 = vmatpush1.bf16.msra.mxu1 %v7667_v20 }
 0x228   : > { %3149 = vmatpush1.bf16.msra.mxu0 %v7545_v17  ;;  %v7606_v17 = vld [vmem:[%s8247_s15 + $0x990] ss:$8 sps:$4 sm:$0xff]  }
 0x229   : > { %3150 = vmatprep.subr.bf16.mxu0 %v7550_v18  ;;  %v7611_v18 = vld [vmem:[%s8247_s15 + $0x9a4] ss:$8 sps:$4 sm:$0xff]  }
 0x22c   : > { %3151 = vmatpush1.bf16.msra.mxu0 %v7548_v21  ;;  %v7614_v21 = vld [vmem:[%s8247_s15 + $0x9b4] ss:$8 sps:$4 sm:$0xff]  }
 0x22d   : > { %3152 = vmatprep.subr.bf16.mxu0 %v7553_v23  ;;  %v7617_v23 = vld [vmem:[%s8247_s15 + $0x9c4] ss:$8 sps:$4 sm:$0xff]  }
 0x230   : > { %3153 = vmatpush1.bf16.msra.mxu0 %v7551_v25  ;;  %v7620_v25 = vld [vmem:[%s8247_s15 + $0x9d4] ss:$8 sps:$4 sm:$0xff]  }
 0x231   : > { %3154 = vmatprep.subr.bf16.mxu0 %v7556_v27  ;;  %v7625_v27 = vld [vmem:[%s8247_s15 + $0x9e4] ss:$8 sps:$4 sm:$0xff]  }
 0x234   : > { %3155 = vmatpush1.bf16.msra.mxu0 %v7554_v29  ;;  %v7631_v29 = vld [vmem:[%s8247_s15 + $0x9f4] ss:$8 sps:$4 sm:$0xff]   ;;  %s7003_s15 = sshll.u32 %s9202_s25, 10 }
 0x235   : > { %3156 = vmatprep.subr.bf16.mxu0 %v7559_v31  ;;  %v1164_v31 = vcombine.high %v8682_v61, %v8682_v61  ;;  %s8737_s20 = scalar_lea.vmem %s9190_s7, %s7003_s15  ;;  %s8894_s19 = scalar_lea.vmem %s9192_s9, %s7003_s15 }
 0x236   : > { %v7715_v34 = vld [vmem:[%s8737_s20 + $0x24] ss:$16 sps:$4 sm:$0xff]   ;;  %s678_s15 = scalar_lea.vmem %s9195_s12, %s9202_s25 }
 0x237   : > { %v7718_v20 = vld [vmem:[%s8737_s20 + $0x44] ss:$16 sps:$4 sm:$0xff]  }
 0x238   : > { %3157 = vmatpush1.bf16.msra.mxu0 %v7557_v33 }
 0x239   : > { %3158 = vmatprep.subr.bf16.mxu0 %v7562_v35 }
 0x23c   : > { %3159 = vmatpush1.bf16.msra.mxu0 %v7560_v36 }
 0x23d   : > { %3160 = vmatprep.subr.bf16.mxu0 %v7565_v38  ;;  %v6704_v38 = vcombine.high %v3313_v37, %v3313_v37  ;;  %v7721_v37 = vld [vmem:[%s8737_s20 + $0x64] ss:$16 sps:$4 sm:$0xff]  }
 0x23f   : > { %6707 = vmatprep.subr.msk.bf16.mxu1 %vm3688_vm3, %v6704_v38  ;;  %v7719_v38 = vld [vmem:[%s8737_s20 + $0x60] ss:$16 sps:$4 sm:$0xff]  }
 0x240   : > { %3161 = vmatpush1.bf16.msra.mxu0 %v7563_v41  ;;  %v3690_v41 = vsel %vm3688_vm3, %v6703_v39, 0  ;;  %v7724_v39 = vld [vmem:[%s8737_s20 + $0x84] ss:$16 sps:$4 sm:$0xff]  }
 0x241   : > { %3162 = vmatprep.subr.bf16.mxu0 %v7568_v43  ;;  %3726 = vmatpush1.bf16.msra.mxu1 %v3690_v41  ;;  %v7722_v41 = vld [vmem:[%s8737_s20 + $0x80] ss:$16 sps:$4 sm:$0xff]  }
 0x242   : > { %3742 = vmatprep.subr.bf16.mxu1 %v7674_v42  ;;  %v7727_v42 = vld [vmem:[%s8737_s20 + $0xa4] ss:$16 sps:$4 sm:$0xff]  }
 0x244   : > { %3163 = vmatpush1.bf16.msra.mxu0 %v7566_v45 }
 0x245   : > { %3164 = vmatprep.subr.bf16.mxu0 %v7571_v47 }
 0x248   : > { %3165 = vmatpush1.bf16.msra.mxu0 %v7569_v49 }
 0x249   : > { %3166 = vmatprep.subr.bf16.mxu0 %v7574_v51  ;;  %v8750_v51 = vsub.s32 0, %v8259_v12 }
 0x24b   : > { %v1019_v55 = vrot.slane %v1014_v52, %v8750_v51 }
 0x24c   : > { %3167 = vmatpush1.bf16.msra.mxu0 %v7572_v54  ;;  %v8753_v54 = vsub.s32 1, %v8259_v12 }
 0x24d   : > { %3168 = vmatprep.subr.bf16.mxu0 %v7577_v56 }
 0x24e   : > { %v1023_v56 = vrot.slane %v1014_v52, %v8753_v54  ;;  %v7731_v52 = vld [vmem:[%s8737_s20 + $0xe0] ss:$16 sps:$4 sm:$0xff]  }
 0x250   : > { %3169 = vmatpush1.bf16.msra.mxu0 %v7575_v58 }
 0x251   : > { %3179 = vmatprep.subr.bf16.mxu0 %v7581_v60 }
 0x253   : > { %3171 = vmatmul.mubr.bf16.vlgmr.msra.gmra.mrb[0].mxu0 %v8682_v61 }
 0x254   : > { %3180 = vmatpush1.bf16.msra.mxu0 %v7579_v63  ;;  %3211 = vmatprep.mubr.bf16.mxu0 %v1165_v0 }
 0x255   : > { %3181 = vmatprep.subr.bf16.mxu0 %v7584_v1 }
 0x258   : > { %3182 = vmatpush1.bf16.msra.mxu0 %v7582_v16 }
 0x259   : > { %3183 = vmatprep.subr.bf16.mxu0 %v7587_v40 }
 0x25c   : > { %3184 = vmatpush1.bf16.msra.mxu0 %v7585_v2  ;;  %v7672_v2 = vld [vmem:[%s8619_s14 + $0x8] ss:$16 sps:$4 sm:$0xff]  }
 0x25d   : > { %3185 = vmatprep.subr.bf16.mxu0 %v7590_v53 }
 0x260   : > { %3186 = vmatpush1.bf16.msra.mxu0 %v7588_v3  ;;  %v7677_v3 = vld [vmem:[%s8619_s14 + $0x2c] ss:$16 sps:$4 sm:$0xff]  }
 0x261   : > { %3187 = vmatprep.subr.bf16.mxu0 %v7593_v4  ;;  %v7675_v4 = vld [vmem:[%s8619_s14 + $0x28] ss:$16 sps:$4 sm:$0xff]  }
 0x264   : > { %3188 = vmatpush1.bf16.msra.mxu0 %v7591_v5  ;;  %v7680_v5 = vld [vmem:[%s8619_s14 + $0x4c] ss:$16 sps:$4 sm:$0xff]  }
 0x265   : > { %3189 = vmatprep.subr.bf16.mxu0 %v7596_v6  ;;  %v7678_v6 = vld [vmem:[%s8619_s14 + $0x48] ss:$16 sps:$4 sm:$0xff]  }
 0x268   : > { %3190 = vmatpush1.bf16.msra.mxu0 %v7594_v7  ;;  %v7683_v7 = vld [vmem:[%s8619_s14 + $0x6c] ss:$16 sps:$4 sm:$0xff]  }
 0x269   : > { %3191 = vmatprep.subr.bf16.mxu0 %v7599_v8  ;;  %v7681_v8 = vld [vmem:[%s8619_s14 + $0x68] ss:$16 sps:$4 sm:$0xff]  }
 0x26c   : > { %3192 = vmatpush1.bf16.msra.mxu0 %v7597_v9  ;;  %v7686_v9 = vld [vmem:[%s8619_s14 + $0x8c] ss:$16 sps:$4 sm:$0xff]  }
 0x26d   : > { %3193 = vmatprep.subr.bf16.mxu0 %v7602_v10  ;;  %v7684_v10 = vld [vmem:[%s8619_s14 + $0x88] ss:$16 sps:$4 sm:$0xff]  }
 0x270   : > { %3194 = vmatpush1.bf16.msra.mxu0 %v7600_v11  ;;  %v7689_v11 = vld [vmem:[%s8619_s14 + $0xac] ss:$16 sps:$4 sm:$0xff]  }
 0x271   : > { %3195 = vmatprep.subr.bf16.mxu0 %v7605_v13  ;;  %v7687_v13 = vld [vmem:[%s8619_s14 + $0xa8] ss:$16 sps:$4 sm:$0xff]  }
 0x274   : > { %3196 = vmatpush1.bf16.msra.mxu0 %v7603_v14  ;;  %v7692_v14 = vld [vmem:[%s8619_s14 + $0xcc] ss:$16 sps:$4 sm:$0xff]  }
 0x275   : > { %3197 = vmatprep.subr.bf16.mxu0 %v7608_v15  ;;  %v7690_v15 = vld [vmem:[%s8619_s14 + $0xc8] ss:$16 sps:$4 sm:$0xff]  }
 0x278   : > { %3198 = vmatpush1.bf16.msra.mxu0 %v7606_v17  ;;  %v7695_v17 = vld [vmem:[%s8619_s14 + $0xec] ss:$16 sps:$4 sm:$0xff]  }
 0x279   : > { %3199 = vmatprep.subr.bf16.mxu0 %v7611_v18  ;;  %v7693_v18 = vld [vmem:[%s8619_s14 + $0xe8] ss:$16 sps:$4 sm:$0xff]  }
 0x27c   : > { %3200 = vmatpush1.bf16.msra.mxu0 %v7609_v19  ;;  %v7698_v19 = vld [vmem:[%s8619_s14 + $0x10c] ss:$16 sps:$4 sm:$0xff]  }
 0x27d   : > { %3201 = vmatprep.subr.bf16.mxu0 %v7614_v21  ;;  %v7696_v21 = vld [vmem:[%s8619_s14 + $0x108] ss:$16 sps:$4 sm:$0xff]  }
 0x280   : > { %3202 = vmatpush1.bf16.msra.mxu0 %v7612_v22  ;;  %v7701_v22 = vld [vmem:[%s8619_s14 + $0x12c] ss:$16 sps:$4 sm:$0xff]  }
 0x281   : > { %3203 = vmatprep.subr.bf16.mxu0 %v7617_v23  ;;  %v7699_v23 = vld [vmem:[%s8619_s14 + $0x128] ss:$16 sps:$4 sm:$0xff]  }
 0x284   : > { %3204 = vmatpush1.bf16.msra.mxu0 %v7615_v24  ;;  %v7704_v24 = vld [vmem:[%s8619_s14 + $0x14c] ss:$16 sps:$4 sm:$0xff]  }
 0x285   : > { %3205 = vmatprep.subr.bf16.mxu0 %v7620_v25  ;;  %v7702_v25 = vld [vmem:[%s8619_s14 + $0x148] ss:$16 sps:$4 sm:$0xff]  }
 0x288   : > { %3206 = vmatpush1.bf16.msra.mxu0 %v7618_v26  ;;  %v7707_v26 = vld [vmem:[%s8619_s14 + $0x16c] ss:$16 sps:$4 sm:$0xff]  }
 0x289   : > { %3207 = vmatprep.subr.bf16.mxu0 %v7625_v27  ;;  %v3314_v27 = vld [vmem:[%s8619_s14 + $0x188] sm:$0xff] }
 0x28c   : > { %3208 = vmatpush1.bf16.msra.mxu0 %v7623_v28  ;;  %v7705_v28 = vld [vmem:[%s8619_s14 + $0x168] ss:$16 sps:$4 sm:$0xff]   ;;  %s9060_s14 = scalar_lea.vmem %s9194_s11, %s7005_s23  ;;  %s685_s23 = scalar_lea.vmem %s9196_s13, %s6312_s21 }
 0x28d   : > { %3209 = vmatprep.subr.bf16.mxu0 %v7631_v29  ;;  %v3254_v32 = vpop.f32.mrb[0].mxu1  ;;  %v6706_v29 = vcombine.high %v3314_v27, %v3314_v27 }
 0x28e   : > { %v3256_v33 = vpop.f32.mrb[1].mxu1 }
 0x28f   : > { %v3258_v35 = vpop.f32.mrb[2].mxu1 }
 0x290   : > { %3210 = vmatpush1.bf16.msra.mxu0 %v7629_v30  ;;  %v3259_v36 = vpop.f32.mrb[3].mxu1  ;;  %v6705_v30 = vcombine.low %v3314_v27, %v3314_v27  ;;  %v7713_v35 = vld [vmem:[%s8737_s20 + $0x20] ss:$16 sps:$4 sm:$0xff]  }
 0x291   : > { %v7716_v36 = vld [vmem:[%s8737_s20 + $0x40] ss:$16 sps:$4 sm:$0xff]  }
 0x292   : > { %v7767_v27 = vld [vmem:[%s8737_s20 + $0x260] ss:$16 sps:$4 sm:$0xff]  }
 0x293   : > { %3212 = vmatmul.mubr.bf16.vlgmr.msra.gmra.mrb[0].mxu0 %v1164_v31  ;;  %v3696_v31 = vsel %vm3688_vm3, %v6705_v30, 0  ;;  %v7775_v30 = vld [vmem:[%s8737_s20 + $0x2a4] ss:$16 sps:$4 sm:$0xff]  }
 0x2ad   : > { %v8727_v43 = vpop.f32.mrb[4].mxu1 }
 0x2ae   : > { %v8730_v44 = vpop.f32.mrb[5].mxu1 }
 0x2af   : > { %v3390_v45 = vpop.f32.mrb[6].mxu1 }
 0x2b0   : > { %v3391_v46 = vpop.f32.mrb[7].mxu1  ;;  %v7725_v45 = vld [vmem:[%s8737_s20 + $0xa0] ss:$16 sps:$4 sm:$0xff]  }
 0x2b1   : > { %v7730_v46 = vld [vmem:[%s8737_s20 + $0xc4] ss:$16 sps:$4 sm:$0xff]  }
 0x2b5   : > { %v8739_v47 = vpop.f32.mrb[8].mxu1 }
 0x2b6   : > { %v8741_v48 = vpop.f32.mrb[9].mxu1 }
 0x2b7   : > { %v3431_v49 = vpop.f32.mrb[10].mxu1 }
 0x2b8   : > { %v3432_v50 = vpop.f32.mrb[11].mxu1  ;;  %v7728_v49 = vld [vmem:[%s8737_s20 + $0xc0] ss:$16 sps:$4 sm:$0xff]  }
 0x2b9   : > { %v7733_v50 = vld [vmem:[%s8737_s20 + $0xe4] ss:$16 sps:$4 sm:$0xff]  }
 0x366   : > { %v3213_v57 = vpop.f32.mrb[0].mxu0 }
 0x367   : > { %v7050_v58 = vadd.f32 %v3213_v57, %v1019_v55  ;;  %v3215_v59 = vpop.f32.mrb[1].mxu0  ;;  %v7736_v55 = vld [vmem:[%s8737_s20 + $0x104] ss:$16 sps:$4 sm:$0xff]  }
 0x368   : > { %v7052_v60 = vadd.f32 %v3215_v59, %v1023_v56  ;;  %v3217_v61 = vpop.f32.mrb[2].mxu0  ;;  %v7734_v56 = vld [vmem:[%s8737_s20 + $0x100] ss:$16 sps:$4 sm:$0xff]   ;;  %v7739_v57 = vld [vmem:[%s8737_s20 + $0x124] ss:$16 sps:$4 sm:$0xff]  }
 0x369   : > { %v7051_v62 = vadd.f32 %v7050_v58, %v3254_v32  ;;  %v3218_v63 = vpop.f32.mrb[3].mxu0  ;;  %v7712_v32 = vld [vmem:[%s8737_s20 + $0x4] ss:$16 sps:$4 sm:$0xff]   ;;  %v7737_v58 = vld [vmem:[%s8737_s20 + $0x120] ss:$16 sps:$4 sm:$0xff]  }
 0x36a   : > { %v7053_v0 = vadd.f32 %v7052_v60, %v3256_v33  ;;  %v7710_v33 = vld [vmem:[%s8737_s20] ss:$16 sps:$4 sm:$0xff]   ;;  %v7742_v59 = vld [vmem:[%s8737_s20 + $0x144] ss:$16 sps:$4 sm:$0xff]  }
 0x36b   : > { %v3261_v1 = vmax.f32 %v7051_v62, 0.0  ;;  %v7740_v60 = vld [vmem:[%s8737_s20 + $0x140] ss:$16 sps:$4 sm:$0xff]   ;;  %v7745_v61 = vld [vmem:[%s8737_s20 + $0x164] ss:$16 sps:$4 sm:$0xff]  }
 0x36c   : > { %v3262_v16 = vmax.f32 %v7053_v0, 0.0  ;;  %v7743_v62 = vld [vmem:[%s8737_s20 + $0x160] ss:$16 sps:$4 sm:$0xff]   ;;  %v7748_v63 = vld [vmem:[%s8737_s20 + $0x184] ss:$16 sps:$4 sm:$0xff]  }
 0x36d   : > { %v3263_v53 = vpack.c.bf16 %v3261_v1, %v3261_v1  ;;  %v7746_v0 = vld [vmem:[%s8737_s20 + $0x180] ss:$16 sps:$4 sm:$0xff]   ;;  %v7751_v1 = vld [vmem:[%s8737_s20 + $0x1a4] ss:$16 sps:$4 sm:$0xff]  }
 0x36e   : > { %v3264_v40 = vpack.c.bf16 %v3262_v16, %v3262_v16  ;;  %v7749_v16 = vld [vmem:[%s8737_s20 + $0x1a0] ss:$16 sps:$4 sm:$0xff]  }
 0x370   : > { %6708 = vmatprep.mubr.msk.bf16.mxu1 %vm3684_vm4, %v3264_v40 }
 0x371   : > { %3734 = vmatmul.mubr.bf16.vlgmr.msra.gmra.mrb[12].mxu1 %v3263_v53 }
 0x372   : > { %3743 = vmatpush1.bf16.msra.mxu1 %v7672_v2  ;;  %6710 = vmatprep.mubr.msk.bf16.mxu1 %vm3684_vm4, %v3264_v40  ;;  %v7754_v40 = vld [vmem:[%s8737_s20 + $0x1c4] ss:$16 sps:$4 sm:$0xff]   ;;  %v7752_v2 = vld [vmem:[%s8737_s20 + $0x1c0] ss:$16 sps:$4 sm:$0xff]  }
 0x373   : > { %3744 = vmatprep.subr.bf16.mxu1 %v7677_v3  ;;  %v7755_v3 = vld [vmem:[%s8737_s20 + $0x1e0] ss:$16 sps:$4 sm:$0xff]  }
 0x376   : > { %3745 = vmatpush1.bf16.msra.mxu1 %v7675_v4  ;;  %v7760_v4 = vld [vmem:[%s8737_s20 + $0x204] ss:$16 sps:$4 sm:$0xff]  }
 0x377   : > { %3746 = vmatprep.subr.bf16.mxu1 %v7680_v5  ;;  %v8823_v5 = vld [vmem:[%s652_s16] sm:$0xf] }
 0x37a   : > { %3747 = vmatpush1.bf16.msra.mxu1 %v7678_v6  ;;  %v3788_v6 = vrot.slane %v8823_v5, %v8750_v51 }
 0x37b   : > { %3748 = vmatprep.subr.bf16.mxu1 %v7683_v7 }
 0x37e   : > { %3749 = vmatpush1.bf16.msra.mxu1 %v7681_v8  ;;  %v3792_v8 = vrot.slane %v8823_v5, %v8753_v54 }
 0x37f   : > { %3750 = vmatprep.subr.bf16.mxu1 %v7686_v9 }
 0x382   : > { %3751 = vmatpush1.bf16.msra.mxu1 %v7684_v10 }
 0x383   : > { %3752 = vmatprep.subr.bf16.mxu1 %v7689_v11 }
 0x386   : > { %3753 = vmatpush1.bf16.msra.mxu1 %v7687_v13 }
 0x387   : > { %3754 = vmatprep.subr.bf16.mxu1 %v7692_v14 }
 0x38a   : > { %3755 = vmatpush1.bf16.msra.mxu1 %v7690_v15 }
 0x38b   : > { %3756 = vmatprep.subr.bf16.mxu1 %v7695_v17 }
 0x38e   : > { %3757 = vmatpush1.bf16.msra.mxu1 %v7693_v18 }
 0x38f   : > { %3758 = vmatprep.subr.bf16.mxu1 %v7698_v19 }
 0x392   : > { %3759 = vmatpush1.bf16.msra.mxu1 %v7696_v21 }
 0x393   : > { %3760 = vmatprep.subr.bf16.mxu1 %v7701_v22  ;;  %v7758_v22 = vld [vmem:[%s8737_s20 + $0x200] ss:$16 sps:$4 sm:$0xff]  }
 0x396   : > { %3761 = vmatpush1.bf16.msra.mxu1 %v7699_v23 }
 0x397   : > { %3762 = vmatprep.subr.bf16.mxu1 %v7704_v24  ;;  %v7766_v24 = vld [vmem:[%s8737_s20 + $0x244] ss:$16 sps:$4 sm:$0xff]  }
 0x39a   : > { %3763 = vmatpush1.bf16.msra.mxu1 %v7702_v25  ;;  %v7764_v25 = vld [vmem:[%s8737_s20 + $0x240] ss:$16 sps:$4 sm:$0xff]  }
 0x39b   : > { %3764 = vmatprep.subr.bf16.mxu1 %v7707_v26  ;;  %v7769_v26 = vld [vmem:[%s8737_s20 + $0x264] ss:$16 sps:$4 sm:$0xff]  }
 0x39e   : > { %3765 = vmatpush1.bf16.msra.mxu1 %v7705_v28  ;;  %v7772_v28 = vld [vmem:[%s8737_s20 + $0x284] ss:$16 sps:$4 sm:$0xff]  }
 0x39f   : > { %6709 = vmatprep.subr.msk.bf16.mxu1 %vm3688_vm3, %v6706_v29  ;;  %v7770_v29 = vld [vmem:[%s8737_s20 + $0x280] ss:$16 sps:$4 sm:$0xff]  }
 0x3a2   : > { %3767 = vmatpush1.bf16.msra.mxu1 %v3696_v31  ;;  %v7773_v31 = vld [vmem:[%s8737_s20 + $0x2a0] ss:$16 sps:$4 sm:$0xff]  }
 0x3a3   : > { %4607 = vmatprep.subr.bf16.mxu1 %v7712_v32  ;;  %v7778_v32 = vld [vmem:[%s8737_s20 + $0x2c4] ss:$16 sps:$4 sm:$0xff]  }
 0x3a5   : > { %3775 = vmatmul.mubr.bf16.vlgmr.msra.gmra.mrb[16].mxu1 %v3263_v53  ;;  %v7757_v53 = vld [vmem:[%s8737_s20 + $0x1e4] ss:$16 sps:$4 sm:$0xff]  }
 0x3a6   : > { %4608 = vmatpush1.bf16.msra.mxu1 %v7710_v33  ;;  %v7776_v33 = vld [vmem:[%s8737_s20 + $0x2c0] ss:$16 sps:$4 sm:$0xff]  }
 0x3a7   : > { %4609 = vmatprep.subr.bf16.mxu1 %v7715_v34  ;;  %v7781_v34 = vld [vmem:[%s8737_s20 + $0x2e4] ss:$16 sps:$4 sm:$0xff]  }
 0x3aa   : > { %4610 = vmatpush1.bf16.msra.mxu1 %v7713_v35  ;;  %v7779_v35 = vld [vmem:[%s8737_s20 + $0x2e0] ss:$16 sps:$4 sm:$0xff]  }
 0x3ab   : > { %4611 = vmatprep.subr.bf16.mxu1 %v7718_v20  ;;  %v7784_v20 = vld [vmem:[%s8737_s20 + $0x304] ss:$16 sps:$4 sm:$0xff]  }
 0x3ae   : > { %4612 = vmatpush1.bf16.msra.mxu1 %v7716_v36  ;;  %v7782_v36 = vld [vmem:[%s8737_s20 + $0x300] ss:$16 sps:$4 sm:$0xff]  }
 0x3af   : > { %4613 = vmatprep.subr.bf16.mxu1 %v7721_v37  ;;  %v7787_v37 = vld [vmem:[%s8737_s20 + $0x324] ss:$16 sps:$4 sm:$0xff]  }
 0x3b2   : > { %4614 = vmatpush1.bf16.msra.mxu1 %v7719_v38  ;;  %v7785_v38 = vld [vmem:[%s8737_s20 + $0x320] ss:$16 sps:$4 sm:$0xff]  }
 0x3b3   : > { %4615 = vmatprep.subr.bf16.mxu1 %v7724_v39  ;;  %v7790_v39 = vld [vmem:[%s8737_s20 + $0x344] ss:$16 sps:$4 sm:$0xff]  }
 0x3b6   : > { %4616 = vmatpush1.bf16.msra.mxu1 %v7722_v41  ;;  %v8858_v41 = vsub.s32 2, %v8259_v12 }
 0x3b7   : > { %4617 = vmatprep.subr.bf16.mxu1 %v7727_v42  ;;  %v7788_v42 = vld [vmem:[%s8737_s20 + $0x340] ss:$16 sps:$4 sm:$0xff]  }
 0x3ba   : > { %4618 = vmatpush1.bf16.msra.mxu1 %v7725_v45  ;;  %v8862_v45 = vsub.s32 3, %v8259_v12  ;;  %v7796_v12 = vld [vmem:[%s8737_s20 + $0x384] ss:$16 sps:$4 sm:$0xff]  }
 0x3bb   : > { %4619 = vmatprep.subr.bf16.mxu1 %v7730_v46  ;;  %v7793_v46 = vld [vmem:[%s8737_s20 + $0x364] ss:$16 sps:$4 sm:$0xff]  }
 0x3be   : > { %4620 = vmatpush1.bf16.msra.mxu1 %v7728_v49  ;;  %v3796_v49 = vrot.slane %v8823_v5, %v8858_v41 }
 0x3bf   : > { %4621 = vmatprep.subr.bf16.mxu1 %v7733_v50 }
 0x3c2   : > { %4622 = vmatpush1.bf16.msra.mxu1 %v7731_v52  ;;  %v3800_v52 = vrot.slane %v8823_v5, %v8862_v45  ;;  %v7806_v5 = vld [vmem:[%s8737_s20 + $0x8] ss:$16 sps:$4 sm:$0xff]  }
 0x3c3   : > { %4623 = vmatprep.subr.bf16.mxu1 %v7736_v55  ;;  %v7791_v55 = vld [vmem:[%s8737_s20 + $0x360] ss:$16 sps:$4 sm:$0xff]  }
 0x3c6   : > { %4624 = vmatpush1.bf16.msra.mxu1 %v7734_v56 }
 0x3c7   : > { %4625 = vmatprep.subr.bf16.mxu1 %v7739_v57 }
 0x3ca   : > { %4626 = vmatpush1.bf16.msra.mxu1 %v7737_v58 }
 0x3cb   : > { %4627 = vmatprep.subr.bf16.mxu1 %v7742_v59 }
 0x3ce   : > { %4628 = vmatpush1.bf16.msra.mxu1 %v7740_v60 }
 0x3cf   : > { %4629 = vmatprep.subr.bf16.mxu1 %v7745_v61 }
 0x3d2   : > { %4630 = vmatpush1.bf16.msra.mxu1 %v7743_v62 }
 0x3d3   : > { %4631 = vmatprep.subr.bf16.mxu1 %v7748_v63  ;;  %v7794_v63 = vld [vmem:[%s8737_s20 + $0x380] ss:$16 sps:$4 sm:$0xff]  }
 0x3d6   : > { %4632 = vmatpush1.bf16.msra.mxu1 %v7746_v0  ;;  %v7799_v0 = vld [vmem:[%s8737_s20 + $0x3a4] ss:$16 sps:$4 sm:$0xff]  }
 0x3d7   : > { %4633 = vmatprep.subr.bf16.mxu1 %v7751_v1 }
 0x3da   : > { %4634 = vmatpush1.bf16.msra.mxu1 %v7749_v16  ;;  %v7797_v16 = vld [vmem:[%s8737_s20 + $0x3a0] ss:$16 sps:$4 sm:$0xff]  }
 0x3db   : > { %4635 = vmatprep.subr.bf16.mxu1 %v7754_v40  ;;  %v7800_v40 = vld [vmem:[%s8737_s20 + $0x3c0] ss:$16 sps:$4 sm:$0xff]  }
 0x3de   : > { %4636 = vmatpush1.bf16.msra.mxu1 %v7752_v2  ;;  %v7805_v2 = vld [vmem:[%s8737_s20 + $0x3e4] ss:$16 sps:$4 sm:$0xff]  }
 0x3df   : > { %4637 = vmatprep.subr.bf16.mxu1 %v7757_v53  ;;  %v7803_v53 = vld [vmem:[%s8737_s20 + $0x3e0] ss:$16 sps:$4 sm:$0xff]  }
 0x3e2   : > { %4638 = vmatpush1.bf16.msra.mxu1 %v7755_v3 }
 0x3e3   : > { %4648 = vmatprep.subr.bf16.mxu1 %v7760_v4  ;;  %v7808_v4 = vld [vmem:[%s8737_s20 + $0xc] ss:$16 sps:$4 sm:$0xff]  }
 0x444   : > { %v3735_v7 = vpop.f32.mrb[12].mxu1 }
 0x445   : > { %v3736_v9 = vadd.f32 %v3735_v7, %v8727_v43  ;;  %v3737_v10 = vpop.f32.mrb[13].mxu1  ;;  %v7763_v43 = vld [vmem:[%s8737_s20 + $0x224] ss:$16 sps:$4 sm:$0xff]   ;;  %v7811_v7 = vld [vmem:[%s8737_s20 + $0x2c] ss:$16 sps:$4 sm:$0xff]  }
 0x446   : > { %v3738_v11 = vadd.f32 %v3737_v10, %v8730_v44  ;;  %v3739_v13 = vpop.f32.mrb[14].mxu1  ;;  %v7761_v44 = vld [vmem:[%s8737_s20 + $0x220] ss:$16 sps:$4 sm:$0xff]   ;;  %v7812_v10 = vld [vmem:[%s8737_s20 + $0x48] ss:$16 sps:$4 sm:$0xff]  }
 0x447   : > { %v3805_v14 = vadd.f32 %v3788_v6, %v3736_v9  ;;  %v3740_v15 = vpop.f32.mrb[15].mxu1  ;;  %v7814_v9 = vld [vmem:[%s8737_s20 + $0x4c] ss:$16 sps:$4 sm:$0xff]   ;;  %v7815_v13 = vld [vmem:[%s8737_s20 + $0x68] ss:$16 sps:$4 sm:$0xff]  }
 0x448   : > { %v3806_v17 = vadd.f32 %v3792_v8, %v3738_v11  ;;  %v7809_v8 = vld [vmem:[%s8737_s20 + $0x28] ss:$16 sps:$4 sm:$0xff]   ;;  %v7817_v11 = vld [vmem:[%s8737_s20 + $0x6c] ss:$16 sps:$4 sm:$0xff]  }
 0x449   : > { %v3809_v18 = vmax.f32 %v3805_v14, 0.0  ;;  %v7820_v14 = vld [vmem:[%s8737_s20 + $0x8c] ss:$16 sps:$4 sm:$0xff]   ;;  %v7818_v15 = vld [vmem:[%s8737_s20 + $0x88] ss:$16 sps:$4 sm:$0xff]  }
 0x44a   : > { %v3810_v19 = vmax.f32 %v3806_v17, 0.0  ;;  %v7823_v17 = vld [vmem:[%s8737_s20 + $0xac] ss:$16 sps:$4 sm:$0xff]  }
 0x44b   : > { %v8834_v23 = vpack.c.bf16 %v3809_v18, %v3809_v18  ;;  %v7821_v18 = vld [vmem:[%s8737_s20 + $0xa8] ss:$16 sps:$4 sm:$0xff]  }
 0x44c   : > { %v8831_v21 = vpack.c.bf16 %v3810_v19, %v3810_v19  ;;  %v7826_v19 = vld [vmem:[%s8737_s20 + $0xcc] ss:$16 sps:$4 sm:$0xff]  }
 0x44e   : > { %4639 = vmatprep.mubr.bf16.mxu1 %v8831_v21 }
 0x44f   : > { %4640 = vmatmul.mubr.bf16.vlgmr.msra.gmra.mrb[20].mxu1 %v8834_v23 }
 0x450   : > { %4649 = vmatpush1.bf16.msra.mxu1 %v7758_v22  ;;  %v7829_v22 = vld [vmem:[%s8737_s20 + $0xec] ss:$16 sps:$4 sm:$0xff]  }
 0x451   : > { %4650 = vmatprep.subr.bf16.mxu1 %v7763_v43  ;;  %v7827_v43 = vld [vmem:[%s8737_s20 + $0xe8] ss:$16 sps:$4 sm:$0xff]  }
 0x454   : > { %4651 = vmatpush1.bf16.msra.mxu1 %v7761_v44  ;;  %v7832_v44 = vld [vmem:[%s8737_s20 + $0x10c] ss:$16 sps:$4 sm:$0xff]  }
 0x455   : > { %4652 = vmatprep.subr.bf16.mxu1 %v7766_v24  ;;  %v7830_v24 = vld [vmem:[%s8737_s20 + $0x108] ss:$16 sps:$4 sm:$0xff]  }
 0x458   : > { %4653 = vmatpush1.bf16.msra.mxu1 %v7764_v25  ;;  %v7835_v25 = vld [vmem:[%s8737_s20 + $0x12c] ss:$16 sps:$4 sm:$0xff]  }
 0x459   : > { %4654 = vmatprep.subr.bf16.mxu1 %v7769_v26  ;;  %v7833_v26 = vld [vmem:[%s8737_s20 + $0x128] ss:$16 sps:$4 sm:$0xff]  }
 0x45c   : > { %4655 = vmatpush1.bf16.msra.mxu1 %v7767_v27  ;;  %v7838_v27 = vld [vmem:[%s8737_s20 + $0x14c] ss:$16 sps:$4 sm:$0xff]  }
 0x45d   : > { %4656 = vmatprep.subr.bf16.mxu1 %v7772_v28  ;;  %v7836_v28 = vld [vmem:[%s8737_s20 + $0x148] ss:$16 sps:$4 sm:$0xff]  }
 0x460   : > { %4657 = vmatpush1.bf16.msra.mxu1 %v7770_v29  ;;  %v7841_v29 = vld [vmem:[%s8737_s20 + $0x16c] ss:$16 sps:$4 sm:$0xff]  }
 0x461   : > { %4658 = vmatprep.subr.bf16.mxu1 %v7775_v30  ;;  %v7839_v30 = vld [vmem:[%s8737_s20 + $0x168] ss:$16 sps:$4 sm:$0xff]  }
 0x464   : > { %4659 = vmatpush1.bf16.msra.mxu1 %v7773_v31  ;;  %v7844_v31 = vld [vmem:[%s8737_s20 + $0x18c] ss:$16 sps:$4 sm:$0xff]  }
 0x465   : > { %4660 = vmatprep.subr.bf16.mxu1 %v7778_v32  ;;  %v7842_v32 = vld [vmem:[%s8737_s20 + $0x188] ss:$16 sps:$4 sm:$0xff]  }
 0x468   : > { %4661 = vmatpush1.bf16.msra.mxu1 %v7776_v33  ;;  %v7847_v33 = vld [vmem:[%s8737_s20 + $0x1ac] ss:$16 sps:$4 sm:$0xff]  }
 0x469   : > { %4662 = vmatprep.subr.bf16.mxu1 %v7781_v34  ;;  %v7845_v34 = vld [vmem:[%s8737_s20 + $0x1a8] ss:$16 sps:$4 sm:$0xff]  }
 0x46c   : > { %4663 = vmatpush1.bf16.msra.mxu1 %v7779_v35  ;;  %v7850_v35 = vld [vmem:[%s8737_s20 + $0x1cc] ss:$16 sps:$4 sm:$0xff]  }
 0x46d   : > { %4664 = vmatprep.subr.bf16.mxu1 %v7784_v20  ;;  %v7848_v20 = vld [vmem:[%s8737_s20 + $0x1c8] ss:$16 sps:$4 sm:$0xff]  }
 0x470   : > { %4665 = vmatpush1.bf16.msra.mxu1 %v7782_v36  ;;  %v7853_v36 = vld [vmem:[%s8737_s20 + $0x1ec] ss:$16 sps:$4 sm:$0xff]  }
 0x471   : > { %4666 = vmatprep.subr.bf16.mxu1 %v7787_v37  ;;  %v7851_v37 = vld [vmem:[%s8737_s20 + $0x1e8] ss:$16 sps:$4 sm:$0xff]  }
 0x474   : > { %4667 = vmatpush1.bf16.msra.mxu1 %v7785_v38  ;;  %v7856_v38 = vld [vmem:[%s8737_s20 + $0x20c] ss:$16 sps:$4 sm:$0xff]  }
 0x475   : > { %4668 = vmatprep.subr.bf16.mxu1 %v7790_v39  ;;  %v7854_v39 = vld [vmem:[%s8737_s20 + $0x208] ss:$16 sps:$4 sm:$0xff]  }
 0x478   : > { %v3776_v50 = vpop.f32.mrb[16].mxu1  ;;  %4669 = vmatpush1.bf16.msra.mxu1 %v7788_v42  ;;  %v7859_v42 = vld [vmem:[%s8737_s20 + $0x22c] ss:$16 sps:$4 sm:$0xff]  }
 0x479   : > { %v3777_v56 = vadd.f32 %v3776_v50, %v8739_v47  ;;  %v3778_v57 = vpop.f32.mrb[17].mxu1  ;;  %4670 = vmatprep.subr.bf16.mxu1 %v7793_v46  ;;  %v7857_v46 = vld [vmem:[%s8737_s20 + $0x228] ss:$16 sps:$4 sm:$0xff]  }
 0x47a   : > { %v3779_v58 = vadd.f32 %v3778_v57, %v8741_v48  ;;  %v3780_v59 = vpop.f32.mrb[18].mxu1  ;;  %v7802_v48 = vld [vmem:[%s8737_s20 + $0x3c4] ss:$16 sps:$4 sm:$0xff]   ;;  %v7860_v50 = vld [vmem:[%s8737_s20 + $0x248] ss:$16 sps:$4 sm:$0xff]  }
 0x47b   : > { %v3807_v60 = vadd.f32 %v3796_v49, %v3777_v56  ;;  %v3781_v61 = vpop.f32.mrb[19].mxu1  ;;  %v7862_v49 = vld [vmem:[%s8737_s20 + $0x24c] ss:$16 sps:$4 sm:$0xff]   ;;  %v7866_v56 = vld [vmem:[%s8737_s20 + $0x288] ss:$16 sps:$4 sm:$0xff]  }
 0x47c   : > { %v3808_v62 = vadd.f32 %v3800_v52, %v3779_v58  ;;  %4671 = vmatpush1.bf16.msra.mxu1 %v7791_v55  ;;  %v7865_v52 = vld [vmem:[%s8737_s20 + $0x26c] ss:$16 sps:$4 sm:$0xff]   ;;  %v7863_v55 = vld [vmem:[%s8737_s20 + $0x268] ss:$16 sps:$4 sm:$0xff]  }
 0x47d   : > { %4672 = vmatprep.subr.bf16.mxu1 %v7796_v12  ;;  %v3811_v3 = vmax.f32 %v3807_v60, 0.0  ;;  %v7871_v57 = vld [vmem:[%s8737_s20 + $0x2ac] ss:$16 sps:$4 sm:$0xff]   ;;  %v7869_v12 = vld [vmem:[%s8737_s20 + $0x2a8] ss:$16 sps:$4 sm:$0xff]  }
 0x47e   : > { %v3812_v47 = vmax.f32 %v3808_v62, 0.0  ;;  %v7874_v58 = vld [vmem:[%s8737_s20 + $0x2cc] ss:$16 sps:$4 sm:$0xff]   ;;  %v7872_v59 = vld [vmem:[%s8737_s20 + $0x2c8] ss:$16 sps:$4 sm:$0xff]  }
 0x47f   : > { %v8885_v6 = vpack.c.bf16 %v3811_v3, %v3811_v3  ;;  %v7877_v60 = vld [vmem:[%s8737_s20 + $0x2ec] ss:$16 sps:$4 sm:$0xff]   ;;  %v7875_v61 = vld [vmem:[%s8737_s20 + $0x2e8] ss:$16 sps:$4 sm:$0xff]  }
 0x480   : > { %v8875_v1 = vpack.c.bf16 %v3812_v47, %v3812_v47  ;;  %4673 = vmatpush1.bf16.msra.mxu1 %v7794_v63  ;;  %v7880_v62 = vld [vmem:[%s8737_s20 + $0x30c] ss:$16 sps:$4 sm:$0xff]   ;;  %v7878_v63 = vld [vmem:[%s8737_s20 + $0x308] ss:$16 sps:$4 sm:$0xff]  }
 0x481   : > { %4674 = vmatprep.subr.bf16.mxu1 %v7799_v0  ;;  %v7883_v0 = vld [vmem:[%s8737_s20 + $0x32c] ss:$16 sps:$4 sm:$0xff]   ;;  %v7881_v47 = vld [vmem:[%s8737_s20 + $0x328] ss:$16 sps:$4 sm:$0xff]  }
 0x482   : > { %4680 = vmatprep.mubr.bf16.mxu1 %v8875_v1  ;;  %v7895_v3 = vld [vmem:[%s8737_s20 + $0x3ac] ss:$16 sps:$4 sm:$0xff]  }
 0x484   : > { %4675 = vmatpush1.bf16.msra.mxu1 %v7797_v16  ;;  %v7884_v16 = vld [vmem:[%s8737_s20 + $0x348] ss:$16 sps:$4 sm:$0xff]  }
 0x485   : > { %4676 = vmatprep.subr.bf16.mxu1 %v7802_v48  ;;  %v7889_v48 = vld [vmem:[%s8737_s20 + $0x36c] ss:$16 sps:$4 sm:$0xff]  }
 0x488   : > { %4677 = vmatpush1.bf16.msra.mxu1 %v7800_v40  ;;  %v7887_v40 = vld [vmem:[%s8737_s20 + $0x368] ss:$16 sps:$4 sm:$0xff]  }
 0x489   : > { %4678 = vmatprep.subr.bf16.mxu1 %v7805_v2  ;;  %v7892_v2 = vld [vmem:[%s8737_s20 + $0x38c] ss:$16 sps:$4 sm:$0xff]  }
 0x48c   : > { %4679 = vmatpush1.bf16.msra.mxu1 %v7803_v53  ;;  %v7890_v53 = vld [vmem:[%s8737_s20 + $0x388] ss:$16 sps:$4 sm:$0xff]  }
 0x48d   : > { %4689 = vmatprep.subr.bf16.mxu1 %v7808_v4  ;;  %v7893_v4 = vld [vmem:[%s8737_s20 + $0x3a8] ss:$16 sps:$4 sm:$0xff]  }
 0x48f   : > { %4681 = vmatmul.mubr.bf16.vlgmr.msra.gmra.mrb[20].mxu1 %v8885_v6 }
 0x490   : > { %4690 = vmatpush1.bf16.msra.mxu1 %v7806_v5  ;;  %4721 = vmatprep.mubr.bf16.mxu1 %v8831_v21  ;;  %v7824_v21 = vld [vmem:[%s8737_s20 + $0xc8] ss:$16 sps:$4 sm:$0xff]   ;;  %v7898_v5 = vld [vmem:[%s8737_s20 + $0x3cc] ss:$16 sps:$4 sm:$0xff]  }
 0x491   : > { %4691 = vmatprep.subr.bf16.mxu1 %v7811_v7  ;;  %v7896_v7 = vld [vmem:[%s8737_s20 + $0x3c8] ss:$16 sps:$4 sm:$0xff]  }
 0x494   : > { %4692 = vmatpush1.bf16.msra.mxu1 %v7809_v8  ;;  %v7901_v8 = vld [vmem:[%s8737_s20 + $0x3ec] ss:$16 sps:$4 sm:$0xff]  }
 0x495   : > { %4693 = vmatprep.subr.bf16.mxu1 %v7814_v9  ;;  %v7899_v9 = vld [vmem:[%s8737_s20 + $0x3e8] ss:$16 sps:$4 sm:$0xff]  }
 0x498   : > { %4694 = vmatpush1.bf16.msra.mxu1 %v7812_v10  ;;  %v7904_v10 = vld [vmem:[%s8894_s19 + $0x4] ss:$16 sps:$4 sm:$0xff]  }
 0x499   : > { %4695 = vmatprep.subr.bf16.mxu1 %v7817_v11  ;;  %v7902_v11 = vld [vmem:[%s8894_s19] ss:$16 sps:$4 sm:$0xff]  }
 0x49c   : > { %4696 = vmatpush1.bf16.msra.mxu1 %v7815_v13  ;;  %v7907_v13 = vld [vmem:[%s8894_s19 + $0x24] ss:$16 sps:$4 sm:$0xff]  }
 0x49d   : > { %4697 = vmatprep.subr.bf16.mxu1 %v7820_v14  ;;  %v7905_v14 = vld [vmem:[%s8894_s19 + $0x20] ss:$16 sps:$4 sm:$0xff]  }
 0x4a0   : > { %4698 = vmatpush1.bf16.msra.mxu1 %v7818_v15  ;;  %v7910_v15 = vld [vmem:[%s8894_s19 + $0x44] ss:$16 sps:$4 sm:$0xff]  }
 0x4a1   : > { %4699 = vmatprep.subr.bf16.mxu1 %v7823_v17  ;;  %v7908_v17 = vld [vmem:[%s8894_s19 + $0x40] ss:$16 sps:$4 sm:$0xff]  }
 0x4a4   : > { %4700 = vmatpush1.bf16.msra.mxu1 %v7821_v18  ;;  %v7913_v18 = vld [vmem:[%s8894_s19 + $0x64] ss:$16 sps:$4 sm:$0xff]  }
 0x4a5   : > { %4701 = vmatprep.subr.bf16.mxu1 %v7826_v19  ;;  %v7911_v19 = vld [vmem:[%s8894_s19 + $0x60] ss:$16 sps:$4 sm:$0xff]  }
 0x4a8   : > { %4702 = vmatpush1.bf16.msra.mxu1 %v7824_v21  ;;  %v7916_v21 = vld [vmem:[%s8894_s19 + $0x84] ss:$16 sps:$4 sm:$0xff]  }
 0x4a9   : > { %4703 = vmatprep.subr.bf16.mxu1 %v7829_v22  ;;  %v7919_v22 = vld [vmem:[%s8894_s19 + $0xa4] ss:$16 sps:$4 sm:$0xff]  }
 0x4ac   : > { %4704 = vmatpush1.bf16.msra.mxu1 %v7827_v43  ;;  %v7917_v43 = vld [vmem:[%s8894_s19 + $0xa0] ss:$16 sps:$4 sm:$0xff]  }
 0x4ad   : > { %4705 = vmatprep.subr.bf16.mxu1 %v7832_v44  ;;  %v7922_v44 = vld [vmem:[%s8894_s19 + $0xc4] ss:$16 sps:$4 sm:$0xff]  }
 0x4b0   : > { %4706 = vmatpush1.bf16.msra.mxu1 %v7830_v24  ;;  %v7920_v24 = vld [vmem:[%s8894_s19 + $0xc0] ss:$16 sps:$4 sm:$0xff]  }
 0x4b1   : > { %4707 = vmatprep.subr.bf16.mxu1 %v7835_v25  ;;  %v7925_v25 = vld [vmem:[%s8894_s19 + $0xe4] ss:$16 sps:$4 sm:$0xff]  }
 0x4b4   : > { %4708 = vmatpush1.bf16.msra.mxu1 %v7833_v26  ;;  %v7923_v26 = vld [vmem:[%s8894_s19 + $0xe0] ss:$16 sps:$4 sm:$0xff]  }
 0x4b5   : > { %4709 = vmatprep.subr.bf16.mxu1 %v7838_v27  ;;  %v7928_v27 = vld [vmem:[%s8894_s19 + $0x104] ss:$16 sps:$4 sm:$0xff]  }
 0x4b8   : > { %4710 = vmatpush1.bf16.msra.mxu1 %v7836_v28  ;;  %v7926_v28 = vld [vmem:[%s8894_s19 + $0x100] ss:$16 sps:$4 sm:$0xff]  }
 0x4b9   : > { %4711 = vmatprep.subr.bf16.mxu1 %v7841_v29  ;;  %v7931_v29 = vld [vmem:[%s8894_s19 + $0x124] ss:$16 sps:$4 sm:$0xff]  }
 0x4bc   : > { %4712 = vmatpush1.bf16.msra.mxu1 %v7839_v30  ;;  %v7929_v30 = vld [vmem:[%s8894_s19 + $0x120] ss:$16 sps:$4 sm:$0xff]  }
 0x4bd   : > { %4713 = vmatprep.subr.bf16.mxu1 %v7844_v31  ;;  %v7934_v31 = vld [vmem:[%s8894_s19 + $0x144] ss:$16 sps:$4 sm:$0xff]  }
 0x4c0   : > { %4714 = vmatpush1.bf16.msra.mxu1 %v7842_v32  ;;  %v7932_v32 = vld [vmem:[%s8894_s19 + $0x140] ss:$16 sps:$4 sm:$0xff]  }
 0x4c1   : > { %4715 = vmatprep.subr.bf16.mxu1 %v7847_v33  ;;  %v7937_v33 = vld [vmem:[%s8894_s19 + $0x164] ss:$16 sps:$4 sm:$0xff]  }
 0x4c4   : > { %4716 = vmatpush1.bf16.msra.mxu1 %v7845_v34  ;;  %v7935_v34 = vld [vmem:[%s8894_s19 + $0x160] ss:$16 sps:$4 sm:$0xff]  }
 0x4c5   : > { %4717 = vmatprep.subr.bf16.mxu1 %v7850_v35  ;;  %v7940_v35 = vld [vmem:[%s8894_s19 + $0x184] ss:$16 sps:$4 sm:$0xff]  }
 0x4c8   : > { %4718 = vmatpush1.bf16.msra.mxu1 %v7848_v20  ;;  %v7938_v20 = vld [vmem:[%s8894_s19 + $0x180] ss:$16 sps:$4 sm:$0xff]  }
 0x4c9   : > { %4719 = vmatprep.subr.bf16.mxu1 %v7853_v36  ;;  %v7943_v36 = vld [vmem:[%s8894_s19 + $0x1a4] ss:$16 sps:$4 sm:$0xff]  }
 0x4cc   : > { %4720 = vmatpush1.bf16.msra.mxu1 %v7851_v37  ;;  %v7941_v37 = vld [vmem:[%s8894_s19 + $0x1a0] ss:$16 sps:$4 sm:$0xff]  }
 0x4cd   : > { %4730 = vmatprep.subr.bf16.mxu1 %v7856_v38  ;;  %v7946_v38 = vld [vmem:[%s8894_s19 + $0x1c4] ss:$16 sps:$4 sm:$0xff]  }
 0x4cf   : > { %4722 = vmatmul.mubr.bf16.vlgmr.msra.gmra.mrb[24].mxu1 %v8834_v23  ;;  %v7868_v23 = vld [vmem:[%s8737_s20 + $0x28c] ss:$16 sps:$4 sm:$0xff]  }
 0x4d0   : > { %4731 = vmatpush1.bf16.msra.mxu1 %v7854_v39  ;;  %4762 = vmatprep.mubr.bf16.mxu1 %v8875_v1  ;;  %v7886_v1 = vld [vmem:[%s8737_s20 + $0x34c] ss:$16 sps:$4 sm:$0xff]   ;;  %v7944_v39 = vld [vmem:[%s8894_s19 + $0x1c0] ss:$16 sps:$4 sm:$0xff]  }
 0x4d1   : > { %4732 = vmatprep.subr.bf16.mxu1 %v7859_v42  ;;  %v7949_v42 = vld [vmem:[%s8894_s19 + $0x1e4] ss:$16 sps:$4 sm:$0xff]  }
 0x4d4   : > { %4733 = vmatpush1.bf16.msra.mxu1 %v7857_v46  ;;  %v7947_v46 = vld [vmem:[%s8894_s19 + $0x1e0] ss:$16 sps:$4 sm:$0xff]  }
 0x4d5   : > { %4734 = vmatprep.subr.bf16.mxu1 %v7862_v49  ;;  %v7952_v49 = vld [vmem:[%s8894_s19 + $0x204] ss:$16 sps:$4 sm:$0xff]  }
 0x4d8   : > { %4735 = vmatpush1.bf16.msra.mxu1 %v7860_v50  ;;  %v8998_v50 = vld [vmem:[%s661_s22] sm:$0xf] }
 0x4d9   : > { %4736 = vmatprep.subr.bf16.mxu1 %v7865_v52  ;;  %v3950_v52 = vrot.slane %v8998_v50, %v8750_v51 }
 0x4dc   : > { %4737 = vmatpush1.bf16.msra.mxu1 %v7863_v55  ;;  %v3954_v55 = vrot.slane %v8998_v50, %v8753_v54 }
 0x4dd   : > { %4738 = vmatprep.subr.bf16.mxu1 %v7868_v23 }
 0x4e0   : > { %4739 = vmatpush1.bf16.msra.mxu1 %v7866_v56 }
 0x4e1   : > { %4740 = vmatprep.subr.bf16.mxu1 %v7871_v57 }
 0x4e4   : > { %4741 = vmatpush1.bf16.msra.mxu1 %v7869_v12 }
 0x4e5   : > { %4742 = vmatprep.subr.bf16.mxu1 %v7874_v58 }
 0x4e8   : > { %4743 = vmatpush1.bf16.msra.mxu1 %v7872_v59 }
 0x4e9   : > { %4744 = vmatprep.subr.bf16.mxu1 %v7877_v60 }
 0x4ec   : > { %4745 = vmatpush1.bf16.msra.mxu1 %v7875_v61 }
 0x4ed   : > { %4746 = vmatprep.subr.bf16.mxu1 %v7880_v62 }
 0x4f0   : > { %4747 = vmatpush1.bf16.msra.mxu1 %v7878_v63  ;;  %v7950_v63 = vld [vmem:[%s8894_s19 + $0x200] ss:$16 sps:$4 sm:$0xff]  }
 0x4f1   : > { %4748 = vmatprep.subr.bf16.mxu1 %v7883_v0 }
 0x4f4   : > { %4749 = vmatpush1.bf16.msra.mxu1 %v7881_v47  ;;  %v7955_v47 = vld [vmem:[%s8894_s19 + $0x224] ss:$16 sps:$4 sm:$0xff]  }
 0x4f5   : > { %4750 = vmatprep.subr.bf16.mxu1 %v7886_v1  ;;  %v7953_v1 = vld [vmem:[%s8894_s19 + $0x220] ss:$16 sps:$4 sm:$0xff]  }
 0x4f8   : > { %4751 = vmatpush1.bf16.msra.mxu1 %v7884_v16  ;;  %v7958_v16 = vld [vmem:[%s8894_s19 + $0x244] ss:$16 sps:$4 sm:$0xff]  }
 0x4f9   : > { %4752 = vmatprep.subr.bf16.mxu1 %v7889_v48  ;;  %v7956_v48 = vld [vmem:[%s8894_s19 + $0x240] ss:$16 sps:$4 sm:$0xff]  }
 0x4fc   : > { %4753 = vmatpush1.bf16.msra.mxu1 %v7887_v40  ;;  %v7961_v40 = vld [vmem:[%s8894_s19 + $0x264] ss:$16 sps:$4 sm:$0xff]  }
 0x4fd   : > { %4754 = vmatprep.subr.bf16.mxu1 %v7892_v2  ;;  %v7959_v2 = vld [vmem:[%s8894_s19 + $0x260] ss:$16 sps:$4 sm:$0xff]  }
 0x500   : > { %4755 = vmatpush1.bf16.msra.mxu1 %v7890_v53  ;;  %v7964_v53 = vld [vmem:[%s8894_s19 + $0x284] ss:$16 sps:$4 sm:$0xff]  }
 0x501   : > { %4756 = vmatprep.subr.bf16.mxu1 %v7895_v3  ;;  %v7962_v3 = vld [vmem:[%s8894_s19 + $0x280] ss:$16 sps:$4 sm:$0xff]  }
 0x504   : > { %4757 = vmatpush1.bf16.msra.mxu1 %v7893_v4  ;;  %v7967_v4 = vld [vmem:[%s8894_s19 + $0x2a4] ss:$16 sps:$4 sm:$0xff]  }
 0x505   : > { %4758 = vmatprep.subr.bf16.mxu1 %v7898_v5  ;;  %v7965_v5 = vld [vmem:[%s8894_s19 + $0x2a0] ss:$16 sps:$4 sm:$0xff]  }
 0x508   : > { %4759 = vmatpush1.bf16.msra.mxu1 %v7896_v7  ;;  %v7970_v7 = vld [vmem:[%s8894_s19 + $0x2c4] ss:$16 sps:$4 sm:$0xff]  }
 0x509   : > { %4760 = vmatprep.subr.bf16.mxu1 %v7901_v8  ;;  %v7968_v8 = vld [vmem:[%s8894_s19 + $0x2c0] ss:$16 sps:$4 sm:$0xff]  }
 0x50c   : > { %4761 = vmatpush1.bf16.msra.mxu1 %v7899_v9  ;;  %v7973_v9 = vld [vmem:[%s8894_s19 + $0x2e4] ss:$16 sps:$4 sm:$0xff]  }
 0x50d   : > { %5569 = vmatprep.subr.bf16.mxu1 %v7904_v10  ;;  %v7971_v10 = vld [vmem:[%s8894_s19 + $0x2e0] ss:$16 sps:$4 sm:$0xff]  }
 0x50f   : > { %4763 = vmatmul.mubr.bf16.vlgmr.msra.gmra.mrb[24].mxu1 %v8885_v6  ;;  %v7914_v6 = vld [vmem:[%s8894_s19 + $0x80] ss:$16 sps:$4 sm:$0xff]  }
 0x510   : > { %5570 = vmatpush1.bf16.msra.mxu1 %v7902_v11  ;;  %v7976_v11 = vld [vmem:[%s8894_s19 + $0x304] ss:$16 sps:$4 sm:$0xff]  }
 0x511   : > { %5571 = vmatprep.subr.bf16.mxu1 %v7907_v13  ;;  %v7974_v13 = vld [vmem:[%s8894_s19 + $0x300] ss:$16 sps:$4 sm:$0xff]  }
 0x514   : > { %5572 = vmatpush1.bf16.msra.mxu1 %v7905_v14  ;;  %v7979_v14 = vld [vmem:[%s8894_s19 + $0x324] ss:$16 sps:$4 sm:$0xff]  }
 0x515   : > { %5573 = vmatprep.subr.bf16.mxu1 %v7910_v15  ;;  %v7977_v15 = vld [vmem:[%s8894_s19 + $0x320] ss:$16 sps:$4 sm:$0xff]  }
 0x518   : > { %5574 = vmatpush1.bf16.msra.mxu1 %v7908_v17  ;;  %v7982_v17 = vld [vmem:[%s8894_s19 + $0x344] ss:$16 sps:$4 sm:$0xff]  }
 0x519   : > { %5575 = vmatprep.subr.bf16.mxu1 %v7913_v18  ;;  %v7980_v18 = vld [vmem:[%s8894_s19 + $0x340] ss:$16 sps:$4 sm:$0xff]  }
 0x51c   : > { %5576 = vmatpush1.bf16.msra.mxu1 %v7911_v19  ;;  %v7985_v19 = vld [vmem:[%s8894_s19 + $0x364] ss:$16 sps:$4 sm:$0xff]  }
 0x51d   : > { %5577 = vmatprep.subr.bf16.mxu1 %v7916_v21  ;;  %v7983_v21 = vld [vmem:[%s8894_s19 + $0x360] ss:$16 sps:$4 sm:$0xff]  }
 0x520   : > { %5578 = vmatpush1.bf16.msra.mxu1 %v7914_v6  ;;  %v7988_v6 = vld [vmem:[%s8894_s19 + $0x384] ss:$16 sps:$4 sm:$0xff]  }
 0x521   : > { %5579 = vmatprep.subr.bf16.mxu1 %v7919_v22  ;;  %v7986_v22 = vld [vmem:[%s8894_s19 + $0x380] ss:$16 sps:$4 sm:$0xff]  }
 0x524   : > { %5580 = vmatpush1.bf16.msra.mxu1 %v7917_v43  ;;  %v7991_v43 = vld [vmem:[%s8894_s19 + $0x3a4] ss:$16 sps:$4 sm:$0xff]  }
 0x525   : > { %5581 = vmatprep.subr.bf16.mxu1 %v7922_v44  ;;  %v7989_v44 = vld [vmem:[%s8894_s19 + $0x3a0] ss:$16 sps:$4 sm:$0xff]  }
 0x528   : > { %5582 = vmatpush1.bf16.msra.mxu1 %v7920_v24  ;;  %v7994_v24 = vld [vmem:[%s8894_s19 + $0x3c4] ss:$16 sps:$4 sm:$0xff]  }
 0x529   : > { %5583 = vmatprep.subr.bf16.mxu1 %v7925_v25  ;;  %v7992_v25 = vld [vmem:[%s8894_s19 + $0x3c0] ss:$16 sps:$4 sm:$0xff]  }
 0x52c   : > { %5584 = vmatpush1.bf16.msra.mxu1 %v7923_v26  ;;  %v7997_v26 = vld [vmem:[%s8894_s19 + $0x3e4] ss:$16 sps:$4 sm:$0xff]  }
 0x52d   : > { %5585 = vmatprep.subr.bf16.mxu1 %v7928_v27  ;;  %v7995_v27 = vld [vmem:[%s8894_s19 + $0x3e0] ss:$16 sps:$4 sm:$0xff]  }
 0x530   : > { %5586 = vmatpush1.bf16.msra.mxu1 %v7926_v28  ;;  %v8000_v28 = vld [vmem:[%s8894_s19 + $0xc] ss:$16 sps:$4 sm:$0xff]  }
 0x531   : > { %5587 = vmatprep.subr.bf16.mxu1 %v7931_v29  ;;  %v3958_v29 = vrot.slane %v8998_v50, %v8858_v41 }
 0x534   : > { %5588 = vmatpush1.bf16.msra.mxu1 %v7929_v30  ;;  %v3962_v30 = vrot.slane %v8998_v50, %v8862_v45  ;;  %v8006_v50 = vld [vmem:[%s8894_s19 + $0x4c] ss:$16 sps:$4 sm:$0xff]  }
 0x535   : > { %5589 = vmatprep.subr.bf16.mxu1 %v7934_v31 }
 0x538   : > { %5590 = vmatpush1.bf16.msra.mxu1 %v7932_v32 }
 0x539   : > { %5591 = vmatprep.subr.bf16.mxu1 %v7937_v33 }
 0x53c   : > { %5592 = vmatpush1.bf16.msra.mxu1 %v7935_v34 }
 0x53d   : > { %5593 = vmatprep.subr.bf16.mxu1 %v7940_v35 }
 0x540   : > { %5594 = vmatpush1.bf16.msra.mxu1 %v7938_v20 }
 0x541   : > { %5595 = vmatprep.subr.bf16.mxu1 %v7943_v36 }
 0x544   : > { %5596 = vmatpush1.bf16.msra.mxu1 %v7941_v37 }
 0x545   : > { %5597 = vmatprep.subr.bf16.mxu1 %v7946_v38 }
 0x548   : > { %5598 = vmatpush1.bf16.msra.mxu1 %v7944_v39  ;;  %v7998_v39 = vld [vmem:[%s8894_s19 + $0x8] ss:$16 sps:$4 sm:$0xff]  }
 0x549   : > { %5599 = vmatprep.subr.bf16.mxu1 %v7949_v42 }
 0x54c   : > { %5600 = vmatpush1.bf16.msra.mxu1 %v7947_v46  ;;  %v8003_v46 = vld [vmem:[%s8894_s19 + $0x2c] ss:$16 sps:$4 sm:$0xff]  }
 0x54d   : > { %5610 = vmatprep.subr.bf16.mxu1 %v7952_v49  ;;  %v8001_v49 = vld [vmem:[%s8894_s19 + $0x28] ss:$16 sps:$4 sm:$0xff]  }
 0x562   : > { %v4682_v23 = vpop.f32.mrb[20].mxu1 }
 0x563   : > { %v7054_v56 = vadd.f32 %v4682_v23, %v3950_v52  ;;  %v4684_v57 = vpop.f32.mrb[21].mxu1  ;;  %v8004_v52 = vld [vmem:[%s8894_s19 + $0x48] ss:$16 sps:$4 sm:$0xff]  }
 0x564   : > { %v7055_v12 = vadd.f32 %v4684_v57, %v3954_v55  ;;  %v4686_v58 = vpop.f32.mrb[22].mxu1  ;;  %v8009_v55 = vld [vmem:[%s8894_s19 + $0x6c] ss:$16 sps:$4 sm:$0xff]   ;;  %v8007_v23 = vld [vmem:[%s8894_s19 + $0x68] ss:$16 sps:$4 sm:$0xff]  }
 0x565   : > { %v4771_v59 = vmax.f32 %v7054_v56, 0.0  ;;  %v4687_v60 = vpop.f32.mrb[23].mxu1  ;;  %v8012_v56 = vld [vmem:[%s8894_s19 + $0x8c] ss:$16 sps:$4 sm:$0xff]   ;;  %v8010_v57 = vld [vmem:[%s8894_s19 + $0x88] ss:$16 sps:$4 sm:$0xff]  }
 0x566   : > { %v4772_v61 = vmax.f32 %v7055_v12, 0.0  ;;  %v8015_v12 = vld [vmem:[%s8894_s19 + $0xac] ss:$16 sps:$4 sm:$0xff]   ;;  %v8013_v58 = vld [vmem:[%s8894_s19 + $0xa8] ss:$16 sps:$4 sm:$0xff]  }
 0x567   : > { %v9007_v0 = vpack.c.bf16 %v4771_v59, %v4771_v59  ;;  %v8018_v59 = vld [vmem:[%s8894_s19 + $0xcc] ss:$16 sps:$4 sm:$0xff]   ;;  %v8016_v60 = vld [vmem:[%s8894_s19 + $0xc8] ss:$16 sps:$4 sm:$0xff]  }
 0x568   : > { %v9004_v62 = vpack.c.bf16 %v4772_v61, %v4772_v61  ;;  %v8021_v61 = vld [vmem:[%s8894_s19 + $0xec] ss:$16 sps:$4 sm:$0xff]  }
 0x56a   : > { %5601 = vmatprep.mubr.bf16.mxu1 %v9004_v62 }
 0x56b   : > { %5602 = vmatmul.mubr.bf16.vlgmr.msra.gmra.mrb[28].mxu1 %v9007_v0 }
 0x56c   : > { %5611 = vmatpush1.bf16.msra.mxu1 %v7950_v63  ;;  %v8024_v63 = vld [vmem:[%s8894_s19 + $0x10c] ss:$16 sps:$4 sm:$0xff]  }
 0x56d   : > { %5612 = vmatprep.subr.bf16.mxu1 %v7955_v47  ;;  %v8022_v47 = vld [vmem:[%s8894_s19 + $0x108] ss:$16 sps:$4 sm:$0xff]  }
 0x570   : > { %5613 = vmatpush1.bf16.msra.mxu1 %v7953_v1  ;;  %v8027_v1 = vld [vmem:[%s8894_s19 + $0x12c] ss:$16 sps:$4 sm:$0xff]  }
 0x571   : > { %5614 = vmatprep.subr.bf16.mxu1 %v7958_v16  ;;  %v8025_v16 = vld [vmem:[%s8894_s19 + $0x128] ss:$16 sps:$4 sm:$0xff]  }
 0x574   : > { %5615 = vmatpush1.bf16.msra.mxu1 %v7956_v48  ;;  %v8030_v48 = vld [vmem:[%s8894_s19 + $0x14c] ss:$16 sps:$4 sm:$0xff]  }
 0x575   : > { %5616 = vmatprep.subr.bf16.mxu1 %v7961_v40  ;;  %v8028_v40 = vld [vmem:[%s8894_s19 + $0x148] ss:$16 sps:$4 sm:$0xff]  }
 0x578   : > { %5617 = vmatpush1.bf16.msra.mxu1 %v7959_v2  ;;  %v8033_v2 = vld [vmem:[%s8894_s19 + $0x16c] ss:$16 sps:$4 sm:$0xff]  }
 0x579   : > { %5618 = vmatprep.subr.bf16.mxu1 %v7964_v53  ;;  %v8031_v53 = vld [vmem:[%s8894_s19 + $0x168] ss:$16 sps:$4 sm:$0xff]  }
 0x57c   : > { %5619 = vmatpush1.bf16.msra.mxu1 %v7962_v3  ;;  %v8036_v3 = vld [vmem:[%s8894_s19 + $0x18c] ss:$16 sps:$4 sm:$0xff]  }
 0x57d   : > { %5620 = vmatprep.subr.bf16.mxu1 %v7967_v4  ;;  %v8034_v4 = vld [vmem:[%s8894_s19 + $0x188] ss:$16 sps:$4 sm:$0xff]  }
 0x580   : > { %5621 = vmatpush1.bf16.msra.mxu1 %v7965_v5  ;;  %v8039_v5 = vld [vmem:[%s8894_s19 + $0x1ac] ss:$16 sps:$4 sm:$0xff]  }
 0x581   : > { %5622 = vmatprep.subr.bf16.mxu1 %v7970_v7  ;;  %v8037_v7 = vld [vmem:[%s8894_s19 + $0x1a8] ss:$16 sps:$4 sm:$0xff]  }
 0x584   : > { %5623 = vmatpush1.bf16.msra.mxu1 %v7968_v8  ;;  %v8042_v8 = vld [vmem:[%s8894_s19 + $0x1cc] ss:$16 sps:$4 sm:$0xff]  }
 0x585   : > { %5624 = vmatprep.subr.bf16.mxu1 %v7973_v9  ;;  %v8040_v9 = vld [vmem:[%s8894_s19 + $0x1c8] ss:$16 sps:$4 sm:$0xff]  }
 0x588   : > { %5625 = vmatpush1.bf16.msra.mxu1 %v7971_v10  ;;  %v8045_v10 = vld [vmem:[%s8894_s19 + $0x1ec] ss:$16 sps:$4 sm:$0xff]  }
 0x589   : > { %5626 = vmatprep.subr.bf16.mxu1 %v7976_v11  ;;  %v8043_v11 = vld [vmem:[%s8894_s19 + $0x1e8] ss:$16 sps:$4 sm:$0xff]  }
 0x58c   : > { %5627 = vmatpush1.bf16.msra.mxu1 %v7974_v13  ;;  %v8048_v13 = vld [vmem:[%s8894_s19 + $0x20c] ss:$16 sps:$4 sm:$0xff]  }
 0x58d   : > { %5628 = vmatprep.subr.bf16.mxu1 %v7979_v14  ;;  %v8046_v14 = vld [vmem:[%s8894_s19 + $0x208] ss:$16 sps:$4 sm:$0xff]  }
 0x590   : > { %5629 = vmatpush1.bf16.msra.mxu1 %v7977_v15  ;;  %v8051_v15 = vld [vmem:[%s8894_s19 + $0x22c] ss:$16 sps:$4 sm:$0xff]  }
 0x591   : > { %5630 = vmatprep.subr.bf16.mxu1 %v7982_v17  ;;  %v8049_v17 = vld [vmem:[%s8894_s19 + $0x228] ss:$16 sps:$4 sm:$0xff]  }
 0x594   : > { %5631 = vmatpush1.bf16.msra.mxu1 %v7980_v18  ;;  %v8054_v18 = vld [vmem:[%s8894_s19 + $0x24c] ss:$16 sps:$4 sm:$0xff]  }
 0x595   : > { %5632 = vmatprep.subr.bf16.mxu1 %v7985_v19  ;;  %v8052_v19 = vld [vmem:[%s8894_s19 + $0x248] ss:$16 sps:$4 sm:$0xff]  }
 0x598   : > { %5633 = vmatpush1.bf16.msra.mxu1 %v7983_v21  ;;  %v8057_v21 = vld [vmem:[%s8894_s19 + $0x26c] ss:$16 sps:$4 sm:$0xff]  }
 0x599   : > { %5634 = vmatprep.subr.bf16.mxu1 %v7988_v6  ;;  %v8055_v6 = vld [vmem:[%s8894_s19 + $0x268] ss:$16 sps:$4 sm:$0xff]  }
 0x59c   : > { %5635 = vmatpush1.bf16.msra.mxu1 %v7986_v22  ;;  %v8058_v22 = vld [vmem:[%s8894_s19 + $0x288] ss:$16 sps:$4 sm:$0xff]  }
 0x59d   : > { %5636 = vmatprep.subr.bf16.mxu1 %v7991_v43  ;;  %v8063_v43 = vld [vmem:[%s8894_s19 + $0x2ac] ss:$16 sps:$4 sm:$0xff]  }
 0x5a0   : > { %5637 = vmatpush1.bf16.msra.mxu1 %v7989_v44  ;;  %v8061_v44 = vld [vmem:[%s8894_s19 + $0x2a8] ss:$16 sps:$4 sm:$0xff]  }
 0x5a1   : > { %5638 = vmatprep.subr.bf16.mxu1 %v7994_v24  ;;  %v8066_v24 = vld [vmem:[%s8894_s19 + $0x2cc] ss:$16 sps:$4 sm:$0xff]  }
 0x5a4   : > { %5639 = vmatpush1.bf16.msra.mxu1 %v7992_v25  ;;  %v8064_v25 = vld [vmem:[%s8894_s19 + $0x2c8] ss:$16 sps:$4 sm:$0xff]  }
 0x5a5   : > { %5640 = vmatprep.subr.bf16.mxu1 %v7997_v26  ;;  %v8069_v26 = vld [vmem:[%s8894_s19 + $0x2ec] ss:$16 sps:$4 sm:$0xff]  }
 0x5a8   : > { %5641 = vmatpush1.bf16.msra.mxu1 %v7995_v27  ;;  %v8067_v27 = vld [vmem:[%s8894_s19 + $0x2e8] ss:$16 sps:$4 sm:$0xff]  }
 0x5a9   : > { %5651 = vmatprep.subr.bf16.mxu1 %v8000_v28  ;;  %v8072_v28 = vld [vmem:[%s8894_s19 + $0x30c] ss:$16 sps:$4 sm:$0xff]  }
 0x5e2   : > { %v4764_v31 = vpop.f32.mrb[24].mxu1 }
 0x5e3   : > { %v7056_v32 = vadd.f32 %v4764_v31, %v3958_v29  ;;  %v4766_v33 = vpop.f32.mrb[25].mxu1  ;;  %v8110_v29 = vld [vmem:[%s9060_s14 + $0xc0] sm:$0xff]   ;;  %v8112_v31 = vld [vmem:[%s9060_s14 + $0xc8] sm:$0xff]  }
 0x5e4   : > { %v7057_v34 = vadd.f32 %v4766_v33, %v3962_v30  ;;  %v4768_v35 = vpop.f32.mrb[26].mxu1  ;;  %v8111_v30 = vld [vmem:[%s9060_s14 + $0x80] sm:$0xff]   ;;  %v8075_v33 = vld [vmem:[%s8894_s19 + $0x32c] ss:$16 sps:$4 sm:$0xff]   ;;  %7028 = vmatprep.subr.bf16.mxu0 %v8110_v29 }
 0x5e5   : > { %v4773_v20 = vmax.f32 %v7056_v32, 0.0  ;;  %v4769_v36 = vpop.f32.mrb[27].mxu1  ;;  %v8070_v32 = vld [vmem:[%s8894_s19 + $0x308] ss:$16 sps:$4 sm:$0xff]   ;;  %7029 = vmatpush3.bf16.msra.mxu0 %v8111_v30  ;;  %v8114_v35 = vld [vmem:[%s9060_s14 + $0xd0] sm:$0xff]  }
 0x5e6   : > { %v4774_v37 = vmax.f32 %v7057_v34, 0.0  ;;  %v8113_v34 = vld [vmem:[%s9060_s14 + $0x88] sm:$0xff]   ;;  %7030 = vmatprep.subr.bf16.mxu0 %v8112_v31 }
 0x5e7   : > { %v9049_v42 = vpack.c.bf16 %v4773_v20, %v4773_v20  ;;  %v8073_v20 = vld [vmem:[%s8894_s19 + $0x328] ss:$16 sps:$4 sm:$0xff]   ;;  %v8078_v36 = vld [vmem:[%s8894_s19 + $0x34c] ss:$16 sps:$4 sm:$0xff]  }
 0x5e8   : > { %v9046_v38 = vpack.c.bf16 %v4774_v37, %v4774_v37  ;;  %v8115_v37 = vld [vmem:[%s9060_s14 + $0x90] sm:$0xff]  }
 0x5e9   : > { %7031 = vmatpush3.bf16.msra.mxu0 %v8113_v34 }
 0x5ea   : > { %5642 = vmatprep.mubr.bf16.mxu1 %v9046_v38  ;;  %7032 = vmatprep.subr.bf16.mxu0 %v8114_v35 }
 0x5eb   : > { %5643 = vmatmul.mubr.bf16.vlgmr.msra.gmra.mrb[28].mxu1 %v9049_v42 }
 0x5ec   : > { %5652 = vmatpush1.bf16.msra.mxu1 %v7998_v39  ;;  %5683 = vmatprep.mubr.bf16.mxu1 %v9004_v62  ;;  %v8019_v62 = vld [vmem:[%s8894_s19 + $0xe8] ss:$16 sps:$4 sm:$0xff]  }
 0x5ed   : > { %5653 = vmatprep.subr.bf16.mxu1 %v8003_v46  ;;  %v8076_v39 = vld [vmem:[%s8894_s19 + $0x348] ss:$16 sps:$4 sm:$0xff]   ;;  %v8081_v46 = vld [vmem:[%s8894_s19 + $0x36c] ss:$16 sps:$4 sm:$0xff]   ;;  %7033 = vmatpush3.bf16.msra.mxu0 %v8115_v37 }
 0x5f0   : > { %5654 = vmatpush1.bf16.msra.mxu1 %v8001_v49  ;;  %v8117_v49 = vld [vmem:[%s9060_s14 + $0x98] sm:$0xff]  }
 0x5f1   : > { %5655 = vmatprep.subr.bf16.mxu1 %v8006_v50  ;;  %v8118_v50 = vld [vmem:[%s9060_s14 + $0xe0] sm:$0xff]  }
 0x5f4   : > { %5656 = vmatpush1.bf16.msra.mxu1 %v8004_v52  ;;  %v8079_v52 = vld [vmem:[%s8894_s19 + $0x368] ss:$16 sps:$4 sm:$0xff]  }
 0x5f5   : > { %5657 = vmatprep.subr.bf16.mxu1 %v8009_v55  ;;  %v8084_v55 = vld [vmem:[%s8894_s19 + $0x38c] ss:$16 sps:$4 sm:$0xff]  }
 0x5f8   : > { %5658 = vmatpush1.bf16.msra.mxu1 %v8007_v23  ;;  %v8119_v23 = vld [vmem:[%s9060_s14 + $0xa0] sm:$0xff]  }
 0x5f9   : > { %5659 = vmatprep.subr.bf16.mxu1 %v8012_v56  ;;  %v8120_v56 = vld [vmem:[%s9060_s14 + $0xe8] sm:$0xff]  }
 0x5fc   : > { %5660 = vmatpush1.bf16.msra.mxu1 %v8010_v57  ;;  %v8082_v57 = vld [vmem:[%s8894_s19 + $0x388] ss:$16 sps:$4 sm:$0xff]  }
 0x5fd   : > { %5661 = vmatprep.subr.bf16.mxu1 %v8015_v12  ;;  %v8087_v12 = vld [vmem:[%s8894_s19 + $0x3ac] ss:$16 sps:$4 sm:$0xff]  }
 0x600   : > { %5662 = vmatpush1.bf16.msra.mxu1 %v8013_v58  ;;  %v8121_v58 = vld [vmem:[%s9060_s14 + $0xa8] sm:$0xff]  }
 0x601   : > { %5663 = vmatprep.subr.bf16.mxu1 %v8018_v59  ;;  %v8085_v59 = vld [vmem:[%s8894_s19 + $0x3a8] ss:$16 sps:$4 sm:$0xff]  }
 0x604   : > { %5664 = vmatpush1.bf16.msra.mxu1 %v8016_v60  ;;  %v8090_v60 = vld [vmem:[%s8894_s19 + $0x3cc] ss:$16 sps:$4 sm:$0xff]  }
 0x605   : > { %5665 = vmatprep.subr.bf16.mxu1 %v8021_v61  ;;  %v8088_v61 = vld [vmem:[%s8894_s19 + $0x3c8] ss:$16 sps:$4 sm:$0xff]  }
 0x608   : > { %5666 = vmatpush1.bf16.msra.mxu1 %v8019_v62  ;;  %v8093_v62 = vld [vmem:[%s8894_s19 + $0x3ec] ss:$16 sps:$4 sm:$0xff]  }
 0x609   : > { %5667 = vmatprep.subr.bf16.mxu1 %v8024_v63  ;;  %v8091_v63 = vld [vmem:[%s8894_s19 + $0x3e8] ss:$16 sps:$4 sm:$0xff]  }
 0x60c   : > { %5668 = vmatpush1.bf16.msra.mxu1 %v8022_v47  ;;  %v8094_v47 = vld [vmem:[%s9060_s14 + $0x40] sm:$0xff]  }
 0x60d   : > { %5669 = vmatprep.subr.bf16.mxu1 %v8027_v1  ;;  %v8095_v1 = vld [vmem:[%s9060_s14] sm:$0xff]  }
 0x610   : > { %5670 = vmatpush1.bf16.msra.mxu1 %v8025_v16  ;;  %v8096_v16 = vld [vmem:[%s9060_s14 + $0x48] sm:$0xff]  }
 0x611   : > { %5671 = vmatprep.subr.bf16.mxu1 %v8030_v48  ;;  %v8097_v48 = vld [vmem:[%s9060_s14 + $0x8] sm:$0xff]  }
 0x614   : > { %5672 = vmatpush1.bf16.msra.mxu1 %v8028_v40  ;;  %v8098_v40 = vld [vmem:[%s9060_s14 + $0x50] sm:$0xff]  }
 0x615   : > { %5673 = vmatprep.subr.bf16.mxu1 %v8033_v2  ;;  %v8099_v2 = vld [vmem:[%s9060_s14 + $0x10] sm:$0xff]  }
 0x618   : > { %5674 = vmatpush1.bf16.msra.mxu1 %v8031_v53  ;;  %v8100_v53 = vld [vmem:[%s9060_s14 + $0x58] sm:$0xff]  }
 0x619   : > { %5675 = vmatprep.subr.bf16.mxu1 %v8036_v3  ;;  %v8101_v3 = vld [vmem:[%s9060_s14 + $0x18] sm:$0xff]  }
 0x61c   : > { %5676 = vmatpush1.bf16.msra.mxu1 %v8034_v4  ;;  %v8102_v4 = vld [vmem:[%s9060_s14 + $0x60] sm:$0xff]  }
 0x61d   : > { %5677 = vmatprep.subr.bf16.mxu1 %v8039_v5  ;;  %v8104_v5 = vld [vmem:[%s9060_s14 + $0x68] sm:$0xff]  }
 0x620   : > { %5678 = vmatpush1.bf16.msra.mxu1 %v8037_v7  ;;  %v8105_v7 = vld [vmem:[%s9060_s14 + $0x28] sm:$0xff]  }
 0x621   : > { %5679 = vmatprep.subr.bf16.mxu1 %v8042_v8  ;;  %v8106_v8 = vld [vmem:[%s9060_s14 + $0x70] sm:$0xff]  }
 0x624   : > { %5680 = vmatpush1.bf16.msra.mxu1 %v8040_v9  ;;  %v8107_v9 = vld [vmem:[%s9060_s14 + $0x30] sm:$0xff]  }
 0x625   : > { %5681 = vmatprep.subr.bf16.mxu1 %v8045_v10  ;;  %v8108_v10 = vld [vmem:[%s9060_s14 + $0x78] sm:$0xff]  }
 0x628   : > { %5682 = vmatpush1.bf16.msra.mxu1 %v8043_v11  ;;  %v8109_v11 = vld [vmem:[%s9060_s14 + $0x38] sm:$0xff]  }
 0x629   : > { %5692 = vmatprep.subr.bf16.mxu1 %v8048_v13  ;;  %v4907_v13 = vld [vmem:[%s670_s18] sm:$0xf] }
 0x62b   : > { %5684 = vmatmul.mubr.bf16.vlgmr.msra.gmra.mrb[32].mxu1 %v9007_v0  ;;  %v8060_v0 = vld [vmem:[%s8894_s19 + $0x28c] ss:$16 sps:$4 sm:$0xff]  }
 0x62c   : > { %5693 = vmatpush1.bf16.msra.mxu1 %v8046_v14  ;;  %5724 = vmatprep.mubr.bf16.mxu1 %v9046_v38  ;;  %v8116_v38 = vld [vmem:[%s9060_s14 + $0xd8] sm:$0xff]   ;;  %v4912_v14 = vrot.slane %v4907_v13, %v8750_v51 }
 0x62d   : > { %5694 = vmatprep.subr.bf16.mxu1 %v8051_v15  ;;  %7034 = vmatprep.subr.bf16.mxu0 %v8116_v38  ;;  %v4916_v15 = vrot.slane %v4907_v13, %v8753_v54  ;;  %v4920_v54 = vrot.slane %v4907_v13, %v8858_v41 }
 0x62e   : > { %7035 = vmatpush3.bf16.msra.mxu0 %v8117_v49 }
 0x62f   : > { %7036 = vmatprep.subr.bf16.mxu0 %v8118_v50 }
 0x630   : > { %5695 = vmatpush1.bf16.msra.mxu1 %v8049_v17  ;;  %v8122_v17 = vld [vmem:[%s9060_s14 + $0xf0] sm:$0xff]  }
 0x631   : > { %5696 = vmatprep.subr.bf16.mxu1 %v8054_v18 }
 0x632   : > { %7037 = vmatpush3.bf16.msra.mxu0 %v8119_v23 }
 0x633   : > { %7038 = vmatprep.subr.bf16.mxu0 %v8120_v56 }
 0x634   : > { %5697 = vmatpush1.bf16.msra.mxu1 %v8052_v19  ;;  %v8123_v19 = vld [vmem:[%s9060_s14 + $0xb0] sm:$0xff]  }
 0x635   : > { %5698 = vmatprep.subr.bf16.mxu1 %v8057_v21 }
 0x636   : > { %7039 = vmatpush3.bf16.msra.mxu0 %v8121_v58 }
 0x637   : > { %7040 = vmatprep.subr.bf16.mxu0 %v8122_v17 }
 0x638   : > { %5699 = vmatpush1.bf16.msra.mxu1 %v8055_v6 }
 0x639   : > { %5700 = vmatprep.subr.bf16.mxu1 %v8060_v0 }
 0x63a   : > { %7041 = vmatpush3.bf16.msra.mxu0 %v8123_v19 }
 0x63c   : > { %5701 = vmatpush1.bf16.msra.mxu1 %v8058_v22 }
 0x63d   : > { %5702 = vmatprep.subr.bf16.mxu1 %v8063_v43 }
 0x640   : > { %5703 = vmatpush1.bf16.msra.mxu1 %v8061_v44 }
 0x641   : > { %5704 = vmatprep.subr.bf16.mxu1 %v8066_v24  ;;  %v8124_v24 = vld [vmem:[%s9060_s14 + $0xf8] sm:$0xff]  }
 0x642   : > { %7042 = vmatprep.subr.bf16.mxu0 %v8124_v24 }
 0x644   : > { %5705 = vmatpush1.bf16.msra.mxu1 %v8064_v25 }
 0x645   : > { %5706 = vmatprep.subr.bf16.mxu1 %v8069_v26  ;;  %v8125_v26 = vld [vmem:[%s9060_s14 + $0xb8] sm:$0xff]  }
 0x646   : > { %7043 = vmatpush3.bf16.msra.mxu0 %v8125_v26 }
 0x648   : > { %5707 = vmatpush1.bf16.msra.mxu1 %v8067_v27 }
 0x649   : > { %5708 = vmatprep.subr.bf16.mxu1 %v8072_v28  ;;  %v4924_v28 = vrot.slane %v4907_v13, %v8862_v45  ;;  %v6967_v45 = vld [vmem:[%s678_s15] ss:$0 sm:$0xff] }
 0x64c   : > { %5709 = vmatpush1.bf16.msra.mxu1 %v8070_v32 }
 0x64d   : > { %5710 = vmatprep.subr.bf16.mxu1 %v8075_v33 }
 0x650   : > { %5711 = vmatpush1.bf16.msra.mxu1 %v8073_v20 }
 0x651   : > { %5712 = vmatprep.subr.bf16.mxu1 %v8078_v36 }
 0x654   : > { %5713 = vmatpush1.bf16.msra.mxu1 %v8076_v39 }
 0x655   : > { %5714 = vmatprep.subr.bf16.mxu1 %v8081_v46 }
 0x658   : > { %5715 = vmatpush1.bf16.msra.mxu1 %v8079_v52 }
 0x659   : > { %5716 = vmatprep.subr.bf16.mxu1 %v8084_v55 }
 0x65c   : > { %5717 = vmatpush1.bf16.msra.mxu1 %v8082_v57 }
 0x65d   : > { %5718 = vmatprep.subr.bf16.mxu1 %v8087_v12 }
 0x660   : > { %5719 = vmatpush1.bf16.msra.mxu1 %v8085_v59 }
 0x661   : > { %5720 = vmatprep.subr.bf16.mxu1 %v8090_v60 }
 0x664   : > { %5721 = vmatpush1.bf16.msra.mxu1 %v8088_v61 }
 0x665   : > { %5722 = vmatprep.subr.bf16.mxu1 %v8093_v62 }
 0x668   : > { %5723 = vmatpush1.bf16.msra.mxu1 %v8091_v63 }
 0x669   : > { %7006 = vmatprep.subr.bf16.mxu1 %v8094_v47 }
 0x66b   : > { %5725 = vmatmul.mubr.bf16.vlgmr.msra.gmra.mrb[32].mxu1 %v9049_v42  ;;  %v8103_v42 = vld [vmem:[%s9060_s14 + $0x20] sm:$0xff]  }
 0x66c   : > { %7007 = vmatpush3.bf16.msra.mxu1 %v8095_v1 }
 0x66d   : > { %7008 = vmatprep.subr.bf16.mxu1 %v8096_v16 }
 0x670   : > { %7009 = vmatpush3.bf16.msra.mxu1 %v8097_v48 }
 0x671   : > { %7010 = vmatprep.subr.bf16.mxu1 %v8098_v40 }
 0x674   : > { %7011 = vmatpush3.bf16.msra.mxu1 %v8099_v2 }
 0x675   : > { %7012 = vmatprep.subr.bf16.mxu1 %v8100_v53 }
 0x678   : > { %7013 = vmatpush3.bf16.msra.mxu1 %v8101_v3 }
 0x679   : > { %7014 = vmatprep.subr.bf16.mxu1 %v8102_v4 }
 0x67c   : > { %7015 = vmatpush3.bf16.msra.mxu1 %v8103_v42 }
 0x67d   : > { %7016 = vmatprep.subr.bf16.mxu1 %v8104_v5 }
 0x680   : > { %7017 = vmatpush3.bf16.msra.mxu1 %v8105_v7 }
 0x681   : > { %7018 = vmatprep.subr.bf16.mxu1 %v8106_v8 }
 0x684   : > { %7019 = vmatpush3.bf16.msra.mxu1 %v8107_v9 }
 0x685   : > { %7020 = vmatprep.subr.bf16.mxu1 %v8108_v10 }
 0x688   : > { %7021 = vmatpush3.bf16.msra.mxu1 %v8109_v11 }
 0x6be   : > { %v5644_v18 = vpop.f32.mrb[28].mxu1 }
 0x6bf   : > { %v7058_v21 = vadd.f32 %v5644_v18, %v4912_v14  ;;  %v5646_v6 = vpop.f32.mrb[29].mxu1 }
 0x6c0   : > { %v7059_v0 = vadd.f32 %v5646_v6, %v4916_v15  ;;  %v5648_v22 = vpop.f32.mrb[30].mxu1 }
 0x6c1   : > { %v5733_v43 = vmax.f32 %v7058_v21, 0.0  ;;  %v5649_v44 = vpop.f32.mrb[31].mxu1 }
 0x6c2   : > { %v5734_v25 = vmax.f32 %v7059_v0, 0.0 }
 0x6c3   : > { %v5737_v51 = vpack.c.bf16 %v5733_v43, %v5733_v43 }
 0x6c4   : > { %v5738_v27 = vpack.c.bf16 %v5734_v25, %v5734_v25 }
 0x6c6   : > { %6036 = vmatprep.mubr.bf16.mxu1 %v5738_v27 }
 0x6c7   : > { %6037 = vmatmul.mubr.bf16.vlgmr.msra.gmra.mrb[36].mxu1 %v5737_v51 }
 0x73e   : > { %v5726_v29 = vpop.f32.mrb[32].mxu1 }
 0x73f   : > { %v7060_v30 = vadd.f32 %v5726_v29, %v4920_v54  ;;  %v5728_v31 = vpop.f32.mrb[33].mxu1 }
 0x740   : > { %v7061_v32 = vadd.f32 %v5728_v31, %v4924_v28  ;;  %v5730_v33 = vpop.f32.mrb[34].mxu1 }
 0x741   : > { %v5735_v34 = vmax.f32 %v7060_v30, 0.0  ;;  %v5731_v35 = vpop.f32.mrb[35].mxu1 }
 0x742   : > { %v5736_v20 = vmax.f32 %v7061_v32, 0.0 }
 0x743   : > { %v5739_v37 = vpack.c.bf16 %v5735_v34, %v5735_v34 }
 0x744   : > { %v5740_v36 = vpack.c.bf16 %v5736_v20, %v5736_v20 }
 0x746   : > { %6076 = vmatprep.mubr.bf16.mxu0 %v5740_v36 }
 0x747   : > { %6077 = vmatmul.mubr.bf16.vlgmr.msra.gmra.mrb[4].mxu0 %v5739_v37 }
 0x79a   : > { %v7022_v38 = vpop.f32.mrb[36].mxu1 }
 0x79b   : > { %v7023_v39 = vpop.f32.mrb[37].mxu1 }
 0x79c   : > { %v7024_v46 = vadd.f32 %v7023_v39, %v7022_v38  ;;  %v7025_v41 = vpop.f32.mrb[38].mxu1 }
 0x79d   : > { %v7026_v49 = vpop.f32.mrb[39].mxu1 }
 0x79e   : > { %v6039_v55 = vadd.f32 %v7024_v46, %v6967_v45 }
 0x81a   : > { %v7044_v50 = vpop.f32.mrb[4].mxu0 }
 0x81b   : > { %v7045_v52 = vpop.f32.mrb[5].mxu0 }
 0x81c   : > { %v7046_v23 = vadd.f32 %v7045_v52, %v7044_v50  ;;  %v7047_v56 = vpop.f32.mrb[6].mxu0 }
 0x81d   : > { %v7048_v57 = vpop.f32.mrb[7].mxu0 }
 0x81e   : > { %v6079_v12 = vadd.f32 %v7046_v23, %v6039_v55 }
 0x820   : > { %6085 = vst.msk [vmem:[%s685_s23] sm:$0x3] %vm6084_vm5, %v6079_v12 }
 0x821 PF: > { %s23_s27 = sadd.s32 1, %s8148_s27   ;;  %s9197_s25 = smov %s8144_s26 }
 0x822   : > { %p20_p5 = scmp.ge.s32.totalorder %s23_s27, 4   ;;  %s9198_s26 = smov %s9200_s28 }
 0x824   :  { %22 = sbr.rel (!%p20_p5) target bundleno = 2 (0x2), region = 138 }

</bundles_post_ra>
